<compile_context>
chip_gen: v7x
topology: tpu7x:2x2x1
jax: 0.10.0
libtpu: 0.0.40
codegen_flags: <defaults>
</compile_context>

<pallas_src>
import functools

import jax
import jax.numpy as jnp
from jax import lax
from jax.experimental import pallas as pl
from jax.experimental.pallas import tpu as pltpu

HIDDEN = 1024   # fixed by the module definition
H_CHUNK = 256   # hidden-dim chunk processed per inner iteration


def _round_up(x, m):
    return -(-x // m) * m


def _encoder_kernel(x_ref, w1_ref, b1_ref, w2_ref, b2_ref, o_ref):
    # x_ref : (C, tile)     f32   pixel tile, channel-major (pixels on lanes)
    # w1_ref: (HIDDEN, C)   bf16  conv1 weight (PyTorch (out, in) layout)
    # b1_ref: (HIDDEN, 1)   f32
    # w2_ref: (L, HIDDEN)   bf16  conv2 weight
    # b2_ref: (L, 1)        f32
    # o_ref : (L, tile)     f32   lane-dense output block (tile % 128 == 0)
    x = x_ref[...].astype(jnp.bfloat16)          # (C, tile) MXU operand
    tile = x.shape[1]
    L = o_ref.shape[0]
    n_chunks = w1_ref.shape[0] // H_CHUNK

    def chunk(i, acc):
        hk = pl.multiple_of(i * H_CHUNK, H_CHUNK)

        # ---- conv1 chunk on the MXU (K = C is tiny, padded internally) -----
        h = jnp.dot(w1_ref[pl.ds(hk, H_CHUNK), :], x,
                    preferred_element_type=jnp.float32)       # (H_CHUNK, tile)
        h = h + b1_ref[pl.ds(hk, H_CHUNK), :]

        # ---- SiLU in f32, one EUP push: h*sigmoid(h) = 0.5*h*(1+tanh(h/2)) --
        h = 0.5 * h * (1.0 + jnp.tanh(0.5 * h))

        # ---- conv2 chunk on the MXU: bf16 operands, f32 accumulation --------
        return acc + jnp.dot(w2_ref[:, pl.ds(hk, H_CHUNK)],
                             h.astype(jnp.bfloat16),
                             preferred_element_type=jnp.float32)

    acc = lax.fori_loop(0, n_chunks, chunk,
                        jnp.zeros((L, tile), jnp.float32), unroll=True)
    z = acc + b2_ref[...]
    # sigmoid(z) = 0.5*(1+tanh(z/2)) -- one EUP push per element, f32.
    o_ref[...] = (0.5 * (1.0 + jnp.tanh(0.5 * z))).astype(o_ref.dtype)


@functools.partial(jax.jit, static_argnames=("tile_n",))
def encoder_forward(x_nchw, w1, b1, w2, b2, *, tile_n=2048):
    """x_nchw: (B, C, H, W) f32 -> (B, L, H, W) f32.

    w1: (HIDDEN, C), b1: (HIDDEN,), w2: (L, HIDDEN), b2: (L,)
    (PyTorch Conv2d weights with the 1x1 kernel dims squeezed).
    """
    B, C, H, W = x_nchw.shape
    L = w2.shape[0]
    assert HIDDEN % H_CHUNK == 0
    N = B * H * W

    # Flatten batch into the pixel (lane) axis: (C, B*HW). The transpose is
    # tiny (C=4 channels) relative to the compute-bound kernel.
    x = jnp.transpose(x_nchw.reshape(B, C, H * W), (1, 0, 2)).reshape(C, N)

    # Lane-aligned pixel tile: always a multiple of 128 (rounded UP so odd
    # tile_n values can't produce masked stores / lowering failures), capped
    # at the 128-aligned pixel count.
    tile = max(128, min(tile_n, _round_up(N, 128)))
    tile = _round_up(tile, 128)
    # Keep >= 2 grid steps when possible so v7x's second TensorCore has work.
    if _round_up(N, tile) == tile and tile >= 256:
        tile = _round_up(tile // 2, 128)
    N_pad = _round_up(N, tile)
    if N_pad != N:
        # Padded pixels flow through tanh (finite garbage, no NaN/Inf with
        # finite weights) and are sliced off below -- keep that slice.
        x = jnp.pad(x, ((0, 0), (0, N_pad - N)))

    w1c = w1.astype(jnp.bfloat16)                       # MXU operand
    b1c = b1.reshape(HIDDEN, 1).astype(jnp.float32)
    w2c = w2.astype(jnp.bfloat16)                       # MXU operand
    b2c = b2.reshape(L, 1).astype(jnp.float32)

    out = pl.pallas_call(
        _encoder_kernel,
        out_shape=jax.ShapeDtypeStruct((L, N_pad), jnp.float32),
        grid_spec=pltpu.PrefetchScalarGridSpec(
            num_scalar_prefetch=0,
            grid=(N_pad // tile,),
            in_specs=[
                pl.BlockSpec((C, tile), lambda i: (0, i)),
                pl.BlockSpec((HIDDEN, C), lambda i: (0, 0)),
                pl.BlockSpec((HIDDEN, 1), lambda i: (0, 0)),
                pl.BlockSpec((L, HIDDEN), lambda i: (0, 0)),
                pl.BlockSpec((L, 1), lambda i: (0, 0)),
            ],
            out_specs=pl.BlockSpec((L, tile), lambda i: (0, i)),
        ),
        compiler_params=pltpu.CompilerParams(
            dimension_semantics=("parallel",),
            vmem_limit_bytes=32 * 1024 * 1024),
    )(x, w1c, b1c, w2c, b2c)

    # (L, N_pad) -> drop pad -> (L, B, HW) -> (B, L, H, W).
    out = out[:, :N].reshape(L, B, H * W)
    return jnp.transpose(out, (1, 0, 2)).reshape(B, L, H, W)


def encoder_reference(x_nchw, w1, b1, w2, b2):
    """Pure-JAX f32 reference of the PyTorch forward pass."""
    h = jnp.einsum('bchw,oc->bohw', x_nchw, w1) + b1[None, :, None, None]
    h = h * jax.nn.sigmoid(h)
    z = jnp.einsum('bohw,lo->blhw', h, w2) + b2[None, :, None, None]
    return jax.nn.sigmoid(z)


def init_params(key, num_euv_channels, num_latent_features):
    """Deterministic synthetic init matching nn.Conv2d(k=1) default init.

    Weights are kept in the native PyTorch (out, in) layout.
    """
    k1, k2, k3, k4 = jax.random.split(key, 4)
    bound1 = 1.0 / jnp.sqrt(num_euv_channels)
    bound2 = 1.0 / jnp.sqrt(HIDDEN)
    w1 = jax.random.uniform(k1, (HIDDEN, num_euv_channels), jnp.float32,
                            -bound1, bound1)
    b1 = jax.random.uniform(k2, (HIDDEN,), jnp.float32, -bound1, bound1)
    w2 = jax.random.uniform(k3, (num_latent_features, HIDDEN), jnp.float32,
                            -bound2, bound2)
    b2 = jax.random.uniform(k4, (num_latent_features,), jnp.float32,
                            -bound2, bound2)
    return w1, b1, w2, b2


if __name__ == "__main__":
    # TODO(synk): model_type='conv' (3x3) and latent_output_type='softmax'
    # branches of the PyTorch module are not implemented (defaults only).
    num_euv_channels = 4
    num_latent_features = 8
    B, H, W = 2, 16, 16

    key = jax.random.PRNGKey(0)
    kx, kp = jax.random.split(key)
    x = jax.random.normal(kx, (B, num_euv_channels, H, W), jnp.float32)
    w1, b1, w2, b2 = init_params(kp, num_euv_channels, num_latent_features)

    out = encoder_forward(x, w1, b1, w2, b2)
    jax.block_until_ready(out)

    assert out.shape == (B, num_latent_features, H, W), out.shape
    assert bool(jnp.all((out >= 0.0) & (out <= 1.0))), "sigmoid range violated"

    ref = encoder_reference(x, w1, b1, w2, b2)
    max_err = float(jnp.max(jnp.abs(out - ref)))
    assert max_err < 2e-2, f"mismatch vs f32 reference: {max_err}"
    print("KERNEL_OK")
</pallas_src>

<mosaic_0001>
module attributes {stable_mosaic.version = 11 : i64} {
  func.func @_encoder_kernel(%arg0: i32, %arg1: memref<4x256xf32, #tpu.memory_space<vmem>>, %arg2: memref<1024x4xbf16, #tpu.memory_space<vmem>>, %arg3: memref<1024x1xf32, #tpu.memory_space<vmem>>, %arg4: memref<8x1024xbf16, #tpu.memory_space<vmem>>, %arg5: memref<8x1xf32, #tpu.memory_space<vmem>>, %arg6: memref<8x256xf32, #tpu.memory_space<vmem>>) attributes {dimension_semantics = [#tpu.dimension_semantics<parallel>], iteration_bounds = array<i64: 2>, scalar_prefetch = 0 : i64, scratch_operands = 0 : i64, tpu.core_type = #tpu.core_type<tc>, window_params = [{transform_indices = @transform_0, window_bounds = array<i64: 4, 256>}, {pipeline_mode = #tpu.pipeline_mode<synchronous>, transform_indices = @transform_1, window_bounds = array<i64: 1024, 4>}, {pipeline_mode = #tpu.pipeline_mode<synchronous>, transform_indices = @transform_2, window_bounds = array<i64: 1024, 1>}, {pipeline_mode = #tpu.pipeline_mode<synchronous>, transform_indices = @transform_3, window_bounds = array<i64: 8, 1024>}, {pipeline_mode = #tpu.pipeline_mode<synchronous>, transform_indices = @transform_4, window_bounds = array<i64: 8, 1>}, {transform_indices = @transform_5, window_bounds = array<i64: 8, 256>}]} {
    %c0 = arith.constant 0 : index
    %c0_0 = arith.constant 0 : index
    %0 = vector.load %arg1[%c0, %c0_0] : memref<4x256xf32, #tpu.memory_space<vmem>>, vector<4x256xf32>
    %1 = arith.truncf %0 : vector<4x256xf32> to vector<4x256xbf16>
    %cst = arith.constant 0.000000e+00 : f32
    %2 = vector.broadcast %cst : f32 to vector<8x256xf32>
    %c0_i32 = arith.constant 0 : i32
    %c256_i32 = arith.constant 256 : i32
    %3 = arith.muli %c0_i32, %c256_i32 : i32
    %4 = tpu.assume_multiple %3, 256 : i32
    %5 = arith.index_cast %4 : i32 to index
    %c0_1 = arith.constant 0 : index
    %6 = vector.load %arg2[%5, %c0_1] : memref<1024x4xbf16, #tpu.memory_space<vmem>>, vector<256x4xbf16>
    %cst_2 = arith.constant dense<0.000000e+00> : vector<256x256xf32>
    %7 = tpu.matmul %6, %1, %cst_2 {dimension_numbers = #tpu.dot_dimension_numbers<[1], [0], [0], [1], [0, 0, 1, 1], [], []>} : vector<256x4xbf16>, vector<4x256xbf16>, vector<256x256xf32> -> vector<256x256xf32>
    %8 = arith.index_cast %4 : i32 to index
    %c0_3 = arith.constant 0 : index
    %9 = vector.load %arg3[%8, %c0_3] : memref<1024x1xf32, #tpu.memory_space<vmem>>, vector<256x1xf32>
    %10 = vector.broadcast %9 : vector<256x1xf32> to vector<256x256xf32>
    %11 = arith.addf %7, %10 : vector<256x256xf32>
    %cst_4 = arith.constant 5.000000e-01 : f32
    %12 = vector.broadcast %cst_4 : f32 to vector<256x256xf32>
    %13 = arith.mulf %12, %11 : vector<256x256xf32>
    %cst_5 = arith.constant 5.000000e-01 : f32
    %14 = vector.broadcast %cst_5 : f32 to vector<256x256xf32>
    %15 = arith.mulf %14, %11 : vector<256x256xf32>
    %16 = math.tanh %15 : vector<256x256xf32>
    %cst_6 = arith.constant 1.000000e+00 : f32
    %17 = vector.broadcast %cst_6 : f32 to vector<256x256xf32>
    %18 = arith.addf %17, %16 : vector<256x256xf32>
    %19 = arith.mulf %13, %18 : vector<256x256xf32>
    %c0_7 = arith.constant 0 : index
    %20 = arith.index_cast %4 : i32 to index
    %21 = vector.load %arg4[%c0_7, %20] : memref<8x1024xbf16, #tpu.memory_space<vmem>>, vector<8x256xbf16>
    %22 = arith.truncf %19 : vector<256x256xf32> to vector<256x256xbf16>
    %cst_8 = arith.constant dense<0.000000e+00> : vector<8x256xf32>
    %23 = tpu.matmul %21, %22, %cst_8 {dimension_numbers = #tpu.dot_dimension_numbers<[1], [0], [0], [1], [0, 0, 1, 1], [], []>} : vector<8x256xbf16>, vector<256x256xbf16>, vector<8x256xf32> -> vector<8x256xf32>
    %24 = arith.addf %2, %23 : vector<8x256xf32>
    %c1_i32 = arith.constant 1 : i32
    %c256_i32_9 = arith.constant 256 : i32
    %25 = arith.muli %c1_i32, %c256_i32_9 : i32
    %26 = tpu.assume_multiple %25, 256 : i32
    %27 = arith.index_cast %26 : i32 to index
    %c0_10 = arith.constant 0 : index
    %28 = vector.load %arg2[%27, %c0_10] : memref<1024x4xbf16, #tpu.memory_space<vmem>>, vector<256x4xbf16>
    %cst_11 = arith.constant dense<0.000000e+00> : vector<256x256xf32>
    %29 = tpu.matmul %28, %1, %cst_11 {dimension_numbers = #tpu.dot_dimension_numbers<[1], [0], [0], [1], [0, 0, 1, 1], [], []>} : vector<256x4xbf16>, vector<4x256xbf16>, vector<256x256xf32> -> vector<256x256xf32>
    %30 = arith.index_cast %26 : i32 to index
    %c0_12 = arith.constant 0 : index
    %31 = vector.load %arg3[%30, %c0_12] : memref<1024x1xf32, #tpu.memory_space<vmem>>, vector<256x1xf32>
    %32 = vector.broadcast %31 : vector<256x1xf32> to vector<256x256xf32>
    %33 = arith.addf %29, %32 : vector<256x256xf32>
    %cst_13 = arith.constant 5.000000e-01 : f32
    %34 = vector.broadcast %cst_13 : f32 to vector<256x256xf32>
    %35 = arith.mulf %34, %33 : vector<256x256xf32>
    %cst_14 = arith.constant 5.000000e-01 : f32
    %36 = vector.broadcast %cst_14 : f32 to vector<256x256xf32>
    %37 = arith.mulf %36, %33 : vector<256x256xf32>
    %38 = math.tanh %37 : vector<256x256xf32>
    %cst_15 = arith.constant 1.000000e+00 : f32
    %39 = vector.broadcast %cst_15 : f32 to vector<256x256xf32>
    %40 = arith.addf %39, %38 : vector<256x256xf32>
    %41 = arith.mulf %35, %40 : vector<256x256xf32>
    %c0_16 = arith.constant 0 : index
    %42 = arith.index_cast %26 : i32 to index
    %43 = vector.load %arg4[%c0_16, %42] : memref<8x1024xbf16, #tpu.memory_space<vmem>>, vector<8x256xbf16>
    %44 = arith.truncf %41 : vector<256x256xf32> to vector<256x256xbf16>
    %cst_17 = arith.constant dense<0.000000e+00> : vector<8x256xf32>
    %45 = tpu.matmul %43, %44, %cst_17 {dimension_numbers = #tpu.dot_dimension_numbers<[1], [0], [0], [1], [0, 0, 1, 1], [], []>} : vector<8x256xbf16>, vector<256x256xbf16>, vector<8x256xf32> -> vector<8x256xf32>
    %46 = arith.addf %24, %45 : vector<8x256xf32>
    %c2_i32 = arith.constant 2 : i32
    %c256_i32_18 = arith.constant 256 : i32
    %47 = arith.muli %c2_i32, %c256_i32_18 : i32
    %48 = tpu.assume_multiple %47, 256 : i32
    %49 = arith.index_cast %48 : i32 to index
    %c0_19 = arith.constant 0 : index
    %50 = vector.load %arg2[%49, %c0_19] : memref<1024x4xbf16, #tpu.memory_space<vmem>>, vector<256x4xbf16>
    %cst_20 = arith.constant dense<0.000000e+00> : vector<256x256xf32>
    %51 = tpu.matmul %50, %1, %cst_20 {dimension_numbers = #tpu.dot_dimension_numbers<[1], [0], [0], [1], [0, 0, 1, 1], [], []>} : vector<256x4xbf16>, vector<4x256xbf16>, vector<256x256xf32> -> vector<256x256xf32>
    %52 = arith.index_cast %48 : i32 to index
    %c0_21 = arith.constant 0 : index
    %53 = vector.load %arg3[%52, %c0_21] : memref<1024x1xf32, #tpu.memory_space<vmem>>, vector<256x1xf32>
    %54 = vector.broadcast %53 : vector<256x1xf32> to vector<256x256xf32>
    %55 = arith.addf %51, %54 : vector<256x256xf32>
    %cst_22 = arith.constant 5.000000e-01 : f32
    %56 = vector.broadcast %cst_22 : f32 to vector<256x256xf32>
    %57 = arith.mulf %56, %55 : vector<256x256xf32>
    %cst_23 = arith.constant 5.000000e-01 : f32
    %58 = vector.broadcast %cst_23 : f32 to vector<256x256xf32>
    %59 = arith.mulf %58, %55 : vector<256x256xf32>
    %60 = math.tanh %59 : vector<256x256xf32>
    %cst_24 = arith.constant 1.000000e+00 : f32
    %61 = vector.broadcast %cst_24 : f32 to vector<256x256xf32>
    %62 = arith.addf %61, %60 : vector<256x256xf32>
    %63 = arith.mulf %57, %62 : vector<256x256xf32>
    %c0_25 = arith.constant 0 : index
    %64 = arith.index_cast %48 : i32 to index
    %65 = vector.load %arg4[%c0_25, %64] : memref<8x1024xbf16, #tpu.memory_space<vmem>>, vector<8x256xbf16>
    %66 = arith.truncf %63 : vector<256x256xf32> to vector<256x256xbf16>
    %cst_26 = arith.constant dense<0.000000e+00> : vector<8x256xf32>
    %67 = tpu.matmul %65, %66, %cst_26 {dimension_numbers = #tpu.dot_dimension_numbers<[1], [0], [0], [1], [0, 0, 1, 1], [], []>} : vector<8x256xbf16>, vector<256x256xbf16>, vector<8x256xf32> -> vector<8x256xf32>
    %68 = arith.addf %46, %67 : vector<8x256xf32>
    %c3_i32 = arith.constant 3 : i32
    %c256_i32_27 = arith.constant 256 : i32
    %69 = arith.muli %c3_i32, %c256_i32_27 : i32
    %70 = tpu.assume_multiple %69, 256 : i32
    %71 = arith.index_cast %70 : i32 to index
    %c0_28 = arith.constant 0 : index
    %72 = vector.load %arg2[%71, %c0_28] : memref<1024x4xbf16, #tpu.memory_space<vmem>>, vector<256x4xbf16>
    %cst_29 = arith.constant dense<0.000000e+00> : vector<256x256xf32>
    %73 = tpu.matmul %72, %1, %cst_29 {dimension_numbers = #tpu.dot_dimension_numbers<[1], [0], [0], [1], [0, 0, 1, 1], [], []>} : vector<256x4xbf16>, vector<4x256xbf16>, vector<256x256xf32> -> vector<256x256xf32>
    %74 = arith.index_cast %70 : i32 to index
    %c0_30 = arith.constant 0 : index
    %75 = vector.load %arg3[%74, %c0_30] : memref<1024x1xf32, #tpu.memory_space<vmem>>, vector<256x1xf32>
    %76 = vector.broadcast %75 : vector<256x1xf32> to vector<256x256xf32>
    %77 = arith.addf %73, %76 : vector<256x256xf32>
    %cst_31 = arith.constant 5.000000e-01 : f32
    %78 = vector.broadcast %cst_31 : f32 to vector<256x256xf32>
    %79 = arith.mulf %78, %77 : vector<256x256xf32>
    %cst_32 = arith.constant 5.000000e-01 : f32
    %80 = vector.broadcast %cst_32 : f32 to vector<256x256xf32>
    %81 = arith.mulf %80, %77 : vector<256x256xf32>
    %82 = math.tanh %81 : vector<256x256xf32>
    %cst_33 = arith.constant 1.000000e+00 : f32
    %83 = vector.broadcast %cst_33 : f32 to vector<256x256xf32>
    %84 = arith.addf %83, %82 : vector<256x256xf32>
    %85 = arith.mulf %79, %84 : vector<256x256xf32>
    %c0_34 = arith.constant 0 : index
    %86 = arith.index_cast %70 : i32 to index
    %87 = vector.load %arg4[%c0_34, %86] : memref<8x1024xbf16, #tpu.memory_space<vmem>>, vector<8x256xbf16>
    %88 = arith.truncf %85 : vector<256x256xf32> to vector<256x256xbf16>
    %cst_35 = arith.constant dense<0.000000e+00> : vector<8x256xf32>
    %89 = tpu.matmul %87, %88, %cst_35 {dimension_numbers = #tpu.dot_dimension_numbers<[1], [0], [0], [1], [0, 0, 1, 1], [], []>} : vector<8x256xbf16>, vector<256x256xbf16>, vector<8x256xf32> -> vector<8x256xf32>
    %90 = arith.addf %68, %89 : vector<8x256xf32>
    %c4_i32 = arith.constant 4 : i32
    %c0_36 = arith.constant 0 : index
    %c0_37 = arith.constant 0 : index
    %91 = vector.load %arg5[%c0_36, %c0_37] : memref<8x1xf32, #tpu.memory_space<vmem>>, vector<8x1xf32>
    %92 = vector.broadcast %91 : vector<8x1xf32> to vector<8x256xf32>
    %93 = arith.addf %90, %92 : vector<8x256xf32>
    %cst_38 = arith.constant 5.000000e-01 : f32
    %94 = vector.broadcast %cst_38 : f32 to vector<8x256xf32>
    %95 = arith.mulf %94, %93 : vector<8x256xf32>
    %96 = math.tanh %95 : vector<8x256xf32>
    %cst_39 = arith.constant 1.000000e+00 : f32
    %97 = vector.broadcast %cst_39 : f32 to vector<8x256xf32>
    %98 = arith.addf %97, %96 : vector<8x256xf32>
    %cst_40 = arith.constant 5.000000e-01 : f32
    %99 = vector.broadcast %cst_40 : f32 to vector<8x256xf32>
    %100 = arith.mulf %99, %98 : vector<8x256xf32>
    %c0_41 = arith.constant 0 : index
    %c0_42 = arith.constant 0 : index
    %101 = vector.load %arg6[%c0_41, %c0_42] : memref<8x256xf32, #tpu.memory_space<vmem>>, vector<8x256xf32>
    tpu.vector_store %arg6[%c0_41, %c0_42], %100 {strides = array<i32>} : memref<8x256xf32, #tpu.memory_space<vmem>>, vector<8x256xf32>,
    return
  }
  func.func @transform_0(%arg0: i32) -> (i32, i32) {
    %c0_i32 = arith.constant 0 : i32
    %c0_i32_0 = arith.constant 0 : i32
    return %c0_i32, %arg0 : i32, i32
  }
  func.func @transform_1(%arg0: i32) -> (i32, i32) {
    %c0_i32 = arith.constant 0 : i32
    %c0_i32_0 = arith.constant 0 : i32
    %c0_i32_1 = arith.constant 0 : i32
    return %c0_i32, %c0_i32_0 : i32, i32
  }
  func.func @transform_2(%arg0: i32) -> (i32, i32) {
    %c0_i32 = arith.constant 0 : i32
    %c0_i32_0 = arith.constant 0 : i32
    %c0_i32_1 = arith.constant 0 : i32
    return %c0_i32, %c0_i32_0 : i32, i32
  }
  func.func @transform_3(%arg0: i32) -> (i32, i32) {
    %c0_i32 = arith.constant 0 : i32
    %c0_i32_0 = arith.constant 0 : i32
    %c0_i32_1 = arith.constant 0 : i32
    return %c0_i32, %c0_i32_0 : i32, i32
  }
  func.func @transform_4(%arg0: i32) -> (i32, i32) {
    %c0_i32 = arith.constant 0 : i32
    %c0_i32_0 = arith.constant 0 : i32
    %c0_i32_1 = arith.constant 0 : i32
    return %c0_i32, %c0_i32_0 : i32, i32
  }
  func.func @transform_5(%arg0: i32) -> (i32, i32) {
    %c0_i32 = arith.constant 0 : i32
    %c0_i32_0 = arith.constant 0 : i32
    return %c0_i32, %arg0 : i32, i32
  }
}

</mosaic_0001>

<bundles_post_ra>
// kernel: encoder_forward.1
= control target key start
LH: loop header
LB: loop body
LE: loop exit
PB: predicated region body
PF: predicated region fallthrough
CT: control target
= control target key end

     0   :  { %s4843_s18 = smov 0   ;;  %s7229_s0 = inlined_call_operand.vmem [shape: f32[4,512], index: 0, kind: input, shape index: {}]   ;;  %s7230_s1 = inlined_call_operand.vmem [shape: bf16[1024,4], index: 1, kind: input, shape index: {}]   ;;  %s7231_s2 = inlined_call_operand.vmem [shape: f32[1024,1], index: 2, kind: input, shape index: {}]   ;;  %s7232_s3 = inlined_call_operand.vmem [shape: bf16[8,1024], index: 3, kind: input, shape index: {}]   ;;  %s7233_s4 = inlined_call_operand.vmem [shape: f32[8,1], index: 4, kind: input, shape index: {}]   ;;  %s7234_s5 = inlined_call_operand.vmem [shape: f32[8,512], index: 5, kind: output, shape index: {}]  }
   0x1 LB: > { %s3858_s19 = sadd.s32 4294967295, %s4810_s18   ;;  %p3862_p0 = scmp.ge.s32.totalorder %s4810_s18, 1  ;;  %s4810_s18 = sphi %s4843_s18, %s15_s18  }
   0x2   : > { %p188_p1 = scmp.lt.s32.totalorder %s4810_s18, 3 }
   0x4   : > { %p189_p2 = pnand %p3862_p0, %p188_p1 }
   0x6   : > { %192 = sbr.rel (%p189_p2) target bundleno = 1408 (0x580), region = 40 }
   0xd   : > { %v3934_v0 = vld [vmem:[%s7231_s2 + $0x110] sm:$0xff]  ;;  %v3932_v1 = vld [vmem:[%s7231_s2 + $0x100] sm:$0xff]  ;;  %s3863_s24 = sshll.u32 %s3858_s19, 1  ;;  %v7235_v2 = vmov 0   ;;  %v3935_v3 = vld [vmem:[%s7231_s2 + $0x118] sm:$0xff]  ;;  %vm588_vm0 = vcmask 1041408  }
   0xe   : > { %4214 = vset.pattern.permute.xlu1 %v7235_v2  ;;  %4213 = vset.pattern.permute.xlu0 %v7235_v2  ;;  %p217_p3 = scmp.lt.s32.totalorder %s3863_s24, 3  ;;  %v3933_v4 = vld [vmem:[%s7231_s2 + $0x108] sm:$0xff]  ;;  %v3936_v6 = vld [vmem:[%s7231_s2 + $0x120] sm:$0xff]  ;;  %v3939_v12 = vld [vmem:[%s7231_s2 + $0x138] sm:$0xff]  ;;  %vm539_vm1 = vcmask 31744  }
   0xf   : > { %1155 = vperm.xlu1 %4214, %v3934_v0   ;;  %1145 = vperm.xlu0 %4213, %v3932_v1   ;;  %v3937_v5 = vld [vmem:[%s7231_s2 + $0x128] sm:$0xff]  ;;  %v3938_v13 = vld [vmem:[%s7231_s2 + $0x130] sm:$0xff]  ;;  %v4216_v14 = vld [vmem:[%s7230_s1] sm:$0xff]  }
  0x10   : > { %s7356_s24 = smov (!%p217_p3, %s3863_s24), 3  ;;  %627 = vmatprep.mubr.bf16.mxu0 %v7235_v2  ;;  %1463 = vmatprep.mubr.bf16.mxu1 %v7235_v2  ;;  %v4217_v15 = vld [vmem:[%s7230_s1 + $0x80] sm:$0xff]   ;;  %v3941_v16 = vld [vmem:[%s7231_s2 + $0x148] sm:$0xff]  ;;  %v3943_v18 = vld [vmem:[%s7231_s2 + $0x158] sm:$0xff] }
  0x11   : > { %s3864_s6 = sshll.u32 %s7356_s24, 2  ;;  %v3940_v17 = vld [vmem:[%s7231_s2 + $0x140] sm:$0xff]  ;;  %v3942_v19 = vld [vmem:[%s7231_s2 + $0x150] sm:$0xff]  ;;  %v4218_v20 = vld [vmem:[%s7230_s1 + $0x8] sm:$0xff]   ;;  %s3866_s28 = sshll.u32 %s7356_s24, 3 }
  0x12   : > { %s220_s11 = scalar_lea.vmem %s7229_s0, %s3864_s6  ;;  %v4219_v21 = vld [vmem:[%s7230_s1 + $0x88] sm:$0xff]   ;;  %v3944_v23 = vld [vmem:[%s7231_s2 + $0x160] sm:$0xff]  ;;  %v3947_v24 = vld [vmem:[%s7231_s2 + $0x178] sm:$0xff]  ;;  %s226_s6 = scalar_lea.vmem %s7234_s5, %s3866_s28 }
  0x13   : > { %1160 = vperm.xlu1 %4214, %v3935_v3   ;;  %1150 = vperm.xlu0 %4213, %v3933_v4   ;;  %v229_v7 = vld [vmem:[%s220_s11] sm:$0xff]  ;;  %v3945_v22 = vld [vmem:[%s7231_s2 + $0x168] sm:$0xff]  ;;  %v3946_v25 = vld [vmem:[%s7231_s2 + $0x170] sm:$0xff] }
  0x14   : > { %v231_v8 = vcombine.high %v229_v7, %v229_v7  ;;  %v233_v9 = vpack.c.bf16 %v229_v7, %v229_v7  ;;  %v4220_v26 = vld [vmem:[%s7230_s1 + $0x10] sm:$0xff]   ;;  %v3949_v28 = vld [vmem:[%s7231_s2 + $0x188] sm:$0xff]  ;;  %v3948_v29 = vld [vmem:[%s7231_s2 + $0x180] sm:$0xff] }
  0x15   : > { %v4221_v27 = vld [vmem:[%s7230_s1 + $0x90] sm:$0xff]   ;;  %v3951_v30 = vld [vmem:[%s7231_s2 + $0x198] sm:$0xff]  ;;  %v3953_v34 = vld [vmem:[%s7231_s2 + $0x1a8] sm:$0xff] }
  0x16   : > { %v4879_v10 = vpack.c.bf16 %v231_v8, %v231_v8  ;;  %v4882_v11 = vsel %vm588_vm0, %v233_v9, 0  ;;  %v3950_v31 = vld [vmem:[%s7231_s2 + $0x190] sm:$0xff]  ;;  %v4222_v32 = vld [vmem:[%s7230_s1 + $0x18] sm:$0xff]   ;;  %v3952_v35 = vld [vmem:[%s7231_s2 + $0x1a0] sm:$0xff] }
  0x17   : > { %1170 = vperm.xlu1 %4214, %v3937_v5   ;;  %1165 = vperm.xlu0 %4213, %v3936_v6   ;;  %7259 = vst [vmem:[#allocation3_spill] sm:$0xff] %v4882_v11  ;;  %v4223_v33 = vld [vmem:[%s7230_s1 + $0x98] sm:$0xff]   ;;  %v3954_v37 = vld [vmem:[%s7231_s2 + $0x1b0] sm:$0xff]  ;;  %v4224_v38 = vld [vmem:[%s7230_s1 + $0x20] sm:$0xff]  }
  0x18   : > { %7258 = vst [vmem:[#allocation2_spill] sm:$0xff] %v4879_v10  ;;  %3883 = vmatprep.subr.msk.bf16.mxu0 %vm588_vm0, %v4879_v10  ;;  %3980 = vmatprep.subr.msk.bf16.mxu1 %vm588_vm0, %v4879_v10  ;;  %v3955_v36 = vld [vmem:[%s7231_s2 + $0x1b8] sm:$0xff]  ;;  %v4225_v39 = vld [vmem:[%s7230_s1 + $0xa0] sm:$0xff]   ;;  %v3957_v40 = vld [vmem:[%s7231_s2 + $0x1c8] sm:$0xff] }
  0x19   : > { %596 = vmatpush1.bf16.msra.mxu0 %v4882_v11  ;;  %1432 = vmatpush1.bf16.msra.mxu1 %v4882_v11  ;;  %v3956_v41 = vld [vmem:[%s7231_s2 + $0x1c0] sm:$0xff]  ;;  %v3959_v42 = vld [vmem:[%s7231_s2 + $0x1d8] sm:$0xff]  ;;  %v3958_v43 = vld [vmem:[%s7231_s2 + $0x1d0] sm:$0xff] }
  0x1a   : > { %v4226_v44 = vld [vmem:[%s7230_s1 + $0x28] sm:$0xff]   ;;  %v3960_v47 = vld [vmem:[%s7231_s2 + $0x1e0] sm:$0xff]  ;;  %v3963_v48 = vld [vmem:[%s7231_s2 + $0x1f8] sm:$0xff] }
  0x1b   : > { %1180 = vperm.xlu1 %4214, %v3939_v12   ;;  %1175 = vperm.xlu0 %4213, %v3938_v13   ;;  %v4227_v45 = vld [vmem:[%s7230_s1 + $0xa8] sm:$0xff]   ;;  %v3962_v49 = vld [vmem:[%s7231_s2 + $0x1f0] sm:$0xff]  ;;  %v267_v53 = vld [vmem:[%s7231_s2] sm:$0xff] }
  0x1c   : > { %3884 = vmatmul.mubr.msk.bf16.vlgmr.msra.gmra.mrb[0].mxu0 %vm539_vm1, %v4216_v14  ;;  %3981 = vmatmul.mubr.msk.bf16.vlgmr.msra.gmra.mrb[0].mxu1 %vm539_vm1, %v4217_v15  ;;  %v3961_v46 = vld [vmem:[%s7231_s2 + $0x1e8] sm:$0xff]  ;;  %v4228_v50 = vld [vmem:[%s7230_s1 + $0x30] sm:$0xff]   ;;  %v270_v54 = vld [vmem:[%s7231_s2 + $0x18] sm:$0xff] }
  0x1d   : > { %637 = vmatprep.mubr.bf16.mxu0 %v7235_v2  ;;  %1473 = vmatprep.mubr.bf16.mxu1 %v7235_v2  ;;  %v4229_v51 = vld [vmem:[%s7230_s1 + $0xb0] sm:$0xff]   ;;  %v268_v52 = vld [vmem:[%s7231_s2 + $0x8] sm:$0xff]  ;;  %v4230_v56 = vld [vmem:[%s7230_s1 + $0x38] sm:$0xff]  }
  0x1e   : > { %v269_v55 = vld [vmem:[%s7231_s2 + $0x10] sm:$0xff]  ;;  %v4231_v57 = vld [vmem:[%s7230_s1 + $0xb8] sm:$0xff]   ;;  %v272_v58 = vld [vmem:[%s7231_s2 + $0x28] sm:$0xff] }
  0x1f   : > { %1190 = vperm.xlu1 %4214, %v3941_v16   ;;  %1185 = vperm.xlu0 %4213, %v3940_v17   ;;  %v271_v59 = vld [vmem:[%s7231_s2 + $0x20] sm:$0xff]  ;;  %v274_v60 = vld [vmem:[%s7231_s2 + $0x38] sm:$0xff]  ;;  %v273_v61 = vld [vmem:[%s7231_s2 + $0x30] sm:$0xff] }
  0x20   : > { %v4232_v62 = vld [vmem:[%s7230_s1 + $0x40] sm:$0xff]   ;;  %v276_v0 = vld [vmem:[%s7231_s2 + $0x48] sm:$0xff]  ;;  %v278_v3 = vld [vmem:[%s7231_s2 + $0x58] sm:$0xff] }
  0x21   : > { %v4233_v63 = vld [vmem:[%s7230_s1 + $0xc0] sm:$0xff]   ;;  %v277_v4 = vld [vmem:[%s7231_s2 + $0x50] sm:$0xff]  ;;  %v4234_v5 = vld [vmem:[%s7230_s1 + $0x48] sm:$0xff]  }
  0x22   : > { %v275_v1 = vld [vmem:[%s7231_s2 + $0x40] sm:$0xff]  ;;  %v4235_v6 = vld [vmem:[%s7230_s1 + $0xc8] sm:$0xff]   ;;  %v282_v9 = vld [vmem:[%s7231_s2 + $0x78] sm:$0xff] }
  0x23   : > { %1200 = vperm.xlu1 %4214, %v3943_v18   ;;  %1195 = vperm.xlu0 %4213, %v3942_v19   ;;  %v280_v7 = vld [vmem:[%s7231_s2 + $0x68] sm:$0xff]  ;;  %v279_v8 = vld [vmem:[%s7231_s2 + $0x60] sm:$0xff]  ;;  %v281_v12 = vld [vmem:[%s7231_s2 + $0x70] sm:$0xff] }
  0x24   : > { %3885 = vmatmul.mubr.msk.bf16.gmra.mrb[4].mxu0 %vm539_vm1, %v4218_v20  ;;  %3982 = vmatmul.mubr.msk.bf16.gmra.mrb[4].mxu1 %vm539_vm1, %v4219_v21  ;;  %v4236_v13 = vld [vmem:[%s7230_s1 + $0x50] sm:$0xff]   ;;  %v284_v15 = vld [vmem:[%s7231_s2 + $0x88] sm:$0xff]  ;;  %v283_v16 = vld [vmem:[%s7231_s2 + $0x80] sm:$0xff] }
  0x25   : > { %647 = vmatprep.mubr.bf16.mxu0 %v7235_v2  ;;  %1483 = vmatprep.mubr.bf16.mxu1 %v7235_v2  ;;  %v4237_v14 = vld [vmem:[%s7230_s1 + $0xd0] sm:$0xff]   ;;  %v286_v17 = vld [vmem:[%s7231_s2 + $0x98] sm:$0xff]  ;;  %v288_v21 = vld [vmem:[%s7231_s2 + $0xa8] sm:$0xff] }
  0x26   : > { %v285_v18 = vld [vmem:[%s7231_s2 + $0x90] sm:$0xff]  ;;  %v4238_v19 = vld [vmem:[%s7230_s1 + $0x58] sm:$0xff]  }
  0x27   : > { %1210 = vperm.xlu1 %4214, %v3945_v22   ;;  %1205 = vperm.xlu0 %4213, %v3944_v23   ;;  %v4239_v20 = vld [vmem:[%s7230_s1 + $0xd8] sm:$0xff]   ;;  %v287_v22 = vld [vmem:[%s7231_s2 + $0xa0] sm:$0xff] }
  0x28   : > { %v290_v23 = vld [vmem:[%s7231_s2 + $0xb8] sm:$0xff] }
  0x2b   : > { %1220 = vperm.xlu1 %4214, %v3947_v24   ;;  %1215 = vperm.xlu0 %4213, %v3946_v25   ;;  %v289_v24 = vld [vmem:[%s7231_s2 + $0xb0] sm:$0xff]  ;;  %v4240_v25 = vld [vmem:[%s7230_s1 + $0x60] sm:$0xff]  }
  0x2c   : > { %3886 = vmatmul.mubr.msk.bf16.gmra.mrb[8].mxu0 %vm539_vm1, %v4220_v26  ;;  %3983 = vmatmul.mubr.msk.bf16.gmra.mrb[8].mxu1 %vm539_vm1, %v4221_v27  ;;  %v4241_v26 = vld [vmem:[%s7230_s1 + $0xe0] sm:$0xff]   ;;  %v292_v27 = vld [vmem:[%s7231_s2 + $0xc8] sm:$0xff] }
  0x2d   : > { %657 = vmatprep.mubr.bf16.mxu0 %v7235_v2  ;;  %1493 = vmatprep.mubr.bf16.mxu1 %v7235_v2 }
  0x2f   : > { %1230 = vperm.xlu1 %4214, %v3949_v28   ;;  %1225 = vperm.xlu0 %4213, %v3948_v29   ;;  %v291_v28 = vld [vmem:[%s7231_s2 + $0xc0] sm:$0xff]  ;;  %v294_v29 = vld [vmem:[%s7231_s2 + $0xd8] sm:$0xff] }
  0x33   : > { %1240 = vperm.xlu1 %4214, %v3951_v30   ;;  %1235 = vperm.xlu0 %4213, %v3950_v31   ;;  %v293_v30 = vld [vmem:[%s7231_s2 + $0xd0] sm:$0xff]  ;;  %v4242_v31 = vld [vmem:[%s7230_s1 + $0x68] sm:$0xff]  }
  0x34   : > { %3887 = vmatmul.mubr.msk.bf16.gmra.mrb[12].mxu0 %vm539_vm1, %v4222_v32  ;;  %3984 = vmatmul.mubr.msk.bf16.gmra.mrb[12].mxu1 %vm539_vm1, %v4223_v33  ;;  %v4243_v32 = vld [vmem:[%s7230_s1 + $0xe8] sm:$0xff]  }
  0x35   : > { %667 = vmatprep.mubr.bf16.mxu0 %v7235_v2  ;;  %1503 = vmatprep.mubr.bf16.mxu1 %v7235_v2  ;;  %v296_v33 = vld [vmem:[%s7231_s2 + $0xe8] sm:$0xff] }
  0x37   : > { %1250 = vperm.xlu1 %4214, %v3953_v34   ;;  %1245 = vperm.xlu0 %4213, %v3952_v35   ;;  %v295_v34 = vld [vmem:[%s7231_s2 + $0xe0] sm:$0xff]  ;;  %v298_v35 = vld [vmem:[%s7231_s2 + $0xf8] sm:$0xff] }
  0x3b   : > { %1260 = vperm.xlu1 %4214, %v3955_v36   ;;  %1255 = vperm.xlu0 %4213, %v3954_v37   ;;  %v297_v36 = vld [vmem:[%s7231_s2 + $0xf0] sm:$0xff] }
  0x3c   : > { %3888 = vmatmul.mubr.msk.bf16.gmra.mrb[16].mxu0 %vm539_vm1, %v4224_v38  ;;  %3985 = vmatmul.mubr.msk.bf16.gmra.mrb[16].mxu1 %vm539_vm1, %v4225_v39  ;;  %v4244_v37 = vld [vmem:[%s7230_s1 + $0x70] sm:$0xff]   ;;  %v4035_v39 = vld [vmem:[%s7231_s2 + $0x208] sm:$0xff] }
  0x3d   : > { %677 = vmatprep.mubr.bf16.mxu0 %v7235_v2  ;;  %1513 = vmatprep.mubr.bf16.mxu1 %v7235_v2  ;;  %v4245_v38 = vld [vmem:[%s7230_s1 + $0xf0] sm:$0xff]  }
  0x3f   : > { %1270 = vperm.xlu1 %4214, %v3957_v40   ;;  %1265 = vperm.xlu0 %4213, %v3956_v41   ;;  %v4034_v40 = vld [vmem:[%s7231_s2 + $0x200] sm:$0xff] }
  0x43   : > { %1280 = vperm.xlu1 %4214, %v3959_v42   ;;  %1275 = vperm.xlu0 %4213, %v3958_v43   ;;  %v4037_v42 = vld [vmem:[%s7231_s2 + $0x218] sm:$0xff]  ;;  %v4036_v43 = vld [vmem:[%s7231_s2 + $0x210] sm:$0xff] }
  0x44   : > { %3889 = vmatmul.mubr.msk.bf16.gmra.mrb[20].mxu0 %vm539_vm1, %v4226_v44  ;;  %3986 = vmatmul.mubr.msk.bf16.gmra.mrb[20].mxu1 %vm539_vm1, %v4227_v45  ;;  %v4246_v44 = vld [vmem:[%s7230_s1 + $0x78] sm:$0xff]  }
  0x45   : > { %687 = vmatprep.mubr.bf16.mxu0 %v7235_v2  ;;  %1523 = vmatprep.mubr.bf16.mxu1 %v7235_v2  ;;  %v4247_v45 = vld [vmem:[%s7230_s1 + $0xf8] sm:$0xff]  }
  0x47   : > { %1290 = vperm.xlu1 %4214, %v3961_v46   ;;  %1285 = vperm.xlu0 %4213, %v3960_v47   ;;  %v4039_v47 = vld [vmem:[%s7231_s2 + $0x228] sm:$0xff] }
  0x4b   : > { %1300 = vperm.xlu1 %4214, %v3963_v48   ;;  %1295 = vperm.xlu0 %4213, %v3962_v49   ;;  %v4038_v48 = vld [vmem:[%s7231_s2 + $0x220] sm:$0xff] }
  0x4c   : > { %3890 = vmatmul.mubr.msk.bf16.gmra.mrb[24].mxu0 %vm539_vm1, %v4228_v50  ;;  %3987 = vmatmul.mubr.msk.bf16.gmra.mrb[24].mxu1 %vm539_vm1, %v4229_v51  ;;  %v4041_v51 = vld [vmem:[%s7231_s2 + $0x238] sm:$0xff] }
  0x4d   : > { %697 = vmatprep.mubr.bf16.mxu0 %v7235_v2  ;;  %1533 = vmatprep.mubr.bf16.mxu1 %v7235_v2 }
  0x4f   : > { %306 = vperm.xlu1 %4214, %v268_v52   ;;  %301 = vperm.xlu0 %4213, %v267_v53   ;;  %v4040_v52 = vld [vmem:[%s7231_s2 + $0x230] sm:$0xff] }
  0x53   : > { %316 = vperm.xlu1 %4214, %v270_v54   ;;  %311 = vperm.xlu0 %4213, %v269_v55   ;;  %v4043_v54 = vld [vmem:[%s7231_s2 + $0x248] sm:$0xff]  ;;  %v4042_v55 = vld [vmem:[%s7231_s2 + $0x240] sm:$0xff] }
  0x54   : > { %3891 = vmatmul.mubr.msk.bf16.gmra.mrb[28].mxu0 %vm539_vm1, %v4230_v56  ;;  %3988 = vmatmul.mubr.msk.bf16.gmra.mrb[28].mxu1 %vm539_vm1, %v4231_v57  ;;  %v4045_v57 = vld [vmem:[%s7231_s2 + $0x258] sm:$0xff] }
  0x55   : > { %707 = vmatprep.mubr.bf16.mxu0 %v7235_v2  ;;  %1543 = vmatprep.mubr.bf16.mxu1 %v7235_v2 }
  0x57   : > { %326 = vperm.xlu1 %4214, %v272_v58   ;;  %321 = vperm.xlu0 %4213, %v271_v59   ;;  %v4044_v58 = vld [vmem:[%s7231_s2 + $0x250] sm:$0xff] }
  0x5b   : > { %336 = vperm.xlu1 %4214, %v274_v60   ;;  %331 = vperm.xlu0 %4213, %v273_v61   ;;  %v4047_v61 = vld [vmem:[%s7231_s2 + $0x268] sm:$0xff] }
  0x5c   : > { %3892 = vmatmul.mubr.msk.bf16.gmra.mrb[32].mxu0 %vm539_vm1, %v4232_v62  ;;  %3989 = vmatmul.mubr.msk.bf16.gmra.mrb[32].mxu1 %vm539_vm1, %v4233_v63  ;;  %v4046_v62 = vld [vmem:[%s7231_s2 + $0x260] sm:$0xff] }
  0x5d   : > { %717 = vmatprep.mubr.bf16.mxu0 %v7235_v2  ;;  %1553 = vmatprep.mubr.bf16.mxu1 %v7235_v2 }
  0x5f   : > { %346 = vperm.xlu1 %4214, %v276_v0   ;;  %341 = vperm.xlu0 %4213, %v275_v1   ;;  %v4049_v0 = vld [vmem:[%s7231_s2 + $0x278] sm:$0xff]  ;;  %v4048_v1 = vld [vmem:[%s7231_s2 + $0x270] sm:$0xff] }
  0x63   : > { %356 = vperm.xlu1 %4214, %v278_v3   ;;  %351 = vperm.xlu0 %4213, %v277_v4   ;;  %v4051_v4 = vld [vmem:[%s7231_s2 + $0x288] sm:$0xff] }
  0x64   : > { %3893 = vmatmul.mubr.msk.bf16.gmra.mrb[36].mxu0 %vm539_vm1, %v4234_v5  ;;  %3990 = vmatmul.mubr.msk.bf16.gmra.mrb[36].mxu1 %vm539_vm1, %v4235_v6  ;;  %v4050_v5 = vld [vmem:[%s7231_s2 + $0x280] sm:$0xff] }
  0x65   : > { %727 = vmatprep.mubr.bf16.mxu0 %v7235_v2  ;;  %1563 = vmatprep.mubr.bf16.mxu1 %v7235_v2 }
  0x67   : > { %366 = vperm.xlu1 %4214, %v280_v7   ;;  %361 = vperm.xlu0 %4213, %v279_v8   ;;  %v4053_v8 = vld [vmem:[%s7231_s2 + $0x298] sm:$0xff] }
  0x6b   : > { %376 = vperm.xlu1 %4214, %v282_v9   ;;  %371 = vperm.xlu0 %4213, %v281_v12   ;;  %v4052_v9 = vld [vmem:[%s7231_s2 + $0x290] sm:$0xff] }
  0x6c   : > { %3894 = vmatmul.mubr.msk.bf16.gmra.mrb[40].mxu0 %vm539_vm1, %v4236_v13  ;;  %3991 = vmatmul.mubr.msk.bf16.gmra.mrb[40].mxu1 %vm539_vm1, %v4237_v14  ;;  %v4055_v13 = vld [vmem:[%s7231_s2 + $0x2a8] sm:$0xff]  ;;  %v4054_v14 = vld [vmem:[%s7231_s2 + $0x2a0] sm:$0xff] }
  0x6d   : > { %737 = vmatprep.mubr.bf16.mxu0 %v7235_v2  ;;  %1573 = vmatprep.mubr.bf16.mxu1 %v7235_v2 }
  0x6f   : > { %386 = vperm.xlu1 %4214, %v284_v15   ;;  %381 = vperm.xlu0 %4213, %v283_v16   ;;  %v4057_v16 = vld [vmem:[%s7231_s2 + $0x2b8] sm:$0xff] }
  0x73   : > { %396 = vperm.xlu1 %4214, %v286_v17   ;;  %391 = vperm.xlu0 %4213, %v285_v18   ;;  %v4056_v17 = vld [vmem:[%s7231_s2 + $0x2b0] sm:$0xff] }
  0x74   : > { %3895 = vmatmul.mubr.msk.bf16.gmra.mrb[44].mxu0 %vm539_vm1, %v4238_v19  ;;  %3992 = vmatmul.mubr.msk.bf16.gmra.mrb[44].mxu1 %vm539_vm1, %v4239_v20  ;;  %v4059_v20 = vld [vmem:[%s7231_s2 + $0x2c8] sm:$0xff] }
  0x75   : > { %747 = vmatprep.mubr.bf16.mxu0 %v7235_v2  ;;  %1583 = vmatprep.mubr.bf16.mxu1 %v7235_v2 }
  0x77   : > { %406 = vperm.xlu1 %4214, %v288_v21   ;;  %401 = vperm.xlu0 %4213, %v287_v22   ;;  %v4058_v21 = vld [vmem:[%s7231_s2 + $0x2c0] sm:$0xff] }
  0x7b   : > { %416 = vperm.xlu1 %4214, %v290_v23   ;;  %411 = vperm.xlu0 %4213, %v289_v24   ;;  %v4061_v23 = vld [vmem:[%s7231_s2 + $0x2d8] sm:$0xff]  ;;  %v4060_v24 = vld [vmem:[%s7231_s2 + $0x2d0] sm:$0xff] }
  0x7c   : > { %3896 = vmatmul.mubr.msk.bf16.gmra.mrb[48].mxu0 %vm539_vm1, %v4240_v25  ;;  %3993 = vmatmul.mubr.msk.bf16.gmra.mrb[48].mxu1 %vm539_vm1, %v4241_v26  ;;  %v4063_v26 = vld [vmem:[%s7231_s2 + $0x2e8] sm:$0xff] }
  0x7d   : > { %757 = vmatprep.mubr.bf16.mxu0 %v7235_v2  ;;  %1593 = vmatprep.mubr.bf16.mxu1 %v7235_v2 }
  0x7f   : > { %426 = vperm.xlu1 %4214, %v292_v27   ;;  %421 = vperm.xlu0 %4213, %v291_v28   ;;  %v4062_v27 = vld [vmem:[%s7231_s2 + $0x2e0] sm:$0xff] }
  0x83   : > { %436 = vperm.xlu1 %4214, %v294_v29   ;;  %431 = vperm.xlu0 %4213, %v293_v30   ;;  %v4065_v30 = vld [vmem:[%s7231_s2 + $0x2f8] sm:$0xff] }
  0x84   : > { %3897 = vmatmul.mubr.msk.bf16.gmra.mrb[52].mxu0 %vm539_vm1, %v4242_v31  ;;  %3994 = vmatmul.mubr.msk.bf16.gmra.mrb[52].mxu1 %vm539_vm1, %v4243_v32  ;;  %v4064_v31 = vld [vmem:[%s7231_s2 + $0x2f0] sm:$0xff] }
  0x85   : > { %767 = vmatprep.mubr.bf16.mxu0 %v7235_v2  ;;  %1603 = vmatprep.mubr.bf16.mxu1 %v7235_v2 }
  0x87   : > { %446 = vperm.xlu1 %4214, %v296_v33   ;;  %441 = vperm.xlu0 %4213, %v295_v34   ;;  %v4135_v33 = vld [vmem:[%s7231_s2 + $0x308] sm:$0xff]  ;;  %v4134_v34 = vld [vmem:[%s7231_s2 + $0x300] sm:$0xff] }
  0x8b   : > { %456 = vperm.xlu1 %4214, %v298_v35   ;;  %451 = vperm.xlu0 %4213, %v297_v36   ;;  %v4137_v36 = vld [vmem:[%s7231_s2 + $0x318] sm:$0xff] }
  0x8c   : > { %3898 = vmatmul.mubr.msk.bf16.gmra.mrb[56].mxu0 %vm539_vm1, %v4244_v37  ;;  %3995 = vmatmul.mubr.msk.bf16.gmra.mrb[56].mxu1 %vm539_vm1, %v4245_v38  ;;  %v4136_v37 = vld [vmem:[%s7231_s2 + $0x310] sm:$0xff] }
  0x8d   : > { %777 = vmatprep.mubr.bf16.mxu0 %v7235_v2  ;;  %1613 = vmatprep.mubr.bf16.mxu1 %v7235_v2 }
  0x8e   : > { %v5220_v41 = vpop.permute.xlu0 %1145  ;;  %v5234_v46 = vpop.permute.xlu1 %1155 }
  0x8f   : > { %2083 = vperm.xlu1 %4214, %v4035_v39   ;;  %2078 = vperm.xlu0 %4213, %v4034_v40   ;;  %v4139_v40 = vld [vmem:[%s7231_s2 + $0x328] sm:$0xff] }
  0x92   : > { %v5242_v49 = vpop.permute.xlu0 %1150  ;;  %v5246_v50 = vpop.permute.xlu1 %1160 }
  0x93   : > { %2093 = vperm.xlu1 %4214, %v4037_v42   ;;  %2088 = vperm.xlu0 %4213, %v4036_v43   ;;  %v4138_v42 = vld [vmem:[%s7231_s2 + $0x320] sm:$0xff] }
  0x94   : > { %3899 = vmatmul.mubr.msk.bf16.gmra.mrb[60].mxu0 %vm539_vm1, %v4246_v44  ;;  %3996 = vmatmul.mubr.msk.bf16.gmra.mrb[60].mxu1 %vm539_vm1, %v4247_v45  ;;  %v4141_v44 = vld [vmem:[%s7231_s2 + $0x338] sm:$0xff]  ;;  %v4140_v45 = vld [vmem:[%s7231_s2 + $0x330] sm:$0xff] }
  0x96   : > { %v5254_v53 = vpop.permute.xlu0 %1165  ;;  %v5262_v56 = vpop.permute.xlu1 %1170 }
  0x97   : > { %2103 = vperm.xlu1 %4214, %v4039_v47   ;;  %2098 = vperm.xlu0 %4213, %v4038_v48   ;;  %v4143_v48 = vld [vmem:[%s7231_s2 + $0x348] sm:$0xff] }
  0x9a   : > { %v5270_v59 = vpop.permute.xlu0 %1175  ;;  %v5272_v60 = vpop.permute.xlu1 %1180 }
  0x9b   : > { %2113 = vperm.xlu1 %4214, %v4041_v51   ;;  %2108 = vperm.xlu0 %4213, %v4040_v52   ;;  %v4142_v51 = vld [vmem:[%s7231_s2 + $0x340] sm:$0xff] }
  0x9e   : > { %v5280_v63 = vpop.permute.xlu0 %1185  ;;  %v5288_v3 = vpop.permute.xlu1 %1190 }
  0x9f   : > { %2123 = vperm.xlu1 %4214, %v4043_v54   ;;  %2118 = vperm.xlu0 %4213, %v4042_v55   ;;  %v4145_v55 = vld [vmem:[%s7231_s2 + $0x358] sm:$0xff] }
  0xa2   : > { %v5296_v6 = vpop.permute.xlu0 %1195  ;;  %v5298_v7 = vpop.permute.xlu1 %1200 }
  0xa3   : > { %2133 = vperm.xlu1 %4214, %v4045_v57   ;;  %2128 = vperm.xlu0 %4213, %v4044_v58   ;;  %v4144_v57 = vld [vmem:[%s7231_s2 + $0x350] sm:$0xff] }
  0xa6   : > { %v5306_v12 = vpop.permute.xlu0 %1205  ;;  %v5314_v15 = vpop.permute.xlu1 %1210 }
  0xa7   : > { %2143 = vperm.xlu1 %4214, %v4047_v61   ;;  %2138 = vperm.xlu0 %4213, %v4046_v62   ;;  %v4147_v61 = vld [vmem:[%s7231_s2 + $0x368] sm:$0xff]  ;;  %v4146_v62 = vld [vmem:[%s7231_s2 + $0x360] sm:$0xff] }
  0xaa   : > { %v5322_v18 = vpop.permute.xlu0 %1215  ;;  %v5324_v19 = vpop.permute.xlu1 %1220 }
  0xab   : > { %2153 = vperm.xlu1 %4214, %v4049_v0   ;;  %2148 = vperm.xlu0 %4213, %v4048_v1   ;;  %7260 = vst [vmem:[#allocation4_spill] sm:$0xff] %v5324_v19  ;;  %v4149_v1 = vld [vmem:[%s7231_s2 + $0x378] sm:$0xff] }
  0xae   : > { %v5332_v22 = vpop.permute.xlu0 %1225  ;;  %v5340_v25 = vpop.permute.xlu1 %1230 }
  0xaf   : > { %2163 = vperm.xlu1 %4214, %v4051_v4   ;;  %2158 = vperm.xlu0 %4213, %v4050_v5   ;;  %7261 = vst [vmem:[#allocation5_spill] sm:$0xff] %v5332_v22  ;;  %7262 = vst [vmem:[#allocation6_spill] sm:$0xff] %v5340_v25  ;;  %v4148_v4 = vld [vmem:[%s7231_s2 + $0x370] sm:$0xff] }
  0xb2   : > { %v5348_v28 = vpop.permute.xlu0 %1235  ;;  %v5350_v29 = vpop.permute.xlu1 %1240 }
  0xb3   : > { %2173 = vperm.xlu1 %4214, %v4053_v8   ;;  %2168 = vperm.xlu0 %4213, %v4052_v9   ;;  %7263 = vst [vmem:[#allocation7_spill] sm:$0xff] %v5348_v28  ;;  %7264 = vst [vmem:[#allocation8_spill] sm:$0xff] %v5350_v29  ;;  %v4151_v9 = vld [vmem:[%s7231_s2 + $0x388] sm:$0xff] }
  0xb6   : > { %v5358_v32 = vpop.permute.xlu0 %1245  ;;  %v5366_v35 = vpop.permute.xlu1 %1250 }
  0xb7   : > { %2183 = vperm.xlu1 %4214, %v4055_v13   ;;  %2178 = vperm.xlu0 %4213, %v4054_v14   ;;  %7265 = vst [vmem:[#allocation9_spill] sm:$0xff] %v5358_v32  ;;  %7266 = vst [vmem:[#allocation10_spill] sm:$0xff] %v5366_v35  ;;  %v4150_v13 = vld [vmem:[%s7231_s2 + $0x380] sm:$0xff] }
  0xba   : > { %v5374_v38 = vpop.permute.xlu0 %1255  ;;  %v5376_v39 = vpop.permute.xlu1 %1260 }
  0xbb   : > { %2193 = vperm.xlu1 %4214, %v4057_v16   ;;  %2188 = vperm.xlu0 %4213, %v4056_v17   ;;  %7267 = vst [vmem:[#allocation11_spill] sm:$0xff] %v5374_v38  ;;  %7268 = vst [vmem:[#allocation12_spill] sm:$0xff] %v5376_v39 }
  0xbe   : > { %v5384_v43 = vpop.permute.xlu0 %1265  ;;  %v5392_v47 = vpop.permute.xlu1 %1270 }
  0xbf   : > { %2203 = vperm.xlu1 %4214, %v4059_v20   ;;  %2198 = vperm.xlu0 %4213, %v4058_v21   ;;  %7269 = vst [vmem:[#allocation13_spill] sm:$0xff] %v5384_v43  ;;  %7270 = vst [vmem:[#allocation14_spill] sm:$0xff] %v5392_v47  ;;  %v4153_v20 = vld [vmem:[%s7231_s2 + $0x398] sm:$0xff]  ;;  %v4152_v21 = vld [vmem:[%s7231_s2 + $0x390] sm:$0xff] }
  0xc2   : > { %v5400_v52 = vpop.permute.xlu0 %1275  ;;  %v5402_v54 = vpop.permute.xlu1 %1280 }
  0xc3   : > { %2213 = vperm.xlu1 %4214, %v4061_v23   ;;  %2208 = vperm.xlu0 %4213, %v4060_v24   ;;  %7271 = vst [vmem:[#allocation15_spill] sm:$0xff] %v5400_v52  ;;  %7272 = vst [vmem:[#allocation16_spill] sm:$0xff] %v5402_v54 }
  0xc6   : > { %v5410_v58 = vpop.permute.xlu0 %1285  ;;  %v5418_v0 = vpop.permute.xlu1 %1290 }
  0xc7   : > { %2223 = vperm.xlu1 %4214, %v4063_v26   ;;  %2218 = vperm.xlu0 %4213, %v4062_v27   ;;  %7273 = vst [vmem:[#allocation17_spill] sm:$0xff] %v5410_v58  ;;  %7274 = vst [vmem:[#allocation18_spill] sm:$0xff] %v5418_v0 }
  0xca   : > { %v5426_v5 = vpop.permute.xlu0 %1295  ;;  %v5428_v8 = vpop.permute.xlu1 %1300 }
  0xcb   : > { %2233 = vperm.xlu1 %4214, %v4065_v30   ;;  %2228 = vperm.xlu0 %4213, %v4064_v31   ;;  %7275 = vst [vmem:[#allocation19_spill] sm:$0xff] %v5426_v5  ;;  %7276 = vst [vmem:[#allocation20_spill] sm:$0xff] %v5428_v8 }
  0xce   : > { %v302_v14 = vpop.permute.xlu0 %301  ;;  %v307_v30 = vpop.permute.xlu1 %306 }
  0xcf   : > { %2970 = vperm.xlu1 %4214, %v4135_v33   ;;  %2965 = vperm.xlu0 %4213, %v4134_v34  }
  0xd3   : > { %2980 = vperm.xlu1 %4214, %v4137_v36   ;;  %2975 = vperm.xlu0 %4213, %v4136_v37  }
  0xd7   : > { %2990 = vperm.xlu1 %4214, %v4139_v40   ;;  %2985 = vperm.xlu0 %4213, %v4138_v42  }
  0xdb   : > { %3000 = vperm.xlu1 %4214, %v4141_v44   ;;  %2995 = vperm.xlu0 %4213, %v4140_v45  }
  0xdf   : > { %3010 = vperm.xlu1 %4214, %v4143_v48   ;;  %3005 = vperm.xlu0 %4213, %v4142_v51  }
  0xe3   : > { %3020 = vperm.xlu1 %4214, %v4145_v55   ;;  %3015 = vperm.xlu0 %4213, %v4144_v57   ;;  %v4154_v57 = vld [vmem:[%s7231_s2 + $0x3a0] sm:$0xff] }
  0xe7   : > { %3030 = vperm.xlu1 %4214, %v4147_v61   ;;  %3025 = vperm.xlu0 %4213, %v4146_v62  }
  0xeb   : > { %3040 = vperm.xlu1 %4214, %v4149_v1   ;;  %3035 = vperm.xlu0 %4213, %v4148_v4  }
  0xef   : > { %3050 = vperm.xlu1 %4214, %v4151_v9   ;;  %3045 = vperm.xlu0 %4213, %v4150_v13   ;;  %v629_v16 = vpop.f32.mrb[0].mxu0  ;;  %v1465_v17 = vpop.f32.mrb[0].mxu1 }
  0xf0   : > { %v630_v23 = vadd.f32 %v629_v16, %v302_v14  ;;  %v1466_v24 = vadd.f32 %v1465_v17, %v5220_v41  ;;  %v631_v26 = vpop.f32.mrb[1].mxu0  ;;  %v1467_v27 = vpop.f32.mrb[1].mxu1 }
  0xf1   : > { %v632_v31 = vadd.f32 %v631_v26, %v302_v14  ;;  %v1468_v33 = vadd.f32 %v1467_v27, %v5220_v41  ;;  %v633_v37 = vpop.f32.mrb[2].mxu0  ;;  %v1469_v40 = vpop.f32.mrb[2].mxu1  ;;  %v4155_v41 = vld [vmem:[%s7231_s2 + $0x3a8] sm:$0xff] }
  0xf2   : > { %v5444_v34 = vmul.f32 0.5, %v630_v23  ;;  %v5446_v36 = vmul.f32 0.5, %v1466_v24  ;;  %v634_v45 = vadd.f32 %v633_v37, %v307_v30  ;;  %v1470_v48 = vadd.f32 %v1469_v40, %v5242_v49  ;;  %v635_v51 = vpop.f32.mrb[3].mxu0  ;;  %v1471_v55 = vpop.f32.mrb[3].mxu1 }
  0xf3   : > { %3060 = vperm.xlu1 %4214, %v4153_v20   ;;  %3055 = vperm.xlu0 %4213, %v4152_v21   ;;  %v5448_v42 = vmul.f32 0.5, %v632_v31  ;;  %v5450_v44 = vmul.f32 0.5, %v1468_v33  ;;  %v636_v61 = vadd.f32 %v635_v51, %v307_v30  ;;  %v1472_v62 = vadd.f32 %v1471_v55, %v5242_v49  ;;  %v312_v9 = vpop.permute.xlu0 %311  ;;  %v4157_v49 = vld [vmem:[%s7231_s2 + $0x3b8] sm:$0xff]  ;;  %v4156_v20 = vld [vmem:[%s7231_s2 + $0x3b0] sm:$0xff]  ;;  %v317_v27 = vpop.permute.xlu1 %316 }
  0xf4   : > { %4288 = vtanh.f32 %v5444_v34  ;;  %v5462_v1 = vmul.f32 0.5, %v634_v45  ;;  %v5464_v4 = vmul.f32 0.5, %v1470_v48 }
  0xf5   : > { %4290 = vtanh.f32 %v5446_v36  ;;  %v5467_v13 = vmul.f32 0.5, %v636_v61  ;;  %v5470_v14 = vmul.f32 0.5, %v1472_v62  ;;  %v4158_v61 = vld [vmem:[%s7231_s2 + $0x3c0] sm:$0xff] }
  0xf6   : > { %4292 = vtanh.f32 %v5448_v42 }
  0xf7   : > { %3070 = vperm.xlu1 %4214, %v4155_v41   ;;  %3065 = vperm.xlu0 %4213, %v4154_v57   ;;  %4294 = vtanh.f32 %v5450_v44  ;;  %v639_v16 = vpop.f32.mrb[4].mxu0  ;;  %v1475_v17 = vpop.f32.mrb[4].mxu1 }
  0xf8   : > { %4296 = vtanh.f32 %v5462_v1  ;;  %v640_v21 = vadd.f32 %v639_v16, %v312_v9  ;;  %v1476_v23 = vadd.f32 %v1475_v17, %v5234_v46  ;;  %v641_v24 = vpop.f32.mrb[5].mxu0  ;;  %v1477_v26 = vpop.f32.mrb[5].mxu1 }
  0xf9   : > { %4298 = vtanh.f32 %v5464_v4  ;;  %v642_v30 = vadd.f32 %v641_v24, %v312_v9  ;;  %v1478_v31 = vadd.f32 %v1477_v26, %v5234_v46  ;;  %v643_v40 = vpop.f32.mrb[6].mxu0  ;;  %v1479_v45 = vpop.f32.mrb[6].mxu1  ;;  %v4159_v46 = vld [vmem:[%s7231_s2 + $0x3c8] sm:$0xff] }
  0xfa   : > { %4300 = vtanh.f32 %v5467_v13  ;;  %v5483_v33 = vmul.f32 0.5, %v640_v21  ;;  %v5485_v37 = vmul.f32 0.5, %v1476_v23  ;;  %v644_v55 = vadd.f32 %v643_v40, %v317_v27  ;;  %v645_v41 = vpop.f32.mrb[7].mxu0  ;;  %v1481_v57 = vpop.f32.mrb[7].mxu1  ;;  %v4160_v40 = vld [vmem:[%s7231_s2 + $0x3d0] sm:$0xff] }
  0xfb   : > { %3080 = vperm.xlu1 %4214, %v4157_v49   ;;  %3075 = vperm.xlu0 %4213, %v4156_v20   ;;  %4302 = vtanh.f32 %v5470_v14  ;;  %v5488_v48 = vmul.f32 0.5, %v642_v30  ;;  %v5490_v51 = vmul.f32 0.5, %v1478_v31  ;;  %v1480_v62 = vadd.f32 %v1479_v45, %v5246_v50  ;;  %v322_v20 = vpop.permute.xlu0 %321  ;;  %v4161_v31 = vld [vmem:[%s7231_s2 + $0x3d8] sm:$0xff] }
  0xfc   : > { %4304 = vtanh.f32 %v5483_v33  ;;  %v646_v9 = vadd.f32 %v645_v41, %v317_v27  ;;  %v1482_v16 = vadd.f32 %v1481_v57, %v5246_v50  ;;  %v5502_v17 = vmul.f32 0.5, %v644_v55 }
  0xfd   : > { %4306 = vtanh.f32 %v5485_v37  ;;  %v5505_v21 = vmul.f32 0.5, %v1480_v62 }
  0xfe   : > { %v4289_v49 = vpop.eup %4288  ;;  %4308 = vtanh.f32 %v5488_v48  ;;  %v5507_v23 = vmul.f32 0.5, %v646_v9  ;;  %v5510_v27 = vmul.f32 0.5, %v1482_v16 }
  0xff   : > { %3090 = vperm.xlu1 %4214, %v4159_v46   ;;  %3085 = vperm.xlu0 %4213, %v4158_v61   ;;  %v4291_v24 = vpop.eup %4290  ;;  %v916_v26 = vadd.f32 1.0, %v4289_v49  ;;  %4310 = vtanh.f32 %v5490_v51  ;;  %v649_v50 = vpop.f32.mrb[8].mxu0 }
 0x100   : > { %v1485_v30 = vpop.f32.mrb[8].mxu1  ;;  %v4293_v45 = vpop.eup %4292  ;;  %v1752_v55 = vadd.f32 1.0, %v4291_v24  ;;  %4312 = vtanh.f32 %v5502_v17  ;;  %v650_v41 = vadd.f32 %v649_v50, %v322_v20  ;;  %v4163_v50 = vld [vmem:[%s7231_s2 + $0x3e8] sm:$0xff] }
 0x101   : > { %v1486_v57 = vadd.f32 %v1485_v30, %v5254_v53  ;;  %v651_v46 = vpop.f32.mrb[9].mxu0  ;;  %v1487_v61 = vpop.f32.mrb[9].mxu1  ;;  %4314 = vtanh.f32 %v5505_v21  ;;  %v5522_v49 = vmul.f32 %v916_v26, %v5444_v34  ;;  %v917_v10 = vadd.f32 1.0, %v4293_v45 }
 0x102   : > { %v4295_v62 = vpop.eup %4294  ;;  %v652_v9 = vadd.f32 %v651_v46, %v322_v20  ;;  %4316 = vtanh.f32 %v5507_v23  ;;  %v5525_v2 = vmul.f32 0.5, %v650_v41  ;;  %v653_v24 = vpop.f32.mrb[10].mxu0  ;;  %v4162_v41 = vld [vmem:[%s7231_s2 + $0x3e0] sm:$0xff]  ;;  %v1488_v58 = vadd.f32 %v1487_v61, %v5254_v53  ;;  %v4164_v61 = vld [vmem:[%s7231_s2 + $0x3f0] sm:$0xff] }
 0x103   : > { %v4297_v16 = vpop.eup %4296  ;;  %v1489_v11 = vpop.f32.mrb[10].mxu1  ;;  %3100 = vperm.xlu1 %4214, %v4161_v31   ;;  %3095 = vperm.xlu0 %4213, %v4160_v40   ;;  %4318 = vtanh.f32 %v5510_v27  ;;  %v5531_v20 = vmul.f32 0.5, %v1486_v57  ;;  %v5537_v31 = vmul.f32 %v1752_v55, %v5446_v36  ;;  %v1753_v52 = vadd.f32 1.0, %v4295_v62 }
 0x104   : > { %v4299_v30 = vpop.eup %4298  ;;  %v918_v8 = vadd.f32 1.0, %v4297_v16  ;;  %v655_v34 = vpop.f32.mrb[11].mxu0  ;;  %4320 = vtanh.f32 %v5525_v2  ;;  %v5540_v5 = vmul.f32 0.5, %v652_v9 }
 0x105   : > { %v1491_v26 = vpop.f32.mrb[11].mxu1  ;;  %v4301_v46 = vpop.eup %4300  ;;  %v1754_v40 = vadd.f32 1.0, %v4299_v30  ;;  %4322 = vtanh.f32 %v5531_v20 }
 0x106   : > { %v4303_v45 = vpop.eup %4302  ;;  %v327_v16 = vpop.permute.xlu1 %326  ;;  %v5543_v57 = vmul.f32 %v918_v8, %v5462_v1  ;;  %v919_v0 = vadd.f32 1.0, %v4301_v46  ;;  %4324 = vtanh.f32 %v5540_v5  ;;  %v5553_v1 = vmul.f32 0.5, %v1488_v58 }
 0x107   : > { %v4305_v54 = vpop.eup %4304  ;;  %v5548_v36 = vmul.f32 %v1754_v40, %v5464_v4  ;;  %v1755_v55 = vadd.f32 1.0, %v4303_v45  ;;  %v654_v30 = vadd.f32 %v653_v24, %v327_v16  ;;  %3110 = vperm.xlu1 %4214, %v4163_v50   ;;  %3105 = vperm.xlu0 %4213, %v4162_v41   ;;  %v659_v46 = vpop.f32.mrb[12].mxu0  ;;  %v4165_v4 = vld [vmem:[%s7231_s2 + $0x3f8] sm:$0xff]  ;;  %v5564_v24 = vmul.f32 %v917_v10, %v5448_v42 }
 0x108   : > { %v4307_v9 = vpop.eup %4306  ;;  %v920_v8 = vadd.f32 1.0, %v4305_v54  ;;  %v5555_v53 = vpop.f32.mrb[12].mxu1  ;;  %v5571_v43 = vmul.f32 %v919_v0, %v5467_v13  ;;  %4326 = vtanh.f32 %v5553_v1  ;;  %v1490_v10 = vadd.f32 %v1489_v11, %v5262_v56 }
 0x109   : > { %v4309_v62 = vpop.eup %4308  ;;  %v1756_v58 = vadd.f32 1.0, %v4307_v9  ;;  %v5568_v50 = vmul.f32 0.5, %v654_v30  ;;  %v661_v41 = vpop.f32.mrb[13].mxu0  ;;  %v5574_v39 = vmul.f32 %v1755_v55, %v5470_v14  ;;  %v656_v9 = vadd.f32 %v655_v34, %v327_v16  ;;  %v3784_v34 = vld [vmem:[%s7233_s4] sm:$0xff] }
 0x10a   : > { %v1497_v40 = vpop.f32.mrb[13].mxu1  ;;  %v4311_v45 = vpop.eup %4310  ;;  %v5579_v54 = vmul.f32 %v920_v8, %v5483_v33  ;;  %v921_v30 = vadd.f32 1.0, %v4309_v62  ;;  %v5587_v55 = vmul.f32 0.5, %v1490_v10  ;;  %v1492_v11 = vadd.f32 %v1491_v26, %v5262_v56 }
 0x10b   : > { %v332_v47 = vpop.permute.xlu0 %331  ;;  %v4313_v42 = vpop.eup %4312  ;;  %4328 = vtanh.f32 %v5568_v50  ;;  %3120 = vperm.xlu1 %4214, %v4165_v4   ;;  %3115 = vperm.xlu0 %4213, %v4164_v61   ;;  %v5585_v13 = vmul.f32 %v1756_v58, %v5485_v37  ;;  %v1757_v62 = vadd.f32 1.0, %v4311_v45  ;;  %v5593_v4 = vmul.f32 0.5, %v656_v9 }
 0x10c   : > { %v663_v38 = vpop.f32.mrb[14].mxu0  ;;  %v5582_v35 = vpop.f32.mrb[14].mxu1  ;;  %v922_v14 = vadd.f32 1.0, %v4313_v42  ;;  %v660_v61 = vadd.f32 %v659_v46, %v332_v47  ;;  %4330 = vtanh.f32 %v5587_v55  ;;  %v5599_v56 = vmul.f32 0.5, %v1492_v11 }
 0x10d   : > { %v4315_v0 = vpop.eup %4314  ;;  %v665_v33 = vpop.f32.mrb[15].mxu0  ;;  %4332 = vtanh.f32 %v5593_v4  ;;  %v1817_v9 = vmul.f32 %v1753_v52, %v5450_v44 }
 0x10e   : > { %v1501_v8 = vpop.f32.mrb[15].mxu1  ;;  %v4317_v16 = vpop.eup %4316  ;;  %v1758_v32 = vadd.f32 1.0, %v4315_v0  ;;  %v5596_v37 = vmul.f32 %v922_v14, %v5502_v17  ;;  %v5605_v45 = vmul.f32 0.5, %v660_v61  ;;  %4334 = vtanh.f32 %v5599_v56 }
 0x10f   : > { %v4319_v29 = vpop.eup %4318  ;;  %v923_v58 = vadd.f32 1.0, %v4317_v16  ;;  %3787 = vperm.xlu0 %4213, %v3784_v34   ;;  %v669_v14 = vpop.f32.mrb[16].mxu0  ;;  %v1883_v17 = vpack.c.bf16 %v5574_v39, %v1817_v9  ;;  %v7278_v9 = vpack.c.bf16 %v5543_v57, %v5522_v49 }
 0x110   : > { %v4321_v26 = vpop.eup %4320  ;;  %v5602_v10 = vmul.f32 %v1758_v32, %v5505_v21  ;;  %v1759_v42 = vadd.f32 1.0, %v4319_v29  ;;  %v1505_v11 = vpop.f32.mrb[16].mxu1  ;;  %v5612_v32 = vmul.f32 %v921_v30, %v5488_v48  ;;  %v5615_v29 = vmul.f32 %v1757_v62, %v5490_v51 }
 0x111   : > { %v4323_v46 = vpop.eup %4322  ;;  %v924_v0 = vadd.f32 1.0, %v4321_v26  ;;  %4336 = vtanh.f32 %v5605_v45  ;;  %v671_v52 = vpop.f32.mrb[17].mxu0  ;;  %v5623_v61 = vmul.f32 %v923_v58, %v5507_v23  ;;  %v1496_v48 = vadd.f32 %v5555_v53, %v5270_v59  ;;  %1921 = vmatprep.subr.bf16.mxu0 %v1883_v17 }
 0x112   : > { %v5620_v44 = vpop.f32.mrb[17].mxu1  ;;  %v4325_v34 = vpop.eup %4324  ;;  %v5626_v26 = vmul.f32 %v1759_v42, %v5510_v27  ;;  %v662_v51 = vadd.f32 %v661_v41, %v332_v47  ;;  %v1760_v30 = vadd.f32 1.0, %v4323_v46  ;;  %v1498_v62 = vadd.f32 %v1497_v40, %v5270_v59 }
 0x113   : > { %v337_v16 = vpop.permute.xlu1 %336  ;;  %v1046_v21 = vpack.c.bf16 %v5571_v43, %v5564_v24  ;;  %v5634_v28 = vpop.f32.mrb[18].mxu0  ;;  %v5639_v27 = vmul.f32 %v924_v0, %v5525_v2  ;;  %v5641_v58 = vmul.f32 0.5, %v1496_v48  ;;  %v925_v40 = vadd.f32 1.0, %v4325_v34 }
 0x114   : > { %v5636_v25 = vpop.f32.mrb[18].mxu1  ;;  %v4327_v23 = vpop.eup %4326  ;;  %v5643_v53 = vmul.f32 0.5, %v662_v51  ;;  %v664_v47 = vadd.f32 %v663_v38, %v337_v16  ;;  %v5649_v43 = vmul.f32 0.5, %v1498_v62  ;;  %v1500_v24 = vadd.f32 %v5582_v35, %v5272_v60 }
 0x115   : > { %v5645_v41 = vpop.f32.mrb[19].mxu0  ;;  %v5647_v59 = vpop.f32.mrb[19].mxu1  ;;  %1969 = vmatprep.subr.bf16.mxu1 %v1046_v21  ;;  %v666_v2 = vadd.f32 %v665_v33, %v337_v16  ;;  %4338 = vtanh.f32 %v5641_v58  ;;  %v7277_v38 = vpack.c.bf16 %v5548_v36, %v5537_v31  ;;  %v1502_v17 = vadd.f32 %v1501_v8, %v5272_v60 }
 0x116   : > { %v4329_v39 = vpop.eup %4328  ;;  %v5654_v46 = vmul.f32 0.5, %v664_v47  ;;  %1970 = vmatpush1.bf16.msra.mxu1 %v7278_v9  ;;  %v342_v0 = vpop.permute.xlu0 %341  ;;  %v1761_v21 = vadd.f32 1.0, %v4327_v23  ;;  %4340 = vtanh.f32 %v5643_v53  ;;  %v5664_v35 = vmul.f32 0.5, %v1500_v24 }
 0x117   : > { %v926_v42 = vadd.f32 1.0, %v4329_v39  ;;  %1922 = vmatpush1.bf16.msra.mxu0 %v7277_v38  ;;  %v5666_v33 = vmul.f32 0.5, %v666_v2  ;;  %v4331_v34 = vpop.eup %4330  ;;  %4342 = vtanh.f32 %v5649_v43  ;;  %v5672_v31 = vmul.f32 0.5, %v1502_v17  ;;  %v679_v57 = vpop.f32.mrb[20].mxu0 }
 0x118   : > { %v670_v49 = vadd.f32 %v669_v14, %v342_v0  ;;  %v5674_v36 = vpop.f32.mrb[20].mxu1  ;;  %v4333_v60 = vpop.eup %4332  ;;  %v1762_v8 = vadd.f32 1.0, %v4331_v34  ;;  %4344 = vtanh.f32 %v5654_v46  ;;  %v1506_v48 = vadd.f32 %v1505_v11, %v5280_v63 }
 0x119   : > { %v5669_v16 = vmul.f32 %v926_v42, %v5568_v50  ;;  %v672_v51 = vadd.f32 %v671_v52, %v342_v0  ;;  %v5678_v62 = vpop.f32.mrb[21].mxu0  ;;  %v5680_v23 = vpop.f32.mrb[21].mxu1  ;;  %v5683_v47 = vmul.f32 %v1760_v30, %v5531_v20  ;;  %4346 = vtanh.f32 %v5664_v35 }
 0x11a   : > { %v4335_v50 = vpop.eup %4334  ;;  %v5688_v39 = vmul.f32 0.5, %v670_v49  ;;  %v5691_v2 = vmul.f32 %v925_v40, %v5540_v5  ;;  %v5694_v11 = vmul.f32 %v1762_v8, %v5587_v55  ;;  %4348 = vtanh.f32 %v5666_v33  ;;  %v5699_v20 = vpop.f32.mrb[22].mxu0 }
 0x11b   : > { %v4337_v24 = vpop.eup %4336  ;;  %v5697_v52 = vmul.f32 0.5, %v1506_v48  ;;  %v5701_v30 = vpop.f32.mrb[22].mxu1  ;;  %v5704_v42 = vmul.f32 %v1761_v21, %v5553_v1  ;;  %v927_v38 = vadd.f32 1.0, %v4333_v60  ;;  %4350 = vtanh.f32 %v5672_v31 }
 0x11c   : > { %v5707_v9 = vmul.f32 0.5, %v672_v51  ;;  %v5709_v5 = vpop.f32.mrb[23].mxu0  ;;  %v5711_v55 = vpop.f32.mrb[23].mxu1  ;;  %v1763_v17 = vadd.f32 1.0, %v4335_v50  ;;  %4352 = vtanh.f32 %v5688_v39  ;;  %v1508_v0 = vadd.f32 %v5620_v44, %v5280_v63 }
 0x11d   : > { %v347_v1 = vpop.permute.xlu1 %346  ;;  %v928_v21 = vadd.f32 1.0, %v4337_v24  ;;  %4354 = vtanh.f32 %v5697_v52  ;;  %v1885_v34 = vpack.c.bf16 %v5626_v26, %v5615_v29  ;;  %v1048_v49 = vpack.c.bf16 %v5623_v61, %v5612_v32  ;;  %v352_v60 = vpop.permute.xlu0 %351 }
 0x11e   : > { %4356 = vtanh.f32 %v5707_v9  ;;  %v5724_v8 = vmul.f32 0.5, %v1508_v0  ;;  %v674_v48 = vadd.f32 %v5634_v28, %v347_v1  ;;  %v1510_v63 = vadd.f32 %v5636_v25, %v5288_v3 }
 0x11f   : > { %v4339_v44 = vpop.eup %4338  ;;  %1923 = vmatprep.subr.bf16.mxu0 %v1885_v34  ;;  %1971 = vmatprep.subr.bf16.mxu1 %v1048_v49  ;;  %v676_v51 = vadd.f32 %v5645_v41, %v347_v1  ;;  %v1512_v29 = vadd.f32 %v5647_v59, %v5288_v3  ;;  %v680_v26 = vadd.f32 %v679_v57, %v352_v60  ;;  %v5732_v32 = vpop.f32.mrb[24].mxu0 }
 0x120   : > { %v5734_v61 = vpop.f32.mrb[24].mxu1  ;;  %v4341_v50 = vpop.eup %4340  ;;  %v1764_v24 = vadd.f32 1.0, %v4339_v44  ;;  %4358 = vtanh.f32 %v5724_v8  ;;  %v5737_v28 = vmul.f32 0.5, %v674_v48  ;;  %v5739_v25 = vmul.f32 0.5, %v1510_v63 }
 0x121   : > { %v7279_v0 = vpack.c.bf16 %v5602_v10, %v5585_v13  ;;  %v7280_v3 = vpack.c.bf16 %v5596_v37, %v5579_v54  ;;  %v5747_v41 = vpop.f32.mrb[25].mxu0  ;;  %v5749_v59 = vpop.f32.mrb[25].mxu1  ;;  %v5752_v1 = vmul.f32 %v927_v38, %v5593_v4  ;;  %v1827_v34 = vmul.f32 %v1763_v17, %v5599_v56 }
 0x122   : > { %v4343_v57 = vpop.eup %4342  ;;  %v5755_v49 = vmul.f32 0.5, %v676_v51  ;;  %v5757_v48 = vmul.f32 0.5, %v1512_v29  ;;  %v5760_v10 = vmul.f32 %v928_v21, %v5605_v45  ;;  %4360 = vtanh.f32 %v5737_v28  ;;  %v5767_v63 = vpop.f32.mrb[26].mxu0 }
 0x123   : > { %1924 = vmatpush1.bf16.msra.mxu0 %v7279_v0  ;;  %1972 = vmatpush1.bf16.msra.mxu1 %v7280_v3  ;;  %v4345_v13 = vpop.eup %4344  ;;  %v5763_v54 = vmul.f32 0.5, %v680_v26  ;;  %v1516_v37 = vadd.f32 %v5674_v36, %v5296_v6  ;;  %v5769_v4 = vpop.f32.mrb[26].mxu1  ;;  %v929_v38 = vadd.f32 1.0, %v4341_v50  ;;  %4362 = vtanh.f32 %v5739_v25 }
 0x124   : > { %v4347_v56 = vpop.eup %4346  ;;  %v930_v17 = vadd.f32 1.0, %v4345_v13  ;;  %v682_v44 = vadd.f32 %v5678_v62, %v352_v60  ;;  %v5773_v45 = vpop.f32.mrb[27].mxu0  ;;  %v5778_v29 = vmul.f32 %v1764_v24, %v5641_v58  ;;  %4364 = vtanh.f32 %v5755_v49 }
 0x125   : > { %v5775_v21 = vpop.f32.mrb[27].mxu1  ;;  %v4349_v51 = vpop.eup %4348  ;;  %v1766_v36 = vadd.f32 1.0, %v4347_v56  ;;  %v5781_v26 = vmul.f32 0.5, %v1516_v37  ;;  %4366 = vtanh.f32 %v5757_v48  ;;  %v1518_v24 = vadd.f32 %v5680_v23, %v5296_v6 }
 0x126   : > { %v4351_v0 = vpop.eup %4350  ;;  %v5784_v50 = vmul.f32 %v930_v17, %v5654_v46  ;;  %v931_v3 = vadd.f32 1.0, %v4349_v51  ;;  %v5787_v62 = vmul.f32 0.5, %v682_v44  ;;  %4368 = vtanh.f32 %v5763_v54  ;;  %v362_v46 = vpop.permute.xlu0 %361 }
 0x127   : > { %v4353_v60 = vpop.eup %4352  ;;  %v5790_v13 = vmul.f32 %v1766_v36, %v5664_v35  ;;  %v1767_v58 = vadd.f32 1.0, %v4351_v0  ;;  %v5795_v56 = vadd.f32 1.0, %v4343_v57  ;;  %4370 = vtanh.f32 %v5781_v26  ;;  %v5800_v44 = vpop.f32.mrb[28].mxu0 }
 0x128   : > { %v4355_v37 = vpop.eup %4354  ;;  %v932_v17 = vadd.f32 1.0, %v4353_v60  ;;  %v5802_v51 = vpop.f32.mrb[28].mxu1  ;;  %v5805_v36 = vmul.f32 %v929_v38, %v5643_v53  ;;  %4372 = vtanh.f32 %v5787_v62  ;;  %v5815_v14 = vmul.f32 %v931_v3, %v5666_v33 }
 0x129   : > { %v4357_v35 = vpop.eup %4356  ;;  %v1768_v23 = vadd.f32 1.0, %v4355_v37  ;;  %v5810_v57 = vpop.f32.mrb[29].mxu0  ;;  %v5818_v40 = vmul.f32 %v1767_v58, %v5672_v31  ;;  %v5820_v53 = vmul.f32 0.5, %v1518_v24  ;;  %v1887_v38 = vpack.c.bf16 %v1827_v34, %v5704_v42 }
 0x12a   : > { %v5812_v0 = vpop.f32.mrb[29].mxu1  ;;  %v357_v60 = vpop.permute.xlu1 %356  ;;  %v5824_v37 = vmul.f32 %v932_v17, %v5688_v39  ;;  %v1050_v22 = vpack.c.bf16 %v5752_v1, %v5691_v2  ;;  %v1520_v33 = vadd.f32 %v5701_v30, %v5298_v7  ;;  %v933_v42 = vadd.f32 1.0, %v4357_v35 }
 0x12b   : > { %v4359_v6 = vpop.eup %4358  ;;  %v684_v19 = vadd.f32 %v5699_v20, %v357_v60  ;;  %v5831_v3 = vpop.f32.mrb[30].mxu0  ;;  %v5836_v58 = vmul.f32 %v1768_v23, %v5697_v52  ;;  %4374 = vtanh.f32 %v5820_v53  ;;  %1925 = vmatprep.subr.bf16.mxu0 %v1887_v38  ;;  %v686_v39 = vadd.f32 %v5709_v5, %v357_v60 }
 0x12c   : > { %v5833_v31 = vpop.f32.mrb[30].mxu1  ;;  %v5840_v34 = vpop.f32.mrb[31].mxu0  ;;  %1973 = vmatprep.subr.bf16.mxu1 %v1050_v22  ;;  %v5846_v1 = vmul.f32 0.5, %v1520_v33  ;;  %v7281_v52 = vpack.c.bf16 %v5694_v11, %v5683_v47  ;;  %v1522_v24 = vadd.f32 %v5711_v55, %v5298_v7  ;;  %v690_v17 = vadd.f32 %v5732_v32, %v362_v46 }
 0x12d   : > { %v5842_v2 = vpop.f32.mrb[31].mxu1  ;;  %v4361_v20 = vpop.eup %4360  ;;  %v5844_v30 = vmul.f32 0.5, %v684_v19  ;;  %v1769_v35 = vadd.f32 1.0, %v4359_v6  ;;  %v7282_v60 = vpack.c.bf16 %v5669_v16, %v5639_v27  ;;  %v5857_v19 = vmul.f32 0.5, %v686_v39 }
 0x12e   : > { %1926 = vmatpush1.bf16.msra.mxu0 %v7281_v52  ;;  %v4363_v5 = vpop.eup %4362  ;;  %v934_v23 = vadd.f32 1.0, %v4361_v20  ;;  %v1526_v22 = vadd.f32 %v5734_v61, %v5306_v12  ;;  %v5862_v11 = vmul.f32 0.5, %v1522_v24  ;;  %v5864_v7 = vmul.f32 0.5, %v690_v17 }
 0x12f   : > { %1974 = vmatpush1.bf16.msra.mxu1 %v7282_v60  ;;  %v4365_v38 = vpop.eup %4364  ;;  %v1770_v47 = vadd.f32 1.0, %v4363_v5  ;;  %4376 = vtanh.f32 %v5844_v30  ;;  %v5872_v16 = vpop.f32.mrb[32].mxu0  ;;  %v692_v52 = vadd.f32 %v5747_v41, %v362_v46  ;;  %v1829_v5 = vmul.f32 %v5795_v56, %v5649_v43 }
 0x130   : > { %v4367_v55 = vpop.eup %4366  ;;  %v5867_v32 = vmul.f32 %v934_v23, %v5737_v28  ;;  %v935_v6 = vadd.f32 1.0, %v4365_v38  ;;  %4378 = vtanh.f32 %v5846_v1  ;;  %v5870_v27 = vmul.f32 0.5, %v1526_v22  ;;  %v5874_v61 = vpop.f32.mrb[32].mxu1 }
 0x131   : > { %v4369_v33 = vpop.eup %4368  ;;  %v5877_v39 = vmul.f32 %v1770_v47, %v5739_v25  ;;  %v1771_v20 = vadd.f32 1.0, %v4367_v55  ;;  %4380 = vtanh.f32 %v5857_v19  ;;  %v5881_v28 = vpop.f32.mrb[33].mxu0  ;;  %v5891_v22 = vmul.f32 %v933_v42, %v5707_v9 }
 0x132   : > { %v5883_v24 = vpop.f32.mrb[33].mxu1  ;;  %v4371_v17 = vpop.eup %4370  ;;  %v936_v60 = vadd.f32 1.0, %v4369_v33  ;;  %4382 = vtanh.f32 %v5862_v11  ;;  %v5894_v41 = vmul.f32 %v1769_v35, %v5724_v8  ;;  %v5904_v56 = vmul.f32 %v935_v6, %v5755_v49 }
 0x133   : > { %v4373_v25 = vpop.eup %4372  ;;  %4384 = vtanh.f32 %v5864_v7  ;;  %v5899_v38 = vpop.f32.mrb[34].mxu0  ;;  %v5907_v47 = vmul.f32 %v1771_v20, %v5757_v48  ;;  %v5910_v9 = vmul.f32 0.5, %v692_v52  ;;  %v1772_v55 = vadd.f32 1.0, %v4371_v17 }
 0x134   : > { %v5901_v43 = vpop.f32.mrb[34].mxu1  ;;  %4386 = vtanh.f32 %v5870_v27  ;;  %v5912_v8 = vpop.f32.mrb[35].mxu0  ;;  %v1528_v33 = vadd.f32 %v5749_v59, %v5306_v12  ;;  %v1889_v23 = vpack.c.bf16 %v5818_v40, %v1829_v5  ;;  %v1052_v49 = vpack.c.bf16 %v5815_v14, %v5805_v36 }
 0x135   : > { %v5914_v42 = vpop.f32.mrb[35].mxu1  ;;  %v367_v35 = vpop.permute.xlu1 %366  ;;  %v5922_v6 = vmul.f32 %v936_v60, %v5763_v54  ;;  %v937_v20 = vadd.f32 1.0, %v4373_v25  ;;  %v1530_v46 = vadd.f32 %v5769_v4, %v5314_v15  ;;  %4388 = vtanh.f32 %v5910_v9 }
 0x136   : > { %7283 = vst [vmem:[#allocation21_spill] sm:$0xff] %v5914_v42  ;;  %v4375_v48 = vpop.eup %4374  ;;  %v694_v52 = vadd.f32 %v5767_v63, %v367_v35  ;;  %v372_v42 = vpop.permute.xlu0 %371  ;;  %v5928_v17 = vmul.f32 0.5, %v1528_v33  ;;  %1927 = vmatprep.subr.bf16.mxu0 %v1889_v23  ;;  %1975 = vmatprep.subr.bf16.mxu1 %v1052_v49  ;;  %v696_v12 = vadd.f32 %v5773_v45, %v367_v35 }
 0x137   : > { %v1532_v14 = vadd.f32 %v5775_v21, %v5314_v15  ;;  %v5935_v59 = vmul.f32 0.5, %v1530_v46  ;;  %v7284_v54 = vpack.c.bf16 %v5790_v13, %v5778_v29  ;;  %v7285_v63 = vpack.c.bf16 %v5784_v50, %v5760_v10  ;;  %v5946_v36 = vpop.f32.mrb[36].mxu0  ;;  %v5948_v15 = vpop.f32.mrb[36].mxu1 }
 0x138   : > { %v5933_v40 = vmul.f32 0.5, %v694_v52  ;;  %v700_v4 = vadd.f32 %v5800_v44, %v372_v42  ;;  %v1536_v45 = vadd.f32 %v5802_v51, %v5322_v18  ;;  %v5951_v5 = vmul.f32 %v1772_v55, %v5781_v26  ;;  %v5958_v10 = vpop.f32.mrb[37].mxu0  ;;  %v5960_v50 = vpop.f32.mrb[37].mxu1 }
 0x139   : > { %1928 = vmatpush1.bf16.msra.mxu0 %v7284_v54  ;;  %1976 = vmatpush1.bf16.msra.mxu1 %v7285_v63  ;;  %v4377_v21 = vpop.eup %4376  ;;  %4390 = vtanh.f32 %v5928_v17  ;;  %v5954_v29 = vmul.f32 0.5, %v696_v12  ;;  %v5956_v13 = vmul.f32 0.5, %v1532_v14  ;;  %v1773_v51 = vadd.f32 1.0, %v4375_v48  ;;  %v5969_v55 = vpop.f32.mrb[38].mxu0 }
 0x13a   : > { %v4379_v44 = vpop.eup %4378  ;;  %v938_v23 = vadd.f32 1.0, %v4377_v21  ;;  %4392 = vtanh.f32 %v5933_v40  ;;  %v5963_v60 = vmul.f32 0.5, %v700_v4  ;;  %v5966_v46 = vmul.f32 0.5, %v1536_v45  ;;  %v5971_v33 = vpop.f32.mrb[38].mxu1 }
 0x13b   : > { %v4381_v25 = vpop.eup %4380  ;;  %v1774_v26 = vadd.f32 1.0, %v4379_v44  ;;  %4394 = vtanh.f32 %v5935_v59  ;;  %v702_v35 = vadd.f32 %v5810_v57, %v372_v42  ;;  %v1538_v52 = vadd.f32 %v5812_v0, %v5322_v18  ;;  %v5981_v14 = vpop.f32.mrb[39].mxu0 }
 0x13c   : > { %v4383_v49 = vpop.eup %4382  ;;  %v5974_v48 = vmul.f32 %v938_v23, %v5844_v30  ;;  %4396 = vtanh.f32 %v5954_v29  ;;  %v1891_v12 = vpack.c.bf16 %v5907_v47, %v5894_v41  ;;  %v5983_v54 = vpop.f32.mrb[39].mxu1  ;;  %v939_v63 = vadd.f32 1.0, %v4381_v25 }
 0x13d   : > { %v4385_v57 = vpop.eup %4384  ;;  %v5986_v42 = vmul.f32 %v1774_v26, %v5846_v1  ;;  %v1775_v4 = vadd.f32 1.0, %v4383_v49  ;;  %4398 = vtanh.f32 %v5956_v13  ;;  %v5990_v45 = vmul.f32 %v937_v20, %v5787_v62  ;;  %v377_v0 = vpop.permute.xlu1 %376 }
 0x13e   : > { %v4387_v30 = vpop.eup %4386  ;;  %4400 = vtanh.f32 %v5963_v60  ;;  %1929 = vmatprep.subr.bf16.mxu0 %v1891_v12  ;;  %v382_v41 = vpop.permute.xlu0 %381  ;;  %v5996_v47 = vmul.f32 %v1773_v51, %v5820_v53  ;;  %v940_v21 = vadd.f32 1.0, %v4385_v57  ;;  %v7286_v62 = vpack.c.bf16 %v5877_v39, %v5836_v58  ;;  %v7287_v39 = vld [vmem:[#allocation4_spill] sm:$0xff] }
 0x13f   : > { %4402 = vtanh.f32 %v5966_v46  ;;  %v1776_v20 = vadd.f32 1.0, %v4387_v30  ;;  %v6004_v44 = vmul.f32 0.5, %v702_v35  ;;  %v6006_v23 = vmul.f32 0.5, %v1538_v52  ;;  %v6010_v53 = vpop.f32.mrb[40].mxu0  ;;  %v6012_v51 = vpop.f32.mrb[40].mxu1  ;;  %v7289_v30 = vld [vmem:[#allocation5_spill] sm:$0xff] }
 0x140   : > { %1930 = vmatpush1.bf16.msra.mxu0 %v7286_v62  ;;  %v1054_v25 = vpack.c.bf16 %v5904_v56, %v5891_v22  ;;  %v4389_v26 = vpop.eup %4388  ;;  %v6015_v49 = vmul.f32 %v939_v63, %v5857_v19  ;;  %v6018_v12 = vmul.f32 %v1775_v4, %v5862_v11  ;;  %v704_v58 = vadd.f32 %v5831_v3, %v377_v0  ;;  %v6023_v52 = vpop.f32.mrb[41].mxu0 }
 0x141   : > { %v1540_v35 = vadd.f32 %v5833_v31, %v7287_v39  ;;  %v6025_v57 = vpop.f32.mrb[41].mxu1  ;;  %4404 = vtanh.f32 %v6006_v23  ;;  %v706_v22 = vadd.f32 %v5840_v34, %v377_v0  ;;  %v1542_v19 = vadd.f32 %v5842_v2, %v7287_v39  ;;  %v6044_v0 = vpop.f32.mrb[42].mxu0 }
 0x142   : > { %1977 = vmatprep.subr.bf16.mxu1 %v1054_v25  ;;  %v710_v11 = vadd.f32 %v5872_v16, %v382_v41  ;;  %v6033_v3 = vmul.f32 %v940_v21, %v5864_v7  ;;  %v6035_v63 = vmul.f32 0.5, %v704_v58  ;;  %v7288_v4 = vpack.c.bf16 %v5867_v32, %v5824_v37  ;;  %v6046_v2 = vpop.f32.mrb[42].mxu1  ;;  %v6056_v25 = vpop.f32.mrb[43].mxu0 }
 0x143   : > { %v4391_v56 = vpop.eup %4390  ;;  %v6037_v31 = vmul.f32 0.5, %v1540_v35  ;;  %v1546_v34 = vadd.f32 %v5874_v61, %v7289_v30  ;;  %v6049_v62 = vmul.f32 %v1776_v20, %v5870_v27  ;;  %4406 = vtanh.f32 %v6004_v44  ;;  %v6058_v37 = vpop.f32.mrb[43].mxu1 }
 0x144   : > { %1978 = vmatpush1.bf16.msra.mxu1 %v7288_v4  ;;  %v4393_v16 = vpop.eup %4392  ;;  %v6052_v7 = vmul.f32 0.5, %v706_v22  ;;  %v6054_v21 = vmul.f32 0.5, %v1542_v19  ;;  %4408 = vtanh.f32 %v6035_v63  ;;  %v6061_v58 = vmul.f32 0.5, %v710_v11 }
 0x145   : > { %v4395_v32 = vpop.eup %4394  ;;  %v942_v61 = vadd.f32 1.0, %v4393_v16  ;;  %v712_v39 = vadd.f32 %v5881_v28, %v382_v41  ;;  %4410 = vtanh.f32 %v6037_v31  ;;  %v6065_v35 = vmul.f32 0.5, %v1546_v34 }
 0x146   : > { %v4397_v27 = vpop.eup %4396  ;;  %v1778_v20 = vadd.f32 1.0, %v4395_v32  ;;  %v1548_v22 = vadd.f32 %v5883_v24, %v7289_v30  ;;  %v1777_v4 = vadd.f32 1.0, %v4391_v56  ;;  %4412 = vtanh.f32 %v6052_v7 }
 0x147   : > { %v4399_v19 = vpop.eup %4398  ;;  %v6070_v18 = vmul.f32 %v942_v61, %v5933_v40  ;;  %v943_v16 = vadd.f32 1.0, %v4397_v27  ;;  %4414 = vtanh.f32 %v6054_v21  ;;  %v6079_v32 = vpop.f32.mrb[44].mxu0  ;;  %v6086_v61 = vmul.f32 0.5, %v712_v39 }
 0x148   : > { %v4401_v11 = vpop.eup %4400  ;;  %v6074_v28 = vmul.f32 %v1778_v20, %v5935_v59  ;;  %v1779_v41 = vadd.f32 1.0, %v4399_v19  ;;  %v6077_v34 = vmul.f32 0.5, %v1548_v22  ;;  %v6081_v24 = vpop.f32.mrb[44].mxu1  ;;  %4416 = vtanh.f32 %v6061_v58 }
 0x149   : > { %v4403_v56 = vpop.eup %4402  ;;  %v944_v30 = vadd.f32 1.0, %v4401_v11  ;;  %v6088_v59 = vpop.f32.mrb[45].mxu0  ;;  %v6092_v22 = vadd.f32 1.0, %v4389_v26  ;;  %4418 = vtanh.f32 %v6065_v35  ;;  %v6098_v40 = vmul.f32 %v1777_v4, %v5928_v17 }
 0x14a   : > { %7290 = vst [vmem:[#allocation4_spill] sm:$0xff] %v6088_v59  ;;  %v6090_v27 = vpop.f32.mrb[45].mxu1  ;;  %v387_v20 = vpop.permute.xlu1 %386  ;;  %v1780_v1 = vadd.f32 1.0, %v4403_v56  ;;  %v6101_v11 = vmul.f32 %v943_v16, %v5954_v29  ;;  %v6104_v39 = vmul.f32 %v1779_v41, %v5956_v13  ;;  %4420 = vtanh.f32 %v6077_v34 }
 0x14b   : > { %7291 = vst [vmem:[#allocation5_spill] sm:$0xff] %v6090_v27  ;;  %v1893_v27 = vpack.c.bf16 %v6018_v12, %v5996_v47  ;;  %v6108_v26 = vpop.f32.mrb[46].mxu0  ;;  %v6110_v59 = vpop.f32.mrb[46].mxu1  ;;  %v6113_v56 = vmul.f32 %v944_v30, %v5963_v60  ;;  %v1056_v17 = vpack.c.bf16 %v6015_v49, %v5990_v45  ;;  %v714_v29 = vadd.f32 %v5899_v38, %v387_v20  ;;  %v7295_v60 = vld [vmem:[#allocation6_spill] sm:$0xff]  ;;  %v7297_v49 = vld [vmem:[#allocation21_spill] sm:$0xff] }
 0x14c   : > { %7292 = vst [vmem:[#allocation22_spill] sm:$0xff] %v6110_v59  ;;  %v4405_v19 = vpop.eup %4404  ;;  %v6119_v13 = vpop.f32.mrb[47].mxu0  ;;  %v6124_v12 = vmul.f32 %v1780_v1, %v5966_v46  ;;  %4422 = vtanh.f32 %v6086_v61  ;;  %v1550_v16 = vadd.f32 %v5901_v43, %v7295_v60  ;;  %v716_v41 = vadd.f32 %v5912_v8, %v387_v20 }
 0x14d   : > { %7293 = vst [vmem:[#allocation23_spill] sm:$0xff] %v6119_v13  ;;  %v6121_v4 = vpop.f32.mrb[47].mxu1  ;;  %v392_v47 = vpop.permute.xlu0 %391  ;;  %1931 = vmatprep.subr.bf16.mxu0 %v1893_v27  ;;  %1979 = vmatprep.subr.bf16.mxu1 %v1056_v17  ;;  %v6130_v45 = vmul.f32 0.5, %v714_v29  ;;  %v7296_v38 = vpack.c.bf16 %v5986_v42, %v5951_v5  ;;  %v1552_v46 = vadd.f32 %v7297_v49, %v7295_v60  ;;  %v1781_v43 = vadd.f32 1.0, %v4405_v19 }
 0x14e   : > { %7294 = vst [vmem:[#allocation24_spill] sm:$0xff] %v6121_v4  ;;  %v4407_v30 = vpop.eup %4406  ;;  %v720_v1 = vadd.f32 %v5946_v36, %v392_v47  ;;  %v7298_v4 = vld [vmem:[#allocation7_spill] sm:$0xff]  ;;  %v6140_v59 = vmul.f32 0.5, %v1550_v16  ;;  %v7299_v8 = vpack.c.bf16 %v5974_v48, %v5922_v6  ;;  %v6145_v20 = vmul.f32 0.5, %v716_v41 }
 0x14f   : > { %1932 = vmatpush1.bf16.msra.mxu0 %v7296_v38  ;;  %v1556_v27 = vadd.f32 %v5948_v15, %v7298_v4  ;;  %v4409_v13 = vpop.eup %4408  ;;  %v722_v5 = vadd.f32 %v5958_v10, %v392_v47  ;;  %4424 = vtanh.f32 %v6130_v45  ;;  %v6149_v36 = vmul.f32 0.5, %v1552_v46  ;;  %v6153_v15 = vpop.f32.mrb[48].mxu0 }
 0x150   : > { %1980 = vmatpush1.bf16.msra.mxu1 %v7299_v8  ;;  %v4411_v42 = vpop.eup %4410  ;;  %v946_v17 = vadd.f32 1.0, %v4409_v13  ;;  %v6151_v29 = vmul.f32 0.5, %v720_v1  ;;  %v6155_v19 = vpop.f32.mrb[48].mxu1  ;;  %4426 = vtanh.f32 %v6140_v59  ;;  %v1558_v49 = vadd.f32 %v5960_v50, %v7298_v4 }
 0x151   : > { %v4413_v60 = vpop.eup %4412  ;;  %v1782_v16 = vadd.f32 1.0, %v4411_v42  ;;  %v6158_v6 = vmul.f32 0.5, %v1556_v27  ;;  %v6160_v48 = vmul.f32 0.5, %v722_v5  ;;  %v6162_v10 = vpop.f32.mrb[49].mxu0  ;;  %4428 = vtanh.f32 %v6145_v20 }
 0x152   : > { %v6164_v13 = vpop.f32.mrb[49].mxu1  ;;  %v4415_v47 = vpop.eup %4414  ;;  %v6167_v41 = vmul.f32 %v946_v17, %v6035_v63  ;;  %v947_v38 = vadd.f32 1.0, %v4413_v60  ;;  %4430 = vtanh.f32 %v6149_v36  ;;  %v1895_v8 = vpack.c.bf16 %v6104_v39, %v6098_v40 }
 0x153   : > { %v4417_v46 = vpop.eup %4416  ;;  %v6173_v1 = vmul.f32 %v1782_v16, %v6037_v31  ;;  %v1783_v27 = vadd.f32 1.0, %v4415_v47  ;;  %v6178_v5 = vpop.f32.mrb[50].mxu0  ;;  %v1005_v17 = vmul.f32 %v6092_v22, %v5910_v9  ;;  %4432 = vtanh.f32 %v6151_v29 }
 0x154   : > { %v6180_v63 = vpop.f32.mrb[50].mxu1  ;;  %v4419_v42 = vpop.eup %4418  ;;  %v948_v4 = vadd.f32 1.0, %v4417_v46  ;;  %v6191_v16 = vadd.f32 1.0, %v4407_v30  ;;  %4434 = vtanh.f32 %v6158_v6  ;;  %1933 = vmatprep.subr.bf16.mxu0 %v1895_v8  ;;  %v6197_v47 = vmul.f32 %v1781_v43, %v6006_v23 }
 0x155   : > { %v6187_v31 = vpop.f32.mrb[51].mxu0  ;;  %v6189_v60 = vpop.f32.mrb[51].mxu1  ;;  %v1784_v39 = vadd.f32 1.0, %v4419_v42  ;;  %v6200_v46 = vmul.f32 %v947_v38, %v6052_v7  ;;  %v1847_v50 = vmul.f32 %v1783_v27, %v6054_v21  ;;  %v7301_v30 = vpack.c.bf16 %v6074_v28, %v6049_v62  ;;  %v7302_v21 = vld [vmem:[#allocation8_spill] sm:$0xff] }
 0x156   : > { %7300 = vst [vmem:[#allocation6_spill] sm:$0xff] %v6189_v60  ;;  %v4421_v9 = vpop.eup %4420  ;;  %v397_v22 = vpop.permute.xlu1 %396  ;;  %v6203_v60 = vmul.f32 0.5, %v1558_v49  ;;  %v6209_v8 = vmul.f32 %v948_v4, %v6061_v58  ;;  %4436 = vtanh.f32 %v6160_v48  ;;  %v1058_v23 = vpack.c.bf16 %v6101_v11, %v1005_v17 }
 0x157   : > { %1934 = vmatpush1.bf16.msra.mxu0 %v7301_v30  ;;  %v4423_v42 = vpop.eup %4422  ;;  %v402_v40 = vpop.permute.xlu0 %401  ;;  %v724_v7 = vadd.f32 %v5969_v55, %v397_v22  ;;  %v6215_v43 = vmul.f32 %v1784_v39, %v6065_v35  ;;  %v1560_v62 = vadd.f32 %v5971_v33, %v7302_v21  ;;  %v726_v28 = vadd.f32 %v5981_v14, %v397_v22 }
 0x158   : > { %4438 = vtanh.f32 %v6203_v60  ;;  %v6221_v38 = vpop.f32.mrb[52].mxu0  ;;  %v6223_v58 = vpop.f32.mrb[52].mxu1  ;;  %v1785_v49 = vadd.f32 1.0, %v4421_v9  ;;  %1981 = vmatprep.subr.bf16.mxu1 %v1058_v23  ;;  %v1562_v55 = vadd.f32 %v5983_v54, %v7302_v21  ;;  %v730_v35 = vadd.f32 %v6010_v53, %v402_v40  ;;  %v7304_v9 = vld [vmem:[#allocation9_spill] sm:$0xff] }
 0x159   : > { %v6225_v27 = vmul.f32 0.5, %v724_v7  ;;  %v6230_v11 = vpop.f32.mrb[53].mxu0  ;;  %v6232_v17 = vpop.f32.mrb[53].mxu1  ;;  %v6234_v4 = vmul.f32 0.5, %v1560_v62  ;;  %v7303_v14 = vpack.c.bf16 %v6070_v18, %v6033_v3  ;;  %v6239_v39 = vmul.f32 0.5, %v726_v28 }
 0x15a   : > { %v4425_v33 = vpop.eup %4424  ;;  %v1566_v22 = vadd.f32 %v6012_v51, %v7304_v9  ;;  %v732_v54 = vadd.f32 %v6023_v52, %v402_v40  ;;  %v6245_v23 = vmul.f32 0.5, %v1562_v55  ;;  %v6247_v7 = vmul.f32 0.5, %v730_v35  ;;  %v6249_v21 = vpop.f32.mrb[54].mxu0 }
 0x15b   : > { %1982 = vmatpush1.bf16.msra.mxu1 %v7303_v14  ;;  %v4427_v30 = vpop.eup %4426  ;;  %v950_v53 = vadd.f32 1.0, %v4425_v33  ;;  %4440 = vtanh.f32 %v6225_v27  ;;  %v6251_v62 = vpop.f32.mrb[54].mxu1  ;;  %v1568_v14 = vadd.f32 %v6025_v57, %v7304_v9  ;;  %v6278_v57 = vadd.f32 1.0, %v4423_v42 }
 0x15c   : > { %7305 = vst [vmem:[#allocation21_spill] sm:$0xff] %v6251_v62  ;;  %v4429_v18 = vpop.eup %4428  ;;  %v1786_v3 = vadd.f32 1.0, %v4427_v30  ;;  %4442 = vtanh.f32 %v6234_v4  ;;  %v6254_v28 = vmul.f32 0.5, %v1566_v22  ;;  %v6256_v51 = vmul.f32 0.5, %v732_v54  ;;  %v6258_v52 = vpop.f32.mrb[55].mxu0 }
 0x15d   : > { %7306 = vst [vmem:[#allocation7_spill] sm:$0xff] %v6258_v52  ;;  %v6260_v40 = vpop.f32.mrb[55].mxu1  ;;  %v4431_v55 = vpop.eup %4430  ;;  %v6263_v35 = vmul.f32 %v950_v53, %v6130_v45  ;;  %v951_v33 = vadd.f32 1.0, %v4429_v18  ;;  %4444 = vtanh.f32 %v6239_v39  ;;  %v1897_v52 = vpack.c.bf16 %v1847_v50, %v6197_v47 }
 0x15e   : > { %7307 = vst [vmem:[#allocation8_spill] sm:$0xff] %v6260_v40  ;;  %v4433_v30 = vpop.eup %4432  ;;  %v6269_v22 = vmul.f32 %v1786_v3, %v6140_v59  ;;  %v1787_v54 = vadd.f32 1.0, %v4431_v55  ;;  %4446 = vtanh.f32 %v6245_v23  ;;  %v407_v62 = vpop.permute.xlu1 %406  ;;  %v1009_v45 = vmul.f32 %v6191_v16, %v6004_v44 }
 0x15f   : > { %v4435_v40 = vpop.eup %4434  ;;  %v952_v18 = vadd.f32 1.0, %v4433_v30  ;;  %4448 = vtanh.f32 %v6247_v7  ;;  %1935 = vmatprep.subr.bf16.mxu0 %v1897_v52  ;;  %v6283_v50 = vpop.f32.mrb[56].mxu0  ;;  %v6288_v16 = vmul.f32 %v1785_v49, %v6077_v34  ;;  %v6291_v3 = vmul.f32 %v951_v33, %v6145_v20 }
 0x160   : > { %v1788_v9 = vadd.f32 1.0, %v4435_v40  ;;  %4450 = vtanh.f32 %v6254_v28  ;;  %v6285_v47 = vpop.f32.mrb[56].mxu1  ;;  %v4437_v44 = vpop.eup %4436  ;;  %v6294_v42 = vmul.f32 %v1787_v54, %v6149_v36  ;;  %v6296_v55 = vmul.f32 0.5, %v1568_v14  ;;  %v7309_v36 = vld [vmem:[#allocation10_spill] sm:$0xff] }
 0x161   : > { %v7308_v40 = vpack.c.bf16 %v6173_v1, %v6124_v12  ;;  %v6301_v52 = vpop.f32.mrb[57].mxu0  ;;  %v6303_v30 = vpop.f32.mrb[57].mxu1  ;;  %4452 = vtanh.f32 %v6256_v51  ;;  %v1060_v34 = vpack.c.bf16 %v6200_v46, %v1009_v45  ;;  %v734_v20 = vadd.f32 %v6044_v0, %v407_v62 }
 0x162   : > { %v4439_v53 = vpop.eup %4438  ;;  %v412_v59 = vpop.permute.xlu0 %411  ;;  %v1570_v49 = vadd.f32 %v6046_v2, %v7309_v36  ;;  %v6311_v33 = vmul.f32 %v952_v18, %v6151_v29  ;;  %v6314_v12 = vmul.f32 %v1788_v9, %v6158_v6  ;;  %4454 = vtanh.f32 %v6296_v55 }
 0x163   : > { %1936 = vmatpush1.bf16.msra.mxu0 %v7308_v40  ;;  %v736_v1 = vadd.f32 %v6056_v25, %v407_v62  ;;  %v6318_v14 = vpop.f32.mrb[58].mxu0  ;;  %v6320_v54 = vpop.f32.mrb[58].mxu1  ;;  %1983 = vmatprep.subr.bf16.mxu1 %v1060_v34  ;;  %v6322_v46 = vmul.f32 0.5, %v734_v20  ;;  %v1572_v2 = vadd.f32 %v6058_v37, %v7309_v36  ;;  %v740_v29 = vadd.f32 %v6079_v32, %v412_v59  ;;  %v7313_v40 = vld [vmem:[#allocation11_spill] sm:$0xff]  ;;  %v7314_v20 = vld [vmem:[#allocation4_spill] sm:$0xff] }
 0x164   : > { %v6324_v0 = vmul.f32 0.5, %v1570_v49  ;;  %v6329_v6 = vpop.f32.mrb[59].mxu0  ;;  %v6331_v45 = vpop.f32.mrb[59].mxu1  ;;  %v1789_v25 = vadd.f32 1.0, %v4439_v53  ;;  %v7312_v62 = vpack.c.bf16 %v6167_v41, %v6113_v56  ;;  %v1576_v34 = vadd.f32 %v6081_v24, %v7313_v40 }
 0x165   : > { %7310 = vst [vmem:[#allocation9_spill] sm:$0xff] %v6329_v6  ;;  %7311 = vst [vmem:[#allocation10_spill] sm:$0xff] %v6331_v45  ;;  %v4441_v18 = vpop.eup %4440  ;;  %v6336_v9 = vmul.f32 0.5, %v736_v1  ;;  %v742_v49 = vadd.f32 %v7314_v20, %v412_v59  ;;  %4456 = vtanh.f32 %v6322_v46  ;;  %v6342_v32 = vmul.f32 0.5, %v1572_v2  ;;  %v7315_v2 = vld [vmem:[#allocation5_spill] sm:$0xff] }
 0x166   : > { %1984 = vmatpush1.bf16.msra.mxu1 %v7312_v62  ;;  %v4443_v37 = vpop.eup %4442  ;;  %v954_v36 = vadd.f32 1.0, %v4441_v18  ;;  %v6344_v45 = vmul.f32 0.5, %v740_v29  ;;  %4458 = vtanh.f32 %v6324_v0  ;;  %v6347_v56 = vmul.f32 0.5, %v1576_v34 }
 0x167   : > { %v4445_v53 = vpop.eup %4444  ;;  %v1790_v6 = vadd.f32 1.0, %v4443_v37  ;;  %v6349_v41 = vmul.f32 0.5, %v742_v49  ;;  %4460 = vtanh.f32 %v6336_v9  ;;  %v1578_v18 = vadd.f32 %v7315_v2, %v7313_v40  ;;  %v6357_v29 = vpop.f32.mrb[60].mxu0 }
 0x168   : > { %v4447_v1 = vpop.eup %4446  ;;  %v6352_v24 = vmul.f32 %v954_v36, %v6225_v27  ;;  %v955_v59 = vadd.f32 1.0, %v4445_v53  ;;  %v6359_v62 = vpop.f32.mrb[60].mxu1  ;;  %4462 = vtanh.f32 %v6342_v32  ;;  %v1899_v27 = vpack.c.bf16 %v6294_v42, %v6288_v16 }
 0x169   : > { %7316 = vst [vmem:[#allocation11_spill] sm:$0xff] %v6359_v62  ;;  %v4449_v20 = vpop.eup %4448  ;;  %v6362_v34 = vmul.f32 %v1790_v6, %v6234_v4  ;;  %v1791_v49 = vadd.f32 1.0, %v4447_v1  ;;  %v6367_v37 = vpop.f32.mrb[61].mxu0  ;;  %v1013_v2 = vmul.f32 %v6278_v57, %v6086_v61  ;;  %4464 = vtanh.f32 %v6344_v45 }
 0x16a   : > { %7317 = vst [vmem:[#allocation4_spill] sm:$0xff] %v6367_v37  ;;  %v6369_v36 = vpop.f32.mrb[61].mxu1  ;;  %v4451_v53 = vpop.eup %4450  ;;  %v956_v4 = vadd.f32 1.0, %v4449_v20  ;;  %v953_v6 = vadd.f32 1.0, %v4437_v44  ;;  %4466 = vtanh.f32 %v6347_v56  ;;  %1937 = vmatprep.subr.bf16.mxu0 %v1899_v27  ;;  %v1853_v61 = vmul.f32 %v1789_v25, %v6203_v60  ;;  %v7324_v25 = vld [vmem:[#allocation12_spill] sm:$0xff] }
 0x16b   : > { %7318 = vst [vmem:[#allocation5_spill] sm:$0xff] %v6369_v36  ;;  %v417_v40 = vpop.permute.xlu1 %416  ;;  %v1792_v16 = vadd.f32 1.0, %v4451_v53  ;;  %v6379_v42 = vpop.f32.mrb[62].mxu0  ;;  %v6385_v57 = vmul.f32 %v955_v59, %v6239_v39  ;;  %4468 = vtanh.f32 %v6349_v41  ;;  %v6388_v44 = vmul.f32 0.5, %v1578_v18  ;;  %v7325_v59 = vld [vmem:[#allocation22_spill] sm:$0xff] }
 0x16c   : > { %7319 = vst [vmem:[#allocation25_spill] sm:$0xff] %v6379_v42  ;;  %v6381_v36 = vpop.f32.mrb[62].mxu1  ;;  %v4453_v37 = vpop.eup %4452  ;;  %v7321_v20 = vpack.c.bf16 %v6269_v22, %v6215_v43  ;;  %v1855_v1 = vmul.f32 %v1791_v49, %v6245_v23  ;;  %v1062_v60 = vpack.c.bf16 %v6291_v3, %v1013_v2  ;;  %v744_v39 = vadd.f32 %v6108_v26, %v417_v40  ;;  %v7327_v26 = vld [vmem:[#allocation24_spill] sm:$0xff] }
 0x16d   : > { %7320 = vst [vmem:[#allocation26_spill] sm:$0xff] %v6381_v36  ;;  %v6393_v53 = vpop.f32.mrb[63].mxu0  ;;  %v6395_v27 = vpop.f32.mrb[63].mxu1  ;;  %v1580_v36 = vadd.f32 %v7325_v59, %v7324_v25  ;;  %v6403_v42 = vmul.f32 %v956_v4, %v6247_v7  ;;  %v6406_v43 = vmul.f32 %v1792_v16, %v6254_v28  ;;  %v1582_v3 = vadd.f32 %v7327_v26, %v7324_v25 }
 0x16e   : > { %1938 = vmatpush1.bf16.msra.mxu0 %v7321_v20  ;;  %7322 = vst [vmem:[#allocation27_spill] sm:$0xff] %v6393_v53  ;;  %7323 = vst [vmem:[#allocation28_spill] sm:$0xff] %v6395_v27  ;;  %v4455_v62 = vpop.eup %4454  ;;  %v422_v18 = vpop.permute.xlu0 %421  ;;  %v7326_v20 = vld [vmem:[#allocation23_spill] sm:$0xff]  ;;  %1985 = vmatprep.subr.bf16.mxu1 %v1062_v60  ;;  %v6409_v53 = vmul.f32 0.5, %v744_v39  ;;  %4470 = vtanh.f32 %v6388_v44  ;;  %v7328_v7 = vpack.c.bf16 %v6263_v35, %v6209_v8 }
 0x16f   : > { %v1793_v22 = vadd.f32 1.0, %v4455_v62  ;;  %v746_v27 = vadd.f32 %v7326_v20, %v417_v40  ;;  %v6411_v23 = vmul.f32 0.5, %v1580_v36  ;;  %v750_v49 = vadd.f32 %v6153_v15, %v422_v18  ;;  %v4457_v2 = vpop.eup %4456  ;;  %v7329_v62 = vld [vmem:[#allocation13_spill] sm:$0xff] }
 0x170   : > { %1986 = vmatpush1.bf16.msra.mxu1 %v7328_v7  ;;  %v1586_v40 = vadd.f32 %v6155_v19, %v7329_v62  ;;  %v752_v36 = vadd.f32 %v6162_v10, %v422_v18  ;;  %v4459_v4 = vpop.eup %4458  ;;  %v958_v16 = vadd.f32 1.0, %v4457_v2  ;;  %4472 = vtanh.f32 %v6409_v53 }
 0x171   : > { %v6420_v28 = vmul.f32 0.5, %v746_v27  ;;  %v6426_v60 = vmul.f32 0.5, %v1582_v3  ;;  %v6428_v15 = vmul.f32 0.5, %v750_v49  ;;  %v4461_v39 = vpop.eup %4460  ;;  %v1794_v25 = vadd.f32 1.0, %v4459_v4  ;;  %v7331_v4 = vld [vmem:[#allocation14_spill] sm:$0xff] }
 0x172   : > { %4474 = vtanh.f32 %v6411_v23  ;;  %v6431_v8 = vmul.f32 0.5, %v1586_v40  ;;  %v6433_v35 = vmul.f32 0.5, %v752_v36  ;;  %v4463_v27 = vpop.eup %4462  ;;  %v6436_v19 = vmul.f32 %v958_v16, %v6322_v46 }
 0x173   : > { %v959_v10 = vadd.f32 1.0, %v4461_v39  ;;  %4476 = vtanh.f32 %v6420_v28  ;;  %v1588_v59 = vadd.f32 %v6164_v13, %v7329_v62  ;;  %v4465_v18 = vpop.eup %4464  ;;  %v6442_v20 = vmul.f32 %v1794_v25, %v6324_v0 }
 0x174   : > { %v1795_v26 = vadd.f32 1.0, %v4463_v27  ;;  %4478 = vtanh.f32 %v6426_v60  ;;  %v1901_v3 = vpack.c.bf16 %v1855_v1, %v1853_v61  ;;  %v4467_v49 = vpop.eup %4466  ;;  %v1017_v2 = vmul.f32 %v953_v6, %v6160_v48  ;;  %v427_v1 = vpop.permute.xlu1 %426 }
 0x175   : > { %v1065_v46 = vpack.c.bf16 %v6436_v19, %v6403_v42  ;;  %v960_v7 = vadd.f32 1.0, %v4465_v18  ;;  %4480 = vtanh.f32 %v6428_v15  ;;  %v4469_v40 = vpop.eup %4468  ;;  %v957_v36 = vadd.f32 1.0, %v4453_v37  ;;  %v7334_v18 = vld [vmem:[#allocation15_spill] sm:$0xff] }
 0x176   : > { %v1857_v13 = vmul.f32 %v1793_v22, %v6296_v55  ;;  %v1902_v0 = vpack.c.bf16 %v6442_v20, %v6406_v43  ;;  %4482 = vtanh.f32 %v6431_v8  ;;  %1939 = vmatprep.subr.bf16.mxu0 %v1901_v3  ;;  %v6454_v61 = vmul.f32 %v959_v10, %v6336_v9  ;;  %v432_v9 = vpop.permute.xlu0 %431  ;;  %v7337_v43 = vld [vmem:[#allocation7_spill] sm:$0xff] }
 0x177   : > { %v1859_v48 = vmul.f32 %v1795_v26, %v6342_v32  ;;  %v1796_v6 = vadd.f32 1.0, %v4467_v49  ;;  %v6457_v62 = vmul.f32 0.5, %v1588_v59  ;;  %v7330_v37 = vpack.c.bf16 %v6362_v34, %v6314_v12 }
 0x178   : > { %4484 = vtanh.f32 %v6433_v35  ;;  %v1064_v55 = vpack.c.bf16 %v6385_v57, %v1017_v2  ;;  %v754_v22 = vadd.f32 %v6178_v5, %v427_v1  ;;  %v1590_v16 = vadd.f32 %v6180_v63, %v7331_v4  ;;  %v4471_v12 = vpop.eup %4470  ;;  %v7332_v5 = vld [vmem:[#allocation6_spill] sm:$0xff] }
 0x179   : > { %1940 = vmatpush1.bf16.msra.mxu0 %v7330_v37  ;;  %v6468_v39 = vmul.f32 %v960_v7, %v6344_v45  ;;  %v961_v32 = vadd.f32 1.0, %v4469_v40  ;;  %4486 = vtanh.f32 %v6457_v62  ;;  %v756_v25 = vadd.f32 %v6187_v31, %v427_v1 }
 0x17a   : > { %1987 = vmatprep.subr.bf16.mxu1 %v1064_v55  ;;  %v6472_v34 = vmul.f32 0.5, %v754_v22  ;;  %v6474_v27 = vmul.f32 0.5, %v1590_v16  ;;  %v1592_v57 = vadd.f32 %v7332_v5, %v7331_v4  ;;  %v760_v63 = vadd.f32 %v6221_v38, %v432_v9  ;;  %v4473_v10 = vpop.eup %4472 }
 0x17b   : > { %v6480_v45 = vmul.f32 %v1796_v6, %v6347_v56  ;;  %v7333_v59 = vpack.c.bf16 %v6352_v24, %v6311_v33  ;;  %v6485_v31 = vmul.f32 0.5, %v756_v25  ;;  %v1596_v26 = vadd.f32 %v6223_v58, %v7334_v18 }
 0x17c   : > { %v762_v3 = vadd.f32 %v6230_v11, %v432_v9  ;;  %v4475_v49 = vpop.eup %4474  ;;  %v962_v2 = vadd.f32 1.0, %v4473_v10  ;;  %4488 = vtanh.f32 %v6472_v34  ;;  %v6491_v38 = vmul.f32 0.5, %v1592_v57  ;;  %v7335_v10 = vld [vmem:[#allocation16_spill] sm:$0xff] }
 0x17d   : > { %1988 = vmatpush1.bf16.msra.mxu1 %v7333_v59  ;;  %v6493_v7 = vmul.f32 0.5, %v760_v63  ;;  %v4477_v56 = vpop.eup %4476  ;;  %v1797_v40 = vadd.f32 1.0, %v4471_v12  ;;  %v1798_v1 = vadd.f32 1.0, %v4475_v49  ;;  %4490 = vtanh.f32 %v6474_v27  ;;  %v7336_v59 = vld [vmem:[#allocation21_spill] sm:$0xff] }
 0x17e   : > { %v6496_v33 = vmul.f32 0.5, %v1596_v26  ;;  %v4479_v24 = vpop.eup %4478  ;;  %v6499_v58 = vmul.f32 %v962_v2, %v6409_v53  ;;  %4492 = vtanh.f32 %v6485_v31  ;;  %v6502_v11 = vmul.f32 0.5, %v762_v3 }
 0x17f   : > { %v1598_v6 = vadd.f32 %v6232_v17, %v7334_v18  ;;  %v4481_v37 = vpop.eup %4480  ;;  %v6507_v55 = vmul.f32 %v1798_v1, %v6411_v23  ;;  %v963_v22 = vadd.f32 1.0, %v4477_v56  ;;  %4494 = vtanh.f32 %v6491_v38  ;;  %v442_v18 = vpop.permute.xlu0 %441 }
 0x180   : > { %v1903_v4 = vpack.c.bf16 %v1859_v48, %v1857_v13  ;;  %v4483_v16 = vpop.eup %4482  ;;  %v1067_v53 = vpack.c.bf16 %v6499_v58, %v6468_v39  ;;  %v1799_v9 = vadd.f32 1.0, %v4479_v24  ;;  %v964_v25 = vadd.f32 1.0, %v4481_v37  ;;  %v437_v48 = vpop.permute.xlu1 %436 }
 0x181   : > { %4496 = vtanh.f32 %v6493_v7  ;;  %v1021_v12 = vmul.f32 %v957_v36, %v6256_v51  ;;  %v6515_v17 = vmul.f32 %v961_v32, %v6349_v41  ;;  %v1904_v23 = vpack.c.bf16 %v6507_v55, %v6480_v45  ;;  %v7341_v45 = vld [vmem:[#allocation9_spill] sm:$0xff] }
 0x182   : > { %4498 = vtanh.f32 %v6496_v33  ;;  %1941 = vmatprep.subr.bf16.mxu0 %v1903_v4  ;;  %v4485_v13 = vpop.eup %4484  ;;  %v1861_v5 = vmul.f32 %v1797_v40, %v6388_v44  ;;  %v1800_v57 = vadd.f32 1.0, %v4483_v16  ;;  %v6522_v63 = vmul.f32 0.5, %v1598_v6  ;;  %v7339_v40 = vld [vmem:[#allocation17_spill] sm:$0xff] }
 0x183   : > { %4500 = vtanh.f32 %v6502_v11  ;;  %1942 = vmatpush1.bf16.msra.mxu0 %v1902_v0  ;;  %v4487_v51 = vpop.eup %4486  ;;  %v6528_v41 = vmul.f32 %v963_v22, %v6420_v28  ;;  %v1066_v36 = vpack.c.bf16 %v6454_v61, %v1021_v12  ;;  %v764_v32 = vadd.f32 %v6249_v21, %v437_v48  ;;  %v7338_v21 = vld [vmem:[#allocation8_spill] sm:$0xff] }
 0x184   : > { %v1600_v44 = vadd.f32 %v7336_v59, %v7335_v10  ;;  %v1863_v26 = vmul.f32 %v1799_v9, %v6426_v60  ;;  %v6536_v3 = vmul.f32 %v964_v25, %v6428_v15  ;;  %4502 = vtanh.f32 %v6522_v63  ;;  %v447_v59 = vpop.permute.xlu1 %446 }
 0x185   : > { %v766_v20 = vadd.f32 %v7337_v43, %v437_v48  ;;  %1989 = vmatprep.subr.bf16.mxu1 %v1066_v36  ;;  %v6540_v28 = vmul.f32 0.5, %v764_v32  ;;  %v1602_v61 = vadd.f32 %v7338_v21, %v7335_v10  ;;  %v770_v49 = vadd.f32 %v6283_v50, %v442_v18  ;;  %v7340_v43 = vld [vmem:[#allocation18_spill] sm:$0xff] }
 0x186   : > { %v6542_v0 = vmul.f32 0.5, %v1600_v44  ;;  %v4489_v2 = vpop.eup %4488  ;;  %v6548_v60 = vmul.f32 %v1800_v57, %v6431_v8  ;;  %v1801_v15 = vadd.f32 1.0, %v4487_v51  ;;  %1990 = vmatpush1.bf16.msra.mxu1 %v1065_v46  ;;  %v1606_v1 = vadd.f32 %v6285_v47, %v7339_v40 }
 0x187   : > { %v6553_v56 = vmul.f32 0.5, %v766_v20  ;;  %v4491_v24 = vpop.eup %4490  ;;  %v966_v6 = vadd.f32 1.0, %v4489_v2  ;;  %4504 = vtanh.f32 %v6540_v28  ;;  %v6558_v37 = vmul.f32 0.5, %v1602_v61  ;;  %v452_v20 = vpop.permute.xlu0 %451  ;;  %v7343_v2 = vld [vmem:[#allocation19_spill] sm:$0xff] }
 0x188   : > { %v772_v50 = vadd.f32 %v6301_v52, %v442_v18  ;;  %v4493_v8 = vpop.eup %4492  ;;  %v1802_v22 = vadd.f32 1.0, %v4491_v24  ;;  %4506 = vtanh.f32 %v6542_v0  ;;  %v6562_v4 = vmul.f32 0.5, %v770_v49 }
 0x189   : > { %v6564_v42 = vmul.f32 0.5, %v1606_v1  ;;  %v4495_v19 = vpop.eup %4494  ;;  %v6567_v46 = vmul.f32 %v966_v6, %v6472_v34  ;;  %v967_v47 = vadd.f32 1.0, %v4493_v8  ;;  %4508 = vtanh.f32 %v6553_v56 }
 0x18a   : > { %v1608_v16 = vadd.f32 %v6303_v30, %v7339_v40  ;;  %v6573_v52 = vmul.f32 %v1802_v22, %v6474_v27  ;;  %v1803_v25 = vadd.f32 1.0, %v4495_v19  ;;  %4510 = vtanh.f32 %v6558_v37 }
 0x18b   : > { %v4497_v9 = vpop.eup %4496  ;;  %v1905_v12 = vpack.c.bf16 %v1863_v26, %v1861_v5  ;;  %v965_v57 = vadd.f32 1.0, %v4485_v13  ;;  %v1069_v34 = vpack.c.bf16 %v6567_v46, %v6536_v3  ;;  %v6578_v36 = vmul.f32 0.5, %v772_v50 }
 0x18c   : > { %v4499_v48 = vpop.eup %4498  ;;  %v968_v51 = vadd.f32 1.0, %v4497_v9  ;;  %v1865_v10 = vmul.f32 %v1801_v15, %v6457_v62  ;;  %v1906_v30 = vpack.c.bf16 %v6573_v52, %v6548_v60  ;;  %4512 = vtanh.f32 %v6562_v4  ;;  %v7344_v15 = vld [vmem:[#allocation11_spill] sm:$0xff] }
 0x18d   : > { %v4501_v32 = vpop.eup %4500  ;;  %v1804_v27 = vadd.f32 1.0, %v4499_v48  ;;  %1943 = vmatprep.subr.bf16.mxu0 %v1905_v12  ;;  %v6585_v5 = vmul.f32 %v967_v47, %v6485_v31  ;;  %v1867_v13 = vmul.f32 %v1803_v25, %v6491_v38  ;;  %4514 = vtanh.f32 %v6564_v42  ;;  %v6665_v60 = vld [vmem:[%s7232_s3 + $0x8] sm:$0xff] }
 0x18e   : > { %v6589_v44 = vmul.f32 0.5, %v1608_v16  ;;  %1944 = vmatpush1.bf16.msra.mxu0 %v1904_v23  ;;  %v4503_v62 = vpop.eup %4502  ;;  %v6595_v18 = vmul.f32 %v968_v51, %v6493_v7  ;;  %v1068_v26 = vpack.c.bf16 %v6528_v41, %v6515_v17  ;;  %v774_v31 = vadd.f32 %v6318_v14, %v447_v59  ;;  %v7342_v17 = vld [vmem:[#allocation10_spill] sm:$0xff]  ;;  %v7346_v16 = vld [vmem:[#allocation5_spill] sm:$0xff] }
 0x18f   : > { %v1610_v38 = vadd.f32 %v6320_v54, %v7340_v43  ;;  %v6603_v21 = vmul.f32 %v1804_v27, %v6496_v33  ;;  %v969_v61 = vadd.f32 1.0, %v4501_v32  ;;  %4516 = vtanh.f32 %v6578_v36 }
 0x190   : > { %v776_v55 = vadd.f32 %v7341_v45, %v447_v59  ;;  %1991 = vmatprep.subr.bf16.mxu1 %v1068_v26  ;;  %v6607_v7 = vmul.f32 0.5, %v774_v31  ;;  %v1612_v14 = vadd.f32 %v7342_v17, %v7340_v43  ;;  %v780_v41 = vadd.f32 %v6357_v29, %v452_v20  ;;  %v7345_v29 = vld [vmem:[#allocation4_spill] sm:$0xff] }
 0x191   : > { %v6609_v23 = vmul.f32 0.5, %v1610_v38  ;;  %v4505_v54 = vpop.eup %4504  ;;  %v1805_v49 = vadd.f32 1.0, %v4503_v62  ;;  %4518 = vtanh.f32 %v6589_v44  ;;  %1992 = vmatpush1.bf16.msra.mxu1 %v1067_v53  ;;  %v1616_v40 = vadd.f32 %v7344_v15, %v7343_v2  ;;  %v7349_v38 = vld [vmem:[#allocation26_spill] sm:$0xff]  ;;  %v7351_v45 = vld [vmem:[#allocation28_spill] sm:$0xff] }
 0x192   : > { %v6618_v33 = vmul.f32 0.5, %v776_v55  ;;  %v4507_v1 = vpop.eup %4506  ;;  %v970_v24 = vadd.f32 1.0, %v4505_v54  ;;  %4520 = vtanh.f32 %v6607_v7  ;;  %v6623_v6 = vmul.f32 0.5, %v1612_v14  ;;  %v6676_v14 = vld [vmem:[%s7232_s3] sm:$0xff] }
 0x193   : > { %v782_v50 = vadd.f32 %v7345_v29, %v452_v20  ;;  %v4509_v8 = vpop.eup %4508  ;;  %v1806_v22 = vadd.f32 1.0, %v4507_v1  ;;  %4522 = vtanh.f32 %v6609_v23  ;;  %v6627_v19 = vmul.f32 0.5, %v780_v41 }
 0x194   : > { %v6629_v39 = vmul.f32 0.5, %v1616_v40  ;;  %v4511_v58 = vpop.eup %4510  ;;  %v6632_v53 = vmul.f32 %v970_v24, %v6540_v28  ;;  %v971_v47 = vadd.f32 1.0, %v4509_v8  ;;  %4524 = vtanh.f32 %v6618_v33 }
 0x195   : > { %v1618_v9 = vadd.f32 %v7346_v16, %v7343_v2  ;;  %v1870_v25 = vmul.f32 %v1806_v22, %v6542_v0  ;;  %v1807_v12 = vadd.f32 1.0, %v4511_v58  ;;  %4526 = vtanh.f32 %v6623_v6  ;;  %v457_v0 = vpop.permute.xlu1 %456 }
 0x196   : > { %v1907_v48 = vpack.c.bf16 %v1867_v13, %v1865_v10  ;;  %v4513_v51 = vpop.eup %4512  ;;  %v1071_v32 = vpack.c.bf16 %v6632_v53, %v6595_v18  ;;  %v6641_v27 = vmul.f32 0.5, %v782_v50  ;;  %v1029_v59 = vmul.f32 %v965_v57, %v6433_v35  ;;  %v7348_v18 = vld [vmem:[#allocation20_spill] sm:$0xff] }
 0x197   : > { %v4515_v28 = vpop.eup %4514  ;;  %v1033_v62 = vmul.f32 %v969_v61, %v6502_v11  ;;  %v1908_v26 = vpack.c.bf16 %v1870_v25, %v6603_v21  ;;  %v1871_v31 = vmul.f32 %v1807_v12, %v6558_v37  ;;  %v1869_v43 = vmul.f32 %v1805_v49, %v6522_v63  ;;  %v7347_v37 = vld [vmem:[#allocation25_spill] sm:$0xff]  ;;  %v7350_v21 = vld [vmem:[#allocation27_spill] sm:$0xff] }
 0x198   : > { %1945 = vmatprep.subr.bf16.mxu0 %v1907_v48  ;;  %v1035_v10 = vmul.f32 %v971_v47, %v6553_v56  ;;  %4528 = vtanh.f32 %v6627_v19  ;;  %v6650_v13 = vmul.f32 0.5, %v1618_v9  ;;  %v1070_v11 = vpack.c.bf16 %v6585_v5, %v1029_v59 }
 0x199   : > { %1946 = vmatpush1.bf16.msra.mxu0 %v1906_v30  ;;  %v4517_v35 = vpop.eup %4516  ;;  %4530 = vtanh.f32 %v6629_v39  ;;  %v784_v57 = vadd.f32 %v7347_v37, %v457_v0  ;;  %v1620_v63 = vadd.f32 %v7349_v38, %v7348_v18  ;;  %v972_v20 = vadd.f32 1.0, %v4513_v51 }
 0x19a   : > { %v1808_v56 = vadd.f32 1.0, %v4515_v28  ;;  %4532 = vtanh.f32 %v6641_v27  ;;  %v786_v61 = vadd.f32 %v7350_v21, %v457_v0  ;;  %1993 = vmatprep.subr.bf16.mxu1 %v1070_v11  ;;  %v1622_v55 = vadd.f32 %v7351_v45, %v7348_v18 }
 0x19b   : > { %v4519_v52 = vpop.eup %4518  ;;  %v6667_v30 = vmul.f32 0.5, %v784_v57  ;;  %v6669_v5 = vmul.f32 0.5, %v1620_v63  ;;  %v1909_v17 = vpack.c.bf16 %v1871_v31, %v1869_v43  ;;  %v973_v54 = vadd.f32 1.0, %v4517_v35  ;;  %1994 = vmatpush1.bf16.msra.mxu1 %v1069_v34 }
 0x19c   : > { %v4521_v41 = vpop.eup %4520  ;;  %4534 = vtanh.f32 %v6650_v13  ;;  %v851_v49 = vmul.f32 0.5, %v786_v61  ;;  %v1072_v2 = vpack.c.bf16 %v1035_v10, %v1033_v62  ;;  %v1687_v1 = vmul.f32 0.5, %v1622_v55 }
 0x19d   : > { %v4523_v15 = vpop.eup %4522  ;;  %v974_v40 = vadd.f32 1.0, %v4521_v41  ;;  %4536 = vtanh.f32 %v6667_v30  ;;  %1947 = vmatprep.subr.bf16.mxu0 %v1909_v17  ;;  %v3999_v24 = vcombine.high %v6665_v60, %v6665_v60  ;;  %v1809_v50 = vadd.f32 1.0, %v4519_v52  ;;  %v4254_v17 = vld [vmem:[%s7230_s1 + $0x110] sm:$0xff]   ;;  %v4256_v41 = vld [vmem:[%s7230_s1 + $0x120] sm:$0xff]  }
 0x19e   : > { %v4525_v29 = vpop.eup %4524  ;;  %v1810_v8 = vadd.f32 1.0, %v4523_v15  ;;  %4538 = vtanh.f32 %v6669_v5  ;;  %1995 = vmatprep.subr.bf16.mxu1 %v1072_v2  ;;  %1948 = vmatpush1.bf16.msra.mxu0 %v1908_v26  ;;  %v4001_v3 = vcombine.high %v6676_v14, %v6676_v14  ;;  %v1036_v34 = vmul.f32 %v972_v20, %v6562_v4  ;;  %v4259_v2 = vld [vmem:[%s7230_s1 + $0x138] sm:$0xff]   ;;  %v4260_v15 = vld [vmem:[%s7230_s1 + $0x140] sm:$0xff]  }
 0x19f   : > { %v4527_v46 = vpop.eup %4526  ;;  %v1038_v22 = vmul.f32 %v974_v40, %v6607_v7  ;;  %v975_v58 = vadd.f32 1.0, %v4525_v29  ;;  %4540 = vtanh.f32 %v851_v49  ;;  %1953 = vmatprep.mubr.bf16.mxu0 %v3999_v24  ;;  %v1872_v53 = vmul.f32 %v1808_v56, %v6564_v42  ;;  %1996 = vmatpush1.bf16.msra.mxu1 %v1071_v32  ;;  %v4261_v40 = vld [vmem:[%s7230_s1 + $0x148] sm:$0xff]   ;;  %v4263_v24 = vld [vmem:[%s7230_s1 + $0x158] sm:$0xff]   ;;  %v4264_v29 = vld [vmem:[%s7230_s1 + $0x160] sm:$0xff]  }
 0x1a0   : > { %v1874_v47 = vmul.f32 %v1810_v8, %v6609_v23  ;;  %v1811_v16 = vadd.f32 1.0, %v4527_v46  ;;  %4542 = vtanh.f32 %v1687_v1  ;;  %2001 = vmatprep.mubr.bf16.mxu1 %v4001_v3  ;;  %v1037_v9 = vmul.f32 %v973_v54, %v6578_v36  ;;  %v4257_v54 = vld [vmem:[%s7230_s1 + $0x128] sm:$0xff]   ;;  %v4266_v8 = vld [vmem:[%s7230_s1 + $0x170] sm:$0xff]   ;;  %v4267_v3 = vld [vmem:[%s7230_s1 + $0x178] sm:$0xff]  }
 0x1a1   : > { %v1073_v25 = vpack.c.bf16 %v1038_v22, %v1036_v34  ;;  %v1039_v12 = vmul.f32 %v975_v58, %v6618_v33  ;;  %v1873_v4 = vmul.f32 %v1809_v50, %v6589_v44  ;;  %v4265_v50 = vld [vmem:[%s7230_s1 + $0x168] sm:$0xff]  }
 0x1a2   : > { %v4529_v48 = vpop.eup %4528  ;;  %v1910_v7 = vpack.c.bf16 %v1874_v47, %v1872_v53  ;;  %v1875_v51 = vmul.f32 %v1811_v16, %v6623_v6 }
 0x1a3   : > { %v4531_v28 = vpop.eup %4530  ;;  %v1074_v59 = vpack.c.bf16 %v1039_v12, %v1037_v9  ;;  %v976_v26 = vadd.f32 1.0, %v4529_v48  ;;  %v2079_v48 = vpop.permute.xlu0 %2078 }
 0x1a4   : > { %v4533_v42 = vpop.eup %4532  ;;  %v1911_v62 = vpack.c.bf16 %v1875_v51, %v1873_v4  ;;  %v1812_v36 = vadd.f32 1.0, %v4531_v28  ;;  %v2084_v28 = vpop.permute.xlu1 %2083 }
 0x1a5   : > { %1997 = vmatprep.subr.bf16.mxu1 %v1074_v59  ;;  %v977_v33 = vadd.f32 1.0, %v4533_v42  ;;  %v1040_v6 = vmul.f32 %v976_v26, %v6627_v19  ;;  %v4000_v19 = vcombine.low %v6676_v14, %v6676_v14  ;;  %v4255_v14 = vld [vmem:[%s7230_s1 + $0x118] sm:$0xff]  }
 0x1a6   : > { %v4535_v23 = vpop.eup %4534  ;;  %1949 = vmatprep.subr.bf16.mxu0 %v1911_v62  ;;  %1998 = vmatpush1.bf16.msra.mxu1 %v1073_v25  ;;  %v1876_v57 = vmul.f32 %v1812_v36, %v6629_v39  ;;  %v3998_v39 = vcombine.low %v6665_v60, %v6665_v60  ;;  %v4253_v60 = vld [vmem:[%s7230_s1 + $0x108] sm:$0xff]  }
 0x1a7   : > { %v4537_v32 = vpop.eup %4536  ;;  %1950 = vmatpush1.bf16.msra.mxu0 %v1910_v7  ;;  %v1813_v44 = vadd.f32 1.0, %v4535_v23  ;;  %v1041_v63 = vmul.f32 %v977_v33, %v6641_v27  ;;  %v7353_v27 = vld [vmem:[#allocation3_spill] sm:$0xff] }
 0x1a8   : > { %v4539_v31 = vpop.eup %4538  ;;  %v978_v0 = vadd.f32 1.0, %v4537_v32 }
 0x1a9   : > { %v4541_v43 = vpop.eup %4540  ;;  %v1814_v10 = vadd.f32 1.0, %v4539_v31  ;;  %v1877_v21 = vmul.f32 %v1813_v44, %v6650_v13  ;;  %v7354_v13 = vmov 0  }
 0x1aa   : > { %v4543_v35 = vpop.eup %4542  ;;  %v1042_v11 = vmul.f32 %v978_v0, %v6667_v30  ;;  %v979_v37 = vadd.f32 1.0, %v4541_v43  ;;  %v7352_v30 = vld [vmem:[#allocation2_spill] sm:$0xff]  ;;  %v2089_v0 = vpop.permute.xlu0 %2088 }
 0x1ab   : > { %v1878_v18 = vmul.f32 %v1814_v10, %v6669_v5  ;;  %v1815_v38 = vadd.f32 1.0, %v4543_v35  ;;  %v4252_v5 = vld [vmem:[%s7230_s1 + $0x100] sm:$0xff]   ;;  %v2094_v35 = vpop.permute.xlu1 %2093 }
 0x1ac   : > { %v1075_v20 = vpack.c.bf16 %v1042_v11, %v1040_v6  ;;  %v1043_v56 = vmul.f32 %v979_v37, %v851_v49  ;;  %v4258_v49 = vld [vmem:[%s7230_s1 + $0x130] sm:$0xff]  }
 0x1ad   : > { %v1912_v61 = vpack.c.bf16 %v1878_v18, %v1876_v57  ;;  %v1879_v52 = vmul.f32 %v1815_v38, %v1687_v1  ;;  %v4262_v1 = vld [vmem:[%s7230_s1 + $0x150] sm:$0xff]  }
 0x1ae   : > { %v1076_v45 = vpack.c.bf16 %v1043_v56, %v1041_v63 }
 0x1af   : > { %v1913_v55 = vpack.c.bf16 %v1879_v52, %v1877_v21  ;;  %v2099_v52 = vpop.permute.xlu0 %2098 }
 0x1b0   : > { %1999 = vmatprep.subr.bf16.mxu1 %v1076_v45 }
 0x1b1   : > { %1951 = vmatprep.subr.bf16.mxu0 %v1913_v55  ;;  %2000 = vmatpush1.bf16.msra.mxu1 %v1075_v20 }
 0x1b2   : > { %1952 = vmatpush1.bf16.msra.mxu0 %v1912_v61 }
 0x1b3   : > { %4082 = vmatprep.subr.msk.bf16.mxu0 %vm588_vm0, %v7352_v30 }
 0x1b4   : > { %2002 = vmatmul.mubr.bf16.vlgmr.msra.gmra.mrb[64].mxu1 %v4000_v19 }
 0x1b5   : > { %1954 = vmatmul.mubr.bf16.vlgmr.msra.gmra.mrb[64].mxu0 %v3998_v39 }
 0x1b6   : > { %2365 = vmatpush1.bf16.msra.mxu0 %v7353_v27  ;;  %2396 = vmatprep.mubr.bf16.mxu0 %v7354_v13 }
 0x1bd   : > { %4083 = vmatmul.mubr.msk.bf16.vlgmr.msra.gmra.mrb[68].mxu0 %vm539_vm1, %v4252_v5 }
 0x1be   : > { %2406 = vmatprep.mubr.bf16.mxu0 %v7354_v13 }
 0x1c5   : > { %4084 = vmatmul.mubr.msk.bf16.gmra.mrb[72].mxu0 %vm539_vm1, %v4253_v60 }
 0x1c6   : > { %2416 = vmatprep.mubr.bf16.mxu0 %v7354_v13 }
 0x1cd   : > { %4085 = vmatmul.mubr.msk.bf16.gmra.mrb[76].mxu0 %vm539_vm1, %v4254_v17 }
 0x1ce   : > { %2426 = vmatprep.mubr.bf16.mxu0 %v7354_v13 }
 0x1d5   : > { %4086 = vmatmul.mubr.msk.bf16.gmra.mrb[80].mxu0 %vm539_vm1, %v4255_v14  ;;  %v2104_v14 = vpop.permute.xlu1 %2103 }
 0x1d6   : > { %2436 = vmatprep.mubr.bf16.mxu0 %v7354_v13 }
 0x1dd   : > { %4087 = vmatmul.mubr.msk.bf16.gmra.mrb[84].mxu0 %vm539_vm1, %v4256_v41 }
 0x1de   : > { %2446 = vmatprep.mubr.bf16.mxu0 %v7354_v13 }
 0x1e5   : > { %4088 = vmatmul.mubr.msk.bf16.gmra.mrb[88].mxu0 %vm539_vm1, %v4257_v54 }
 0x1e6   : > { %2456 = vmatprep.mubr.bf16.mxu0 %v7354_v13 }
 0x1ed   : > { %4089 = vmatmul.mubr.msk.bf16.gmra.mrb[92].mxu0 %vm539_vm1, %v4258_v49 }
 0x1ee   : > { %2466 = vmatprep.mubr.bf16.mxu0 %v7354_v13 }
 0x1f5   : > { %4090 = vmatmul.mubr.msk.bf16.gmra.mrb[96].mxu0 %vm539_vm1, %v4259_v2  ;;  %v6805_v2 = vld [vmem:[%s7232_s3 + $0x10] sm:$0xff] }
 0x1f6   : > { %2476 = vmatprep.mubr.bf16.mxu0 %v7354_v13 }
 0x1fd   : > { %4091 = vmatmul.mubr.msk.bf16.gmra.mrb[100].mxu0 %vm539_vm1, %v4260_v15 }
 0x1fe   : > { %2486 = vmatprep.mubr.bf16.mxu0 %v7354_v13 }
 0x205   : > { %4092 = vmatmul.mubr.msk.bf16.gmra.mrb[104].mxu0 %vm539_vm1, %v4261_v40 }
 0x206   : > { %2496 = vmatprep.mubr.bf16.mxu0 %v7354_v13 }
 0x20d   : > { %4093 = vmatmul.mubr.msk.bf16.gmra.mrb[108].mxu0 %vm539_vm1, %v4262_v1 }
 0x20e   : > { %2506 = vmatprep.mubr.bf16.mxu0 %v7354_v13 }
 0x215   : > { %4094 = vmatmul.mubr.msk.bf16.gmra.mrb[112].mxu0 %vm539_vm1, %v4263_v24 }
 0x216   : > { %2516 = vmatprep.mubr.bf16.mxu0 %v7354_v13 }
 0x21d   : > { %4095 = vmatmul.mubr.msk.bf16.gmra.mrb[116].mxu0 %vm539_vm1, %v4264_v29 }
 0x21e   : > { %2526 = vmatprep.mubr.bf16.mxu0 %v7354_v13 }
 0x225   : > { %4096 = vmatmul.mubr.msk.bf16.gmra.mrb[120].mxu0 %vm539_vm1, %v4265_v50 }
 0x226   : > { %2536 = vmatprep.mubr.bf16.mxu0 %v7354_v13 }
 0x22d   : > { %4097 = vmatmul.mubr.msk.bf16.gmra.mrb[124].mxu0 %vm539_vm1, %v4266_v8 }
 0x22e   : > { %2546 = vmatprep.mubr.bf16.mxu0 %v7354_v13 }
 0x235   : > { %4098 = vmatmul.mubr.msk.bf16.gmra.mrb[128].mxu0 %vm539_vm1, %v4267_v3 }
 0x287   : > { %v2003_v46 = vpop.f32.mrb[64].mxu1 }
 0x288   : > { %v1955_v34 = vpop.f32.mrb[64].mxu0  ;;  %v2005_v22 = vpop.f32.mrb[65].mxu1 }
 0x289   : > { %v6789_v58 = vadd.f32 %v2003_v46, %v1955_v34  ;;  %v1957_v53 = vpop.f32.mrb[65].mxu0  ;;  %v2007_v47 = vpop.f32.mrb[66].mxu1 }
 0x28a   : > { %v6791_v16 = vadd.f32 %v2005_v22, %v1957_v53  ;;  %v1959_v9 = vpop.f32.mrb[66].mxu0  ;;  %v2008_v25 = vpop.f32.mrb[67].mxu1  ;;  %v4101_v53 = vcombine.high %v6805_v2, %v6805_v2 }
 0x28b   : > { %v1960_v12 = vpop.f32.mrb[67].mxu0 }
 0x28c   : > { %2886 = vmatprep.mubr.bf16.mxu1 %v4101_v53 }
 0x290   : > { %v2398_v4 = vpop.f32.mrb[68].mxu0 }
 0x291   : > { %v2399_v7 = vadd.f32 %v2398_v4, %v2079_v48  ;;  %v2400_v51 = vpop.f32.mrb[69].mxu0  ;;  %v2109_v4 = vpop.permute.xlu0 %2108 }
 0x292   : > { %v2401_v59 = vadd.f32 %v2400_v51, %v2079_v48  ;;  %v2402_v42 = vpop.f32.mrb[70].mxu0 }
 0x293   : > { %v2557_v62 = vmul.f32 0.5, %v2399_v7  ;;  %v2403_v23 = vadd.f32 %v2402_v42, %v2084_v28  ;;  %v2404_v26 = vpop.f32.mrb[71].mxu0 }
 0x294   : > { %v2558_v32 = vmul.f32 0.5, %v2401_v59  ;;  %v2405_v36 = vadd.f32 %v2404_v26, %v2084_v28  ;;  %v2114_v26 = vpop.permute.xlu1 %2113 }
 0x295   : > { %4544 = vtanh.f32 %v2557_v62  ;;  %v2559_v31 = vmul.f32 0.5, %v2403_v23 }
 0x296   : > { %4546 = vtanh.f32 %v2558_v32  ;;  %v2560_v33 = vmul.f32 0.5, %v2405_v36 }
 0x297   : > { %4548 = vtanh.f32 %v2559_v31 }
 0x298   : > { %4550 = vtanh.f32 %v2560_v33  ;;  %v2408_v43 = vpop.f32.mrb[72].mxu0 }
 0x299   : > { %v2409_v44 = vadd.f32 %v2408_v43, %v2089_v0  ;;  %v2410_v10 = vpop.f32.mrb[73].mxu0 }
 0x29a   : > { %v2411_v6 = vadd.f32 %v2410_v10, %v2089_v0  ;;  %v2412_v11 = vpop.f32.mrb[74].mxu0 }
 0x29b   : > { %v6793_v37 = vmul.f32 0.5, %v2409_v44  ;;  %v2413_v57 = vadd.f32 %v2412_v11, %v2094_v35  ;;  %v2414_v18 = vpop.f32.mrb[75].mxu0 }
 0x29c   : > { %v6795_v38 = vmul.f32 0.5, %v2411_v6  ;;  %v2415_v63 = vadd.f32 %v2414_v18, %v2094_v35 }
 0x29d   : > { %4552 = vtanh.f32 %v6793_v37  ;;  %v2563_v20 = vmul.f32 0.5, %v2413_v57 }
 0x29e   : > { %4554 = vtanh.f32 %v6795_v38  ;;  %v6799_v56 = vmul.f32 0.5, %v2415_v63 }
 0x29f   : > { %v4545_v21 = vpop.eup %4544  ;;  %4556 = vtanh.f32 %v2563_v20 }
 0x2a0   : > { %v4547_v61 = vpop.eup %4546  ;;  %v2685_v45 = vadd.f32 1.0, %v4545_v21  ;;  %4558 = vtanh.f32 %v6799_v56  ;;  %v2418_v55 = vpop.f32.mrb[76].mxu0 }
 0x2a1   : > { %v4549_v19 = vpop.eup %4548  ;;  %v2686_v39 = vadd.f32 1.0, %v4547_v61  ;;  %v2419_v5 = vadd.f32 %v2418_v55, %v2099_v52  ;;  %v2420_v60 = vpop.f32.mrb[77].mxu0 }
 0x2a2   : > { %v4551_v17 = vpop.eup %4550  ;;  %v2687_v41 = vadd.f32 1.0, %v4549_v19  ;;  %v2421_v54 = vadd.f32 %v2420_v60, %v2099_v52  ;;  %v2422_v49 = vpop.f32.mrb[78].mxu0  ;;  %v2749_v15 = vmul.f32 %v2685_v45, %v2557_v62 }
 0x2a3   : > { %v2688_v40 = vadd.f32 1.0, %v4551_v17  ;;  %v6807_v1 = vmul.f32 0.5, %v2419_v5  ;;  %v2423_v24 = vadd.f32 %v2422_v49, %v2104_v14  ;;  %v2424_v29 = vpop.f32.mrb[79].mxu0  ;;  %v2750_v50 = vmul.f32 %v2686_v39, %v2558_v32  ;;  %v2124_v17 = vpop.permute.xlu1 %2123 }
 0x2a4   : > { %v2751_v8 = vmul.f32 %v2687_v41, %v2559_v31  ;;  %v6809_v3 = vmul.f32 0.5, %v2421_v54  ;;  %v2425_v46 = vadd.f32 %v2424_v29, %v2104_v14 }
 0x2a5   : > { %v2752_v34 = vmul.f32 %v2688_v40, %v2560_v33  ;;  %4560 = vtanh.f32 %v6807_v1  ;;  %v6812_v22 = vmul.f32 0.5, %v2423_v24 }
 0x2a6   : > { %v2815_v47 = vpack.c.bf16 %v2751_v8, %v2749_v15  ;;  %4562 = vtanh.f32 %v6809_v3  ;;  %v6817_v9 = vmul.f32 0.5, %v2425_v46 }
 0x2a7   : > { %v4553_v25 = vpop.eup %4552  ;;  %4564 = vtanh.f32 %v6812_v22  ;;  %v2816_v12 = vpack.c.bf16 %v2752_v34, %v2750_v50 }
 0x2a8   : > { %v4555_v48 = vpop.eup %4554  ;;  %v2689_v7 = vadd.f32 1.0, %v4553_v25  ;;  %4566 = vtanh.f32 %v6817_v9  ;;  %v2428_v51 = vpop.f32.mrb[80].mxu0 }
 0x2a9   : > { %v4557_v28 = vpop.eup %4556  ;;  %v2690_v59 = vadd.f32 1.0, %v4555_v48  ;;  %v2429_v42 = vadd.f32 %v2428_v51, %v2109_v4  ;;  %v2430_v62 = vpop.f32.mrb[81].mxu0  ;;  %2854 = vmatprep.subr.bf16.mxu1 %v2816_v12 }
 0x2aa   : > { %v4559_v23 = vpop.eup %4558  ;;  %v2691_v32 = vadd.f32 1.0, %v4557_v28  ;;  %v2431_v36 = vadd.f32 %v2430_v62, %v2109_v4  ;;  %v2432_v31 = vpop.f32.mrb[82].mxu0  ;;  %2855 = vmatpush1.bf16.msra.mxu1 %v2815_v47  ;;  %v2753_v10 = vmul.f32 %v2689_v7, %v6793_v37 }
 0x2ab   : > { %v2692_v33 = vadd.f32 1.0, %v4559_v23  ;;  %v6821_v0 = vmul.f32 0.5, %v2429_v42  ;;  %v2433_v43 = vadd.f32 %v2432_v31, %v2114_v26  ;;  %v2434_v44 = vpop.f32.mrb[83].mxu0  ;;  %v2754_v57 = vmul.f32 %v2690_v59, %v6795_v38  ;;  %v2134_v62 = vpop.permute.xlu1 %2133 }
 0x2ac   : > { %v2755_v35 = vmul.f32 %v2691_v32, %v2563_v20  ;;  %v6824_v6 = vmul.f32 0.5, %v2431_v36  ;;  %v2435_v11 = vadd.f32 %v2434_v44, %v2114_v26  ;;  %v2119_v20 = vpop.permute.xlu0 %2118 }
 0x2ad   : > { %v2756_v18 = vmul.f32 %v2692_v33, %v6799_v56  ;;  %4568 = vtanh.f32 %v6821_v0  ;;  %v2571_v63 = vmul.f32 0.5, %v2433_v43 }
 0x2ae   : > { %v2817_v21 = vpack.c.bf16 %v2755_v35, %v2753_v10  ;;  %4570 = vtanh.f32 %v6824_v6  ;;  %v6830_v61 = vmul.f32 0.5, %v2435_v11 }
 0x2af   : > { %v4561_v52 = vpop.eup %4560  ;;  %4572 = vtanh.f32 %v2571_v63  ;;  %v2818_v45 = vpack.c.bf16 %v2756_v18, %v2754_v57 }
 0x2b0   : > { %v4563_v37 = vpop.eup %4562  ;;  %v2693_v55 = vadd.f32 1.0, %v4561_v52  ;;  %4574 = vtanh.f32 %v6830_v61  ;;  %v2438_v19 = vpop.f32.mrb[84].mxu0 }
 0x2b1   : > { %v4565_v38 = vpop.eup %4564  ;;  %v2694_v39 = vadd.f32 1.0, %v4563_v37  ;;  %v2439_v56 = vadd.f32 %v2438_v19, %v2119_v20  ;;  %v2440_v5 = vpop.f32.mrb[85].mxu0  ;;  %2856 = vmatprep.subr.bf16.mxu1 %v2818_v45 }
 0x2b2   : > { %v4567_v60 = vpop.eup %4566  ;;  %v2695_v14 = vadd.f32 1.0, %v4565_v38  ;;  %v2441_v41 = vadd.f32 %v2440_v5, %v2119_v20  ;;  %v2442_v54 = vpop.f32.mrb[86].mxu0  ;;  %2857 = vmatpush1.bf16.msra.mxu1 %v2817_v21  ;;  %v2757_v29 = vmul.f32 %v2693_v55, %v6807_v1 }
 0x2b3   : > { %v2696_v49 = vadd.f32 1.0, %v4567_v60  ;;  %v6833_v15 = vmul.f32 0.5, %v2439_v56  ;;  %v2443_v40 = vadd.f32 %v2442_v54, %v2124_v17  ;;  %v2444_v24 = vpop.f32.mrb[87].mxu0  ;;  %v2758_v34 = vmul.f32 %v2694_v39, %v6809_v3  ;;  %v2144_v5 = vpop.permute.xlu1 %2143 }
 0x2b4   : > { %v2759_v50 = vmul.f32 %v2695_v14, %v6812_v22  ;;  %v6837_v8 = vmul.f32 0.5, %v2441_v41  ;;  %v2445_v46 = vadd.f32 %v2444_v24, %v2124_v17  ;;  %v2129_v22 = vpop.permute.xlu0 %2128 }
 0x2b5   : > { %v2760_v53 = vmul.f32 %v2696_v49, %v6817_v9  ;;  %4576 = vtanh.f32 %v6833_v15  ;;  %v2575_v47 = vmul.f32 0.5, %v2443_v40 }
 0x2b6   : > { %v2819_v25 = vpack.c.bf16 %v2759_v50, %v2757_v29  ;;  %4578 = vtanh.f32 %v6837_v8  ;;  %v6843_v12 = vmul.f32 0.5, %v2445_v46 }
 0x2b7   : > { %v4569_v48 = vpop.eup %4568  ;;  %4580 = vtanh.f32 %v2575_v47  ;;  %v2820_v1 = vpack.c.bf16 %v2760_v53, %v2758_v34 }
 0x2b8   : > { %v4571_v4 = vpop.eup %4570  ;;  %v2697_v7 = vadd.f32 1.0, %v4569_v48  ;;  %4582 = vtanh.f32 %v6843_v12  ;;  %v2448_v51 = vpop.f32.mrb[88].mxu0 }
 0x2b9   : > { %v4573_v3 = vpop.eup %4572  ;;  %v2698_v28 = vadd.f32 1.0, %v4571_v4  ;;  %v2449_v9 = vadd.f32 %v2448_v51, %v2129_v22  ;;  %v2450_v59 = vpop.f32.mrb[89].mxu0  ;;  %2858 = vmatprep.subr.bf16.mxu1 %v2820_v1 }
 0x2ba   : > { %v4575_v42 = vpop.eup %4574  ;;  %v2699_v23 = vadd.f32 1.0, %v4573_v3  ;;  %v2451_v26 = vadd.f32 %v2450_v59, %v2129_v22  ;;  %v2452_v32 = vpop.f32.mrb[90].mxu0  ;;  %2859 = vmatpush1.bf16.msra.mxu1 %v2819_v25  ;;  %v2761_v44 = vmul.f32 %v2697_v7, %v6821_v0 }
 0x2bb   : > { %v2700_v36 = vadd.f32 1.0, %v4575_v42  ;;  %v6846_v31 = vmul.f32 0.5, %v2449_v9  ;;  %v2453_v33 = vadd.f32 %v2452_v32, %v2134_v62  ;;  %v2454_v43 = vpop.f32.mrb[91].mxu0  ;;  %v2762_v57 = vmul.f32 %v2698_v28, %v6824_v6  ;;  %v2154_v59 = vpop.permute.xlu1 %2153 }
 0x2bc   : > { %v2763_v10 = vmul.f32 %v2699_v23, %v2571_v63  ;;  %v6849_v35 = vmul.f32 0.5, %v2451_v26  ;;  %v2455_v11 = vadd.f32 %v2454_v43, %v2134_v62  ;;  %v2139_v63 = vpop.permute.xlu0 %2138 }
 0x2bd   : > { %v2764_v18 = vmul.f32 %v2700_v36, %v6830_v61  ;;  %4584 = vtanh.f32 %v6846_v31  ;;  %v2579_v21 = vmul.f32 0.5, %v2453_v33 }
 0x2be   : > { %v2821_v52 = vpack.c.bf16 %v2763_v10, %v2761_v44  ;;  %4586 = vtanh.f32 %v6849_v35  ;;  %v6855_v45 = vmul.f32 0.5, %v2455_v11 }
 0x2bf   : > { %v4577_v37 = vpop.eup %4576  ;;  %4588 = vtanh.f32 %v2579_v21  ;;  %v2822_v20 = vpack.c.bf16 %v2764_v18, %v2762_v57 }
 0x2c0   : > { %v4579_v0 = vpop.eup %4578  ;;  %v2701_v55 = vadd.f32 1.0, %v4577_v37  ;;  %4590 = vtanh.f32 %v6855_v45  ;;  %v2458_v19 = vpop.f32.mrb[92].mxu0 }
 0x2c1   : > { %v4581_v6 = vpop.eup %4580  ;;  %v2702_v38 = vadd.f32 1.0, %v4579_v0  ;;  %v2459_v61 = vadd.f32 %v2458_v19, %v2139_v63  ;;  %v2460_v39 = vpop.f32.mrb[93].mxu0  ;;  %2860 = vmatprep.subr.bf16.mxu1 %v2822_v20 }
 0x2c2   : > { %v4583_v56 = vpop.eup %4582  ;;  %v2703_v60 = vadd.f32 1.0, %v4581_v6  ;;  %v2461_v17 = vadd.f32 %v2460_v39, %v2139_v63  ;;  %v2462_v14 = vpop.f32.mrb[94].mxu0  ;;  %2861 = vmatpush1.bf16.msra.mxu1 %v2821_v52  ;;  %v2765_v24 = vmul.f32 %v2701_v55, %v6833_v15 }
 0x2c3   : > { %v2704_v41 = vadd.f32 1.0, %v4583_v56  ;;  %v6858_v54 = vmul.f32 0.5, %v2459_v61  ;;  %v2463_v49 = vadd.f32 %v2462_v14, %v2144_v5  ;;  %v2464_v40 = vpop.f32.mrb[95].mxu0  ;;  %v2766_v34 = vmul.f32 %v2702_v38, %v6837_v8  ;;  %v2164_v39 = vpop.permute.xlu1 %2163 }
 0x2c4   : > { %v2767_v29 = vmul.f32 %v2703_v60, %v2575_v47  ;;  %v6861_v50 = vmul.f32 0.5, %v2461_v17  ;;  %v2465_v46 = vadd.f32 %v2464_v40, %v2144_v5  ;;  %v2149_v47 = vpop.permute.xlu0 %2148 }
 0x2c5   : > { %v2768_v53 = vmul.f32 %v2704_v41, %v6843_v12  ;;  %4592 = vtanh.f32 %v6858_v54  ;;  %v2583_v25 = vmul.f32 0.5, %v2463_v49 }
 0x2c6   : > { %v2823_v48 = vpack.c.bf16 %v2767_v29, %v2765_v24  ;;  %4594 = vtanh.f32 %v6861_v50  ;;  %v6867_v1 = vmul.f32 0.5, %v2465_v46 }
 0x2c7   : > { %v4585_v4 = vpop.eup %4584  ;;  %4596 = vtanh.f32 %v2583_v25  ;;  %v2824_v22 = vpack.c.bf16 %v2768_v53, %v2766_v34 }
 0x2c8   : > { %v4587_v15 = vpop.eup %4586  ;;  %v2705_v7 = vadd.f32 1.0, %v4585_v4  ;;  %4598 = vtanh.f32 %v6867_v1  ;;  %v2468_v51 = vpop.f32.mrb[96].mxu0 }
 0x2c9   : > { %v4589_v8 = vpop.eup %4588  ;;  %v2706_v3 = vadd.f32 1.0, %v4587_v15  ;;  %v2469_v12 = vadd.f32 %v2468_v51, %v2149_v47  ;;  %v2470_v28 = vpop.f32.mrb[97].mxu0  ;;  %2862 = vmatprep.subr.bf16.mxu1 %v2824_v22 }
 0x2ca   : > { %v4591_v9 = vpop.eup %4590  ;;  %v2707_v42 = vadd.f32 1.0, %v4589_v8  ;;  %v2471_v62 = vadd.f32 %v2470_v28, %v2149_v47  ;;  %v2472_v23 = vpop.f32.mrb[98].mxu0  ;;  %2863 = vmatpush1.bf16.msra.mxu1 %v2823_v48  ;;  %v2769_v43 = vmul.f32 %v2705_v7, %v6846_v31 }
 0x2cb   : > { %v2708_v26 = vadd.f32 1.0, %v4591_v9  ;;  %v6870_v32 = vmul.f32 0.5, %v2469_v12  ;;  %v2473_v36 = vadd.f32 %v2472_v23, %v2154_v59  ;;  %v2474_v33 = vpop.f32.mrb[99].mxu0  ;;  %v2770_v57 = vmul.f32 %v2706_v3, %v6849_v35  ;;  %v2174_v28 = vpop.permute.xlu1 %2173 }
 0x2cc   : > { %v2771_v44 = vmul.f32 %v2707_v42, %v2579_v21  ;;  %v6873_v10 = vmul.f32 0.5, %v2471_v62  ;;  %v2475_v11 = vadd.f32 %v2474_v33, %v2154_v59  ;;  %v2159_v21 = vpop.permute.xlu0 %2158 }
 0x2cd   : > { %v2772_v18 = vmul.f32 %v2708_v26, %v6855_v45  ;;  %4600 = vtanh.f32 %v6870_v32  ;;  %v2587_v52 = vmul.f32 0.5, %v2473_v36 }
 0x2ce   : > { %v2825_v37 = vpack.c.bf16 %v2771_v44, %v2769_v43  ;;  %4602 = vtanh.f32 %v6873_v10  ;;  %v6879_v20 = vmul.f32 0.5, %v2475_v11 }
 0x2cf   : > { %v4593_v0 = vpop.eup %4592  ;;  %4604 = vtanh.f32 %v2587_v52  ;;  %v2826_v63 = vpack.c.bf16 %v2772_v18, %v2770_v57 }
 0x2d0   : > { %v4595_v31 = vpop.eup %4594  ;;  %v2709_v55 = vadd.f32 1.0, %v4593_v0  ;;  %4606 = vtanh.f32 %v6879_v20  ;;  %v2478_v19 = vpop.f32.mrb[100].mxu0 }
 0x2d1   : > { %v4597_v35 = vpop.eup %4596  ;;  %v2710_v6 = vadd.f32 1.0, %v4595_v31  ;;  %v2479_v45 = vadd.f32 %v2478_v19, %v2159_v21  ;;  %v2480_v38 = vpop.f32.mrb[101].mxu0  ;;  %2864 = vmatprep.subr.bf16.mxu1 %v2826_v63 }
 0x2d2   : > { %v4599_v61 = vpop.eup %4598  ;;  %v2711_v56 = vadd.f32 1.0, %v4597_v35  ;;  %v2481_v5 = vadd.f32 %v2480_v38, %v2159_v21  ;;  %v2482_v60 = vpop.f32.mrb[102].mxu0  ;;  %2865 = vmatpush1.bf16.msra.mxu1 %v2825_v37  ;;  %v2773_v40 = vmul.f32 %v2709_v55, %v6858_v54 }
 0x2d3   : > { %v2712_v17 = vadd.f32 1.0, %v4599_v61  ;;  %v6882_v14 = vmul.f32 0.5, %v2479_v45  ;;  %v2483_v41 = vadd.f32 %v2482_v60, %v2164_v39  ;;  %v2484_v49 = vpop.f32.mrb[103].mxu0  ;;  %v2774_v34 = vmul.f32 %v2710_v6, %v6861_v50  ;;  %v2184_v38 = vpop.permute.xlu1 %2183 }
 0x2d4   : > { %v2775_v24 = vmul.f32 %v2711_v56, %v2583_v25  ;;  %v6885_v29 = vmul.f32 0.5, %v2481_v5  ;;  %v2485_v46 = vadd.f32 %v2484_v49, %v2164_v39  ;;  %v2169_v25 = vpop.permute.xlu0 %2168 }
 0x2d5   : > { %v2776_v53 = vmul.f32 %v2712_v17, %v6867_v1  ;;  %4608 = vtanh.f32 %v6882_v14  ;;  %v2591_v48 = vmul.f32 0.5, %v2483_v41 }
 0x2d6   : > { %v2827_v4 = vpack.c.bf16 %v2775_v24, %v2773_v40  ;;  %4610 = vtanh.f32 %v6885_v29  ;;  %v6891_v22 = vmul.f32 0.5, %v2485_v46 }
 0x2d7   : > { %v4601_v15 = vpop.eup %4600  ;;  %4612 = vtanh.f32 %v2591_v48  ;;  %v2828_v47 = vpack.c.bf16 %v2776_v53, %v2774_v34 }
 0x2d8   : > { %v4603_v54 = vpop.eup %4602  ;;  %v2713_v7 = vadd.f32 1.0, %v4601_v15  ;;  %4614 = vtanh.f32 %v6891_v22  ;;  %v2488_v51 = vpop.f32.mrb[104].mxu0 }
 0x2d9   : > { %v4605_v50 = vpop.eup %4604  ;;  %v2714_v8 = vadd.f32 1.0, %v4603_v54  ;;  %v2489_v1 = vadd.f32 %v2488_v51, %v2169_v25  ;;  %v2490_v3 = vpop.f32.mrb[105].mxu0  ;;  %2866 = vmatprep.subr.bf16.mxu1 %v2828_v47 }
 0x2da   : > { %v4607_v12 = vpop.eup %4606  ;;  %v2715_v9 = vadd.f32 1.0, %v4605_v50  ;;  %v2491_v59 = vadd.f32 %v2490_v3, %v2169_v25  ;;  %v2492_v42 = vpop.f32.mrb[106].mxu0  ;;  %2867 = vmatpush1.bf16.msra.mxu1 %v2827_v4  ;;  %v2777_v33 = vmul.f32 %v2713_v7, %v6870_v32 }
 0x2db   : > { %v2716_v62 = vadd.f32 1.0, %v4607_v12  ;;  %v6894_v23 = vmul.f32 0.5, %v2489_v1  ;;  %v2493_v26 = vadd.f32 %v2492_v42, %v2174_v28  ;;  %v2494_v36 = vpop.f32.mrb[107].mxu0  ;;  %v2778_v57 = vmul.f32 %v2714_v8, %v6873_v10  ;;  %v2194_v3 = vpop.permute.xlu1 %2193 }
 0x2dc   : > { %v2779_v43 = vmul.f32 %v2715_v9, %v2587_v52  ;;  %v6897_v44 = vmul.f32 0.5, %v2491_v59  ;;  %v2495_v11 = vadd.f32 %v2494_v36, %v2174_v28  ;;  %v2179_v52 = vpop.permute.xlu0 %2178 }
 0x2dd   : > { %v2780_v18 = vmul.f32 %v2716_v62, %v6879_v20  ;;  %4616 = vtanh.f32 %v6894_v23  ;;  %v2595_v37 = vmul.f32 0.5, %v2493_v26 }
 0x2de   : > { %v2829_v0 = vpack.c.bf16 %v2779_v43, %v2777_v33  ;;  %4618 = vtanh.f32 %v6897_v44  ;;  %v6903_v63 = vmul.f32 0.5, %v2495_v11 }
 0x2df   : > { %v4609_v31 = vpop.eup %4608  ;;  %4620 = vtanh.f32 %v2595_v37  ;;  %v2830_v21 = vpack.c.bf16 %v2780_v18, %v2778_v57 }
 0x2e0   : > { %v4611_v32 = vpop.eup %4610  ;;  %v2717_v55 = vadd.f32 1.0, %v4609_v31  ;;  %4622 = vtanh.f32 %v6903_v63  ;;  %v2498_v19 = vpop.f32.mrb[108].mxu0 }
 0x2e1   : > { %v4613_v10 = vpop.eup %4612  ;;  %v2718_v35 = vadd.f32 1.0, %v4611_v32  ;;  %v2499_v20 = vadd.f32 %v2498_v19, %v2179_v52  ;;  %v2500_v6 = vpop.f32.mrb[109].mxu0  ;;  %2868 = vmatprep.subr.bf16.mxu1 %v2830_v21 }
 0x2e2   : > { %v4615_v45 = vpop.eup %4614  ;;  %v2719_v61 = vadd.f32 1.0, %v4613_v10  ;;  %v2501_v39 = vadd.f32 %v2500_v6, %v2179_v52  ;;  %v2502_v56 = vpop.f32.mrb[110].mxu0  ;;  %2869 = vmatpush1.bf16.msra.mxu1 %v2829_v0  ;;  %v2781_v49 = vmul.f32 %v2717_v55, %v6882_v14 }
 0x2e3   : > { %v2720_v5 = vadd.f32 1.0, %v4615_v45  ;;  %v6906_v60 = vmul.f32 0.5, %v2499_v20  ;;  %v2503_v17 = vadd.f32 %v2502_v56, %v2184_v38  ;;  %v2504_v41 = vpop.f32.mrb[111].mxu0  ;;  %v2782_v34 = vmul.f32 %v2718_v35, %v6885_v29  ;;  %v2204_v6 = vpop.permute.xlu1 %2203 }
 0x2e4   : > { %v2783_v40 = vmul.f32 %v2719_v61, %v2591_v48  ;;  %v6909_v24 = vmul.f32 0.5, %v2501_v39  ;;  %v2505_v46 = vadd.f32 %v2504_v41, %v2184_v38  ;;  %v2189_v48 = vpop.permute.xlu0 %2188 }
 0x2e5   : > { %v2784_v53 = vmul.f32 %v2720_v5, %v6891_v22  ;;  %4624 = vtanh.f32 %v6906_v60  ;;  %v2599_v4 = vmul.f32 0.5, %v2503_v17 }
 0x2e6   : > { %v2831_v15 = vpack.c.bf16 %v2783_v40, %v2781_v49  ;;  %4626 = vtanh.f32 %v6909_v24  ;;  %v6915_v47 = vmul.f32 0.5, %v2505_v46 }
 0x2e7   : > { %v4617_v54 = vpop.eup %4616  ;;  %4628 = vtanh.f32 %v2599_v4  ;;  %v2832_v25 = vpack.c.bf16 %v2784_v53, %v2782_v34 }
 0x2e8   : > { %v4619_v14 = vpop.eup %4618  ;;  %v2721_v7 = vadd.f32 1.0, %v4617_v54  ;;  %4630 = vtanh.f32 %v6915_v47  ;;  %v2508_v51 = vpop.f32.mrb[112].mxu0 }
 0x2e9   : > { %v4621_v29 = vpop.eup %4620  ;;  %v2722_v50 = vadd.f32 1.0, %v4619_v14  ;;  %v2509_v22 = vadd.f32 %v2508_v51, %v2189_v48  ;;  %v2510_v8 = vpop.f32.mrb[113].mxu0  ;;  %2870 = vmatprep.subr.bf16.mxu1 %v2832_v25 }
 0x2ea   : > { %v4623_v1 = vpop.eup %4622  ;;  %v2723_v12 = vadd.f32 1.0, %v4621_v29  ;;  %v2511_v28 = vadd.f32 %v2510_v8, %v2189_v48  ;;  %v2512_v9 = vpop.f32.mrb[114].mxu0  ;;  %2871 = vmatpush1.bf16.msra.mxu1 %v2831_v15  ;;  %v2785_v36 = vmul.f32 %v2721_v7, %v6894_v23 }
 0x2eb   : > { %v2724_v59 = vadd.f32 1.0, %v4623_v1  ;;  %v6918_v42 = vmul.f32 0.5, %v2509_v22  ;;  %v2513_v62 = vadd.f32 %v2512_v9, %v2194_v3  ;;  %v2514_v26 = vpop.f32.mrb[115].mxu0  ;;  %v2786_v57 = vmul.f32 %v2722_v50, %v6897_v44  ;;  %v2214_v8 = vpop.permute.xlu1 %2213 }
 0x2ec   : > { %v2787_v33 = vmul.f32 %v2723_v12, %v2595_v37  ;;  %v6921_v43 = vmul.f32 0.5, %v2511_v28  ;;  %v2515_v11 = vadd.f32 %v2514_v26, %v2194_v3  ;;  %v2199_v37 = vpop.permute.xlu0 %2198 }
 0x2ed   : > { %v2788_v18 = vmul.f32 %v2724_v59, %v6903_v63  ;;  %4632 = vtanh.f32 %v6918_v42  ;;  %v2603_v0 = vmul.f32 0.5, %v2513_v62 }
 0x2ee   : > { %v2833_v31 = vpack.c.bf16 %v2787_v33, %v2785_v36  ;;  %4634 = vtanh.f32 %v6921_v43  ;;  %v6927_v21 = vmul.f32 0.5, %v2515_v11 }
 0x2ef   : > { %v4625_v32 = vpop.eup %4624  ;;  %4636 = vtanh.f32 %v2603_v0  ;;  %v2834_v52 = vpack.c.bf16 %v2788_v18, %v2786_v57 }
 0x2f0   : > { %v4627_v23 = vpop.eup %4626  ;;  %v2725_v55 = vadd.f32 1.0, %v4625_v32  ;;  %4638 = vtanh.f32 %v6927_v21  ;;  %v2518_v19 = vpop.f32.mrb[116].mxu0 }
 0x2f1   : > { %v4629_v44 = vpop.eup %4628  ;;  %v2726_v10 = vadd.f32 1.0, %v4627_v23  ;;  %v2519_v63 = vadd.f32 %v2518_v19, %v2199_v37  ;;  %v2520_v35 = vpop.f32.mrb[117].mxu0  ;;  %2872 = vmatprep.subr.bf16.mxu1 %v2834_v52 }
 0x2f2   : > { %v4631_v20 = vpop.eup %4630  ;;  %v2727_v45 = vadd.f32 1.0, %v4629_v44  ;;  %v2521_v38 = vadd.f32 %v2520_v35, %v2199_v37  ;;  %v2522_v61 = vpop.f32.mrb[118].mxu0  ;;  %2873 = vmatpush1.bf16.msra.mxu1 %v2833_v31  ;;  %v2789_v41 = vmul.f32 %v2725_v55, %v6906_v60 }
 0x2f3   : > { %v2728_v39 = vadd.f32 1.0, %v4631_v20  ;;  %v6930_v56 = vmul.f32 0.5, %v2519_v63  ;;  %v2523_v5 = vadd.f32 %v2522_v61, %v2204_v6  ;;  %v2524_v17 = vpop.f32.mrb[119].mxu0  ;;  %v2790_v34 = vmul.f32 %v2726_v10, %v6909_v24  ;;  %v2224_v35 = vpop.permute.xlu1 %2223 }
 0x2f4   : > { %v2791_v49 = vmul.f32 %v2727_v45, %v2599_v4  ;;  %v6933_v40 = vmul.f32 0.5, %v2521_v38  ;;  %v2525_v46 = vadd.f32 %v2524_v17, %v2204_v6  ;;  %v2209_v4 = vpop.permute.xlu0 %2208 }
 0x2f5   : > { %v2792_v53 = vmul.f32 %v2728_v39, %v6915_v47  ;;  %4640 = vtanh.f32 %v6930_v56  ;;  %v2607_v15 = vmul.f32 0.5, %v2523_v5 }
 0x2f6   : > { %v2835_v54 = vpack.c.bf16 %v2791_v49, %v2789_v41  ;;  %4642 = vtanh.f32 %v6933_v40  ;;  %v6939_v25 = vmul.f32 0.5, %v2525_v46 }
 0x2f7   : > { %v4633_v14 = vpop.eup %4632  ;;  %4644 = vtanh.f32 %v2607_v15  ;;  %v2836_v48 = vpack.c.bf16 %v2792_v53, %v2790_v34 }
 0x2f8   : > { %v4635_v60 = vpop.eup %4634  ;;  %v2729_v7 = vadd.f32 1.0, %v4633_v14  ;;  %4646 = vtanh.f32 %v6939_v25  ;;  %v2528_v51 = vpop.f32.mrb[120].mxu0 }
 0x2f9   : > { %v4637_v24 = vpop.eup %4636  ;;  %v2730_v29 = vadd.f32 1.0, %v4635_v60  ;;  %v2529_v47 = vadd.f32 %v2528_v51, %v2209_v4  ;;  %v2530_v50 = vpop.f32.mrb[121].mxu0  ;;  %2874 = vmatprep.subr.bf16.mxu1 %v2836_v48 }
 0x2fa   : > { %v4639_v22 = vpop.eup %4638  ;;  %v2731_v1 = vadd.f32 1.0, %v4637_v24  ;;  %v2531_v3 = vadd.f32 %v2530_v50, %v2209_v4  ;;  %v2532_v12 = vpop.f32.mrb[122].mxu0  ;;  %2875 = vmatpush1.bf16.msra.mxu1 %v2835_v54  ;;  %v2793_v26 = vmul.f32 %v2729_v7, %v6918_v42 }
 0x2fb   : > { %v2732_v28 = vadd.f32 1.0, %v4639_v22  ;;  %v6942_v9 = vmul.f32 0.5, %v2529_v47  ;;  %v2533_v59 = vadd.f32 %v2532_v12, %v2214_v8  ;;  %v2534_v62 = vpop.f32.mrb[123].mxu0  ;;  %v2794_v57 = vmul.f32 %v2730_v29, %v6921_v43 }
 0x2fc   : > { %v2795_v36 = vmul.f32 %v2731_v1, %v2603_v0  ;;  %v6945_v33 = vmul.f32 0.5, %v2531_v3  ;;  %v2535_v11 = vadd.f32 %v2534_v62, %v2214_v8  ;;  %v2219_v0 = vpop.permute.xlu0 %2218 }
 0x2fd   : > { %v2796_v18 = vmul.f32 %v2732_v28, %v6927_v21  ;;  %4648 = vtanh.f32 %v6942_v9  ;;  %v2611_v31 = vmul.f32 0.5, %v2533_v59 }
 0x2fe   : > { %v2837_v32 = vpack.c.bf16 %v2795_v36, %v2793_v26  ;;  %4650 = vtanh.f32 %v6945_v33  ;;  %v6951_v52 = vmul.f32 0.5, %v2535_v11 }
 0x2ff   : > { %v4641_v23 = vpop.eup %4640  ;;  %4652 = vtanh.f32 %v2611_v31  ;;  %v2838_v37 = vpack.c.bf16 %v2796_v18, %v2794_v57 }
 0x300   : > { %v4643_v42 = vpop.eup %4642  ;;  %v2733_v55 = vadd.f32 1.0, %v4641_v23  ;;  %4654 = vtanh.f32 %v6951_v52  ;;  %v2538_v19 = vpop.f32.mrb[124].mxu0 }
 0x301   : > { %v4645_v43 = vpop.eup %4644  ;;  %v2734_v44 = vadd.f32 1.0, %v4643_v42  ;;  %v2539_v21 = vadd.f32 %v2538_v19, %v2219_v0  ;;  %v2540_v10 = vpop.f32.mrb[125].mxu0  ;;  %2876 = vmatprep.subr.bf16.mxu1 %v2838_v37 }
 0x302   : > { %v4647_v63 = vpop.eup %4646  ;;  %v2735_v20 = vadd.f32 1.0, %v4645_v43  ;;  %v2541_v6 = vadd.f32 %v2540_v10, %v2219_v0  ;;  %v2542_v45 = vpop.f32.mrb[126].mxu0  ;;  %2877 = vmatpush1.bf16.msra.mxu1 %v2837_v32  ;;  %v2797_v17 = vmul.f32 %v2733_v55, %v6930_v56 }
 0x303   : > { %v2736_v38 = vadd.f32 1.0, %v4647_v63  ;;  %v2613_v61 = vmul.f32 0.5, %v2539_v21  ;;  %v2543_v39 = vadd.f32 %v2542_v45, %v2224_v35  ;;  %v2544_v5 = vpop.f32.mrb[127].mxu0  ;;  %v2798_v34 = vmul.f32 %v2734_v44, %v6933_v40  ;;  %v2229_v51 = vpop.permute.xlu0 %2228 }
 0x304   : > { %v2799_v41 = vmul.f32 %v2735_v20, %v2607_v15  ;;  %v2614_v49 = vmul.f32 0.5, %v2541_v6  ;;  %v2545_v46 = vadd.f32 %v2544_v5, %v2224_v35 }
 0x305   : > { %v2800_v53 = vmul.f32 %v2736_v38, %v6939_v25  ;;  %4656 = vtanh.f32 %v2613_v61  ;;  %v2615_v54 = vmul.f32 0.5, %v2543_v39  ;;  %v2234_v25 = vpop.permute.xlu1 %2233 }
 0x306   : > { %v2839_v14 = vpack.c.bf16 %v2799_v41, %v2797_v17  ;;  %4658 = vtanh.f32 %v2614_v49  ;;  %v2616_v48 = vmul.f32 0.5, %v2545_v46 }
 0x307   : > { %v4649_v60 = vpop.eup %4648  ;;  %4660 = vtanh.f32 %v2615_v54  ;;  %v2840_v4 = vpack.c.bf16 %v2800_v53, %v2798_v34 }
 0x308   : > { %v4651_v7 = vpop.eup %4650  ;;  %v2737_v24 = vadd.f32 1.0, %v4649_v60  ;;  %4662 = vtanh.f32 %v2616_v48  ;;  %v2548_v56 = vpop.f32.mrb[128].mxu0 }
 0x309   : > { %v4653_v15 = vpop.eup %4652  ;;  %v2738_v29 = vadd.f32 1.0, %v4651_v7  ;;  %v2549_v47 = vadd.f32 %v2548_v56, %v2229_v51  ;;  %v2550_v50 = vpop.f32.mrb[129].mxu0  ;;  %2878 = vmatprep.subr.bf16.mxu1 %v2840_v4  ;;  %v4274_v4 = vld [vmem:[%s7230_s1 + $0x1a0] sm:$0xff]   ;;  %v4275_v7 = vld [vmem:[%s7230_s1 + $0x1a8] sm:$0xff]  }
 0x30a   : > { %v4655_v40 = vpop.eup %4654  ;;  %v2739_v22 = vadd.f32 1.0, %v4653_v15  ;;  %v2551_v8 = vadd.f32 %v2550_v50, %v2229_v51  ;;  %v2552_v1 = vpop.f32.mrb[130].mxu0  ;;  %2879 = vmatpush1.bf16.msra.mxu1 %v2839_v14  ;;  %v2801_v62 = vmul.f32 %v2737_v24, %v6942_v9  ;;  %v4276_v51 = vld [vmem:[%s7230_s1 + $0x1b0] sm:$0xff]   ;;  %v4277_v24 = vld [vmem:[%s7230_s1 + $0x1b8] sm:$0xff]   ;;  %v4278_v56 = vld [vmem:[%s7230_s1 + $0x1c0] sm:$0xff]  }
 0x30b   : > { %v2740_v3 = vadd.f32 1.0, %v4655_v40  ;;  %v2617_v12 = vmul.f32 0.5, %v2549_v47  ;;  %v2553_v28 = vadd.f32 %v2552_v1, %v2234_v25  ;;  %v2554_v59 = vpop.f32.mrb[131].mxu0  ;;  %v2802_v57 = vmul.f32 %v2738_v29, %v6945_v33  ;;  %v4279_v15 = vld [vmem:[%s7230_s1 + $0x1c8] sm:$0xff]   ;;  %v4280_v29 = vld [vmem:[%s7230_s1 + $0x1d0] sm:$0xff]   ;;  %v4281_v47 = vld [vmem:[%s7230_s1 + $0x1d8] sm:$0xff]  }
 0x30c   : > { %v2803_v26 = vmul.f32 %v2739_v22, %v2611_v31  ;;  %v2618_v36 = vmul.f32 0.5, %v2551_v8  ;;  %v2555_v11 = vadd.f32 %v2554_v59, %v2234_v25  ;;  %v4282_v50 = vld [vmem:[%s7230_s1 + $0x1e0] sm:$0xff]   ;;  %v4283_v40 = vld [vmem:[%s7230_s1 + $0x1e8] sm:$0xff]   ;;  %v4284_v25 = vld [vmem:[%s7230_s1 + $0x1f0] sm:$0xff]  }
 0x30d   : > { %v2804_v18 = vmul.f32 %v2740_v3, %v6951_v52  ;;  %4664 = vtanh.f32 %v2617_v12  ;;  %v2619_v32 = vmul.f32 0.5, %v2553_v28  ;;  %v4285_v22 = vld [vmem:[%s7230_s1 + $0x1f8] sm:$0xff]  }
 0x30e   : > { %v2841_v23 = vpack.c.bf16 %v2803_v26, %v2801_v62  ;;  %4666 = vtanh.f32 %v2618_v36  ;;  %v2620_v37 = vmul.f32 0.5, %v2555_v11  ;;  %v2966_v62 = vpop.permute.xlu0 %2965  ;;  %v2971_v11 = vpop.permute.xlu1 %2970 }
 0x30f   : > { %v4657_v42 = vpop.eup %4656  ;;  %4668 = vtanh.f32 %v2619_v32  ;;  %v2842_v0 = vpack.c.bf16 %v2804_v18, %v2802_v57 }
 0x310   : > { %v4659_v55 = vpop.eup %4658  ;;  %v2741_v19 = vadd.f32 1.0, %v4657_v42  ;;  %4670 = vtanh.f32 %v2620_v37 }
 0x311   : > { %v4661_v43 = vpop.eup %4660  ;;  %v2742_v9 = vadd.f32 1.0, %v4659_v55  ;;  %2880 = vmatprep.subr.bf16.mxu1 %v2842_v0 }
 0x312   : > { %v4663_v31 = vpop.eup %4662  ;;  %v2743_v44 = vadd.f32 1.0, %v4661_v43  ;;  %2881 = vmatpush1.bf16.msra.mxu1 %v2841_v23  ;;  %v2805_v21 = vmul.f32 %v2741_v19, %v2613_v61 }
 0x313   : > { %v2744_v33 = vadd.f32 1.0, %v4663_v31  ;;  %v2806_v10 = vmul.f32 %v2742_v9, %v2614_v49  ;;  %v4100_v49 = vcombine.low %v6805_v2, %v6805_v2  ;;  %v4271_v2 = vld [vmem:[%s7230_s1 + $0x188] sm:$0xff]   ;;  %v2981_v31 = vpop.permute.xlu1 %2980 }
 0x314   : > { %v2807_v52 = vmul.f32 %v2743_v44, %v2615_v54 }
 0x315   : > { %v2808_v63 = vmul.f32 %v2744_v33, %v2616_v48  ;;  %v4270_v48 = vld [vmem:[%s7230_s1 + $0x180] sm:$0xff]  }
 0x316   : > { %v2843_v35 = vpack.c.bf16 %v2807_v52, %v2805_v21 }
 0x317   : > { %v4665_v20 = vpop.eup %4664  ;;  %v2844_v6 = vpack.c.bf16 %v2808_v63, %v2806_v10 }
 0x318   : > { %v4667_v45 = vpop.eup %4666  ;;  %v2745_v38 = vadd.f32 1.0, %v4665_v20 }
 0x319   : > { %v4669_v39 = vpop.eup %4668  ;;  %v2746_v5 = vadd.f32 1.0, %v4667_v45  ;;  %2882 = vmatprep.subr.bf16.mxu1 %v2844_v6 }
 0x31a   : > { %v4671_v17 = vpop.eup %4670  ;;  %v2747_v41 = vadd.f32 1.0, %v4669_v39  ;;  %2883 = vmatpush1.bf16.msra.mxu1 %v2843_v35  ;;  %v2809_v34 = vmul.f32 %v2745_v38, %v2617_v12 }
 0x31b   : > { %v2748_v46 = vadd.f32 1.0, %v4671_v17  ;;  %v2810_v14 = vmul.f32 %v2746_v5, %v2618_v36 }
 0x31c   : > { %v2811_v53 = vmul.f32 %v2747_v41, %v2619_v32 }
 0x31d   : > { %v2812_v60 = vmul.f32 %v2748_v46, %v2620_v37 }
 0x31e   : > { %v2845_v61 = vpack.c.bf16 %v2811_v53, %v2809_v34 }
 0x31f   : > { %v2846_v54 = vpack.c.bf16 %v2812_v60, %v2810_v14  ;;  %v2991_v60 = vpop.permute.xlu1 %2990 }
 0x321   : > { %2884 = vmatprep.subr.bf16.mxu1 %v2846_v54 }
 0x322   : > { %2885 = vmatpush1.bf16.msra.mxu1 %v2845_v61 }
 0x323   : > { %4182 = vmatprep.subr.msk.bf16.mxu1 %vm588_vm0, %v7352_v30  ;;  %v4272_v30 = vld [vmem:[%s7230_s1 + $0x190] sm:$0xff]  }
 0x325   : > { %2887 = vmatmul.mubr.bf16.vlgmr.msra.gmra.mrb[68].mxu1 %v4100_v49 }
 0x326   : > { %3252 = vmatpush1.bf16.msra.mxu1 %v7353_v27  ;;  %3283 = vmatprep.mubr.bf16.mxu1 %v7354_v13  ;;  %v4273_v27 = vld [vmem:[%s7230_s1 + $0x198] sm:$0xff]  }
 0x32d   : > { %4183 = vmatmul.mubr.msk.bf16.vlgmr.msra.gmra.mrb[72].mxu1 %vm539_vm1, %v4270_v48  ;;  %v7063_v48 = vld [vmem:[%s7232_s3 + $0x18] sm:$0xff] }
 0x32e   : > { %3293 = vmatprep.mubr.bf16.mxu1 %v7354_v13 }
 0x335   : > { %4184 = vmatmul.mubr.msk.bf16.gmra.mrb[76].mxu1 %vm539_vm1, %v4271_v2 }
 0x336   : > { %3303 = vmatprep.mubr.bf16.mxu1 %v7354_v13 }
 0x33d   : > { %4185 = vmatmul.mubr.msk.bf16.gmra.mrb[80].mxu1 %vm539_vm1, %v4272_v30 }
 0x33e   : > { %3313 = vmatprep.mubr.bf16.mxu1 %v7354_v13 }
 0x345   : > { %4186 = vmatmul.mubr.msk.bf16.gmra.mrb[84].mxu1 %vm539_vm1, %v4273_v27 }
 0x346   : > { %3323 = vmatprep.mubr.bf16.mxu1 %v7354_v13 }
 0x34d   : > { %4187 = vmatmul.mubr.msk.bf16.gmra.mrb[88].mxu1 %vm539_vm1, %v4274_v4 }
 0x34e   : > { %3333 = vmatprep.mubr.bf16.mxu1 %v7354_v13 }
 0x355   : > { %4188 = vmatmul.mubr.msk.bf16.gmra.mrb[92].mxu1 %vm539_vm1, %v4275_v7 }
 0x356   : > { %3343 = vmatprep.mubr.bf16.mxu1 %v7354_v13 }
 0x35d   : > { %4189 = vmatmul.mubr.msk.bf16.gmra.mrb[96].mxu1 %vm539_vm1, %v4276_v51 }
 0x35e   : > { %3353 = vmatprep.mubr.bf16.mxu1 %v7354_v13 }
 0x365   : > { %4190 = vmatmul.mubr.msk.bf16.gmra.mrb[100].mxu1 %vm539_vm1, %v4277_v24 }
 0x366   : > { %3363 = vmatprep.mubr.bf16.mxu1 %v7354_v13 }
 0x36d   : > { %4191 = vmatmul.mubr.msk.bf16.gmra.mrb[104].mxu1 %vm539_vm1, %v4278_v56 }
 0x36e   : > { %3373 = vmatprep.mubr.bf16.mxu1 %v7354_v13 }
 0x375   : > { %4192 = vmatmul.mubr.msk.bf16.gmra.mrb[108].mxu1 %vm539_vm1, %v4279_v15 }
 0x376   : > { %3383 = vmatprep.mubr.bf16.mxu1 %v7354_v13 }
 0x37d   : > { %4193 = vmatmul.mubr.msk.bf16.gmra.mrb[112].mxu1 %vm539_vm1, %v4280_v29 }
 0x37e   : > { %3393 = vmatprep.mubr.bf16.mxu1 %v7354_v13 }
 0x385   : > { %4194 = vmatmul.mubr.msk.bf16.gmra.mrb[116].mxu1 %vm539_vm1, %v4281_v47 }
 0x386   : > { %3403 = vmatprep.mubr.bf16.mxu1 %v7354_v13 }
 0x38d   : > { %4195 = vmatmul.mubr.msk.bf16.gmra.mrb[120].mxu1 %vm539_vm1, %v4282_v50  ;;  %v4201_v50 = vcombine.high %v7063_v48, %v7063_v48 }
 0x38e   : > { %3413 = vmatprep.mubr.bf16.mxu1 %v7354_v13 }
 0x38f   : > { %3773 = vmatprep.mubr.bf16.mxu0 %v4201_v50 }
 0x395   : > { %4196 = vmatmul.mubr.msk.bf16.gmra.mrb[124].mxu1 %vm539_vm1, %v4283_v40 }
 0x396   : > { %3423 = vmatprep.mubr.bf16.mxu1 %v7354_v13 }
 0x39d   : > { %4197 = vmatmul.mubr.msk.bf16.gmra.mrb[128].mxu1 %vm539_vm1, %v4284_v25 }
 0x39e   : > { %3433 = vmatprep.mubr.bf16.mxu1 %v7354_v13 }
 0x3a5   : > { %4198 = vmatmul.mubr.msk.bf16.gmra.mrb[132].mxu1 %vm539_vm1, %v4285_v22 }
 0x3f8   : > { %v2888_v8 = vpop.f32.mrb[68].mxu1 }
 0x3f9   : > { %v7046_v1 = vadd.f32 %v2888_v8, %v6789_v58  ;;  %v2890_v3 = vpop.f32.mrb[69].mxu1 }
 0x3fa   : > { %v7049_v12 = vadd.f32 %v2890_v3, %v6791_v16  ;;  %v2892_v28 = vpop.f32.mrb[70].mxu1  ;;  %v2976_v16 = vpop.permute.xlu0 %2975 }
 0x3fb   : > { %v2893_v59 = vpop.f32.mrb[71].mxu1 }
 0x3fe   : > { %v2986_v39 = vpop.permute.xlu0 %2985 }
 0x400   : > { %v3285_v26 = vpop.f32.mrb[72].mxu1 }
 0x401   : > { %v3286_v36 = vadd.f32 %v3285_v26, %v2966_v62  ;;  %v3287_v13 = vpop.f32.mrb[73].mxu1 }
 0x402   : > { %v3288_v57 = vadd.f32 %v3287_v13, %v2966_v62  ;;  %v3289_v18 = vpop.f32.mrb[74].mxu1  ;;  %v2996_v28 = vpop.permute.xlu0 %2995 }
 0x403   : > { %v3444_v32 = vmul.f32 0.5, %v3286_v36  ;;  %v3290_v23 = vadd.f32 %v3289_v18, %v2971_v11  ;;  %v3291_v37 = vpop.f32.mrb[75].mxu1  ;;  %v3001_v18 = vpop.permute.xlu1 %3000 }
 0x404   : > { %v3445_v42 = vmul.f32 0.5, %v3288_v57  ;;  %v3292_v0 = vadd.f32 %v3291_v37, %v2971_v11 }
 0x405   : > { %4672 = vtanh.f32 %v3444_v32  ;;  %v3446_v58 = vmul.f32 0.5, %v3290_v23 }
 0x406   : > { %4674 = vtanh.f32 %v3445_v42  ;;  %v3447_v55 = vmul.f32 0.5, %v3292_v0 }
 0x407   : > { %4676 = vtanh.f32 %v3446_v58 }
 0x408   : > { %4678 = vtanh.f32 %v3447_v55  ;;  %v3295_v19 = vpop.f32.mrb[76].mxu1 }
 0x409   : > { %v3296_v43 = vadd.f32 %v3295_v19, %v2976_v16  ;;  %v3297_v9 = vpop.f32.mrb[77].mxu1 }
 0x40a   : > { %v3298_v44 = vadd.f32 %v3297_v9, %v2976_v16  ;;  %v3299_v33 = vpop.f32.mrb[78].mxu1 }
 0x40b   : > { %v7051_v21 = vmul.f32 0.5, %v3296_v43  ;;  %v3300_v52 = vadd.f32 %v3299_v33, %v2981_v31  ;;  %v3301_v10 = vpop.f32.mrb[79].mxu1 }
 0x40c   : > { %v7053_v63 = vmul.f32 0.5, %v3298_v44  ;;  %v3302_v35 = vadd.f32 %v3301_v10, %v2981_v31 }
 0x40d   : > { %4680 = vtanh.f32 %v7051_v21  ;;  %v3450_v20 = vmul.f32 0.5, %v3300_v52 }
 0x40e   : > { %4682 = vtanh.f32 %v7053_v63  ;;  %v7057_v6 = vmul.f32 0.5, %v3302_v35 }
 0x40f   : > { %v4673_v45 = vpop.eup %4672  ;;  %4684 = vtanh.f32 %v3450_v20 }
 0x410   : > { %v4675_v38 = vpop.eup %4674  ;;  %v3572_v5 = vadd.f32 1.0, %v4673_v45  ;;  %4686 = vtanh.f32 %v7057_v6  ;;  %v3305_v17 = vpop.f32.mrb[80].mxu1 }
 0x411   : > { %v4677_v41 = vpop.eup %4676  ;;  %v3573_v46 = vadd.f32 1.0, %v4675_v38  ;;  %v3306_v34 = vadd.f32 %v3305_v17, %v2986_v39  ;;  %v3307_v53 = vpop.f32.mrb[81].mxu1 }
 0x412   : > { %v4679_v14 = vpop.eup %4678  ;;  %v3574_v61 = vadd.f32 1.0, %v4677_v41  ;;  %v3308_v54 = vadd.f32 %v3307_v53, %v2986_v39  ;;  %v3309_v49 = vpop.f32.mrb[82].mxu1  ;;  %v3636_v2 = vmul.f32 %v3572_v5, %v3444_v32 }
 0x413   : > { %v3575_v30 = vadd.f32 1.0, %v4679_v14  ;;  %v7065_v27 = vmul.f32 0.5, %v3306_v34  ;;  %v3310_v4 = vadd.f32 %v3309_v49, %v2991_v60  ;;  %v3311_v7 = vpop.f32.mrb[83].mxu1  ;;  %v3637_v51 = vmul.f32 %v3573_v46, %v3445_v42  ;;  %v3011_v46 = vpop.permute.xlu1 %3010 }
 0x414   : > { %v3638_v24 = vmul.f32 %v3574_v61, %v3446_v58  ;;  %v7067_v56 = vmul.f32 0.5, %v3308_v54  ;;  %v3312_v15 = vadd.f32 %v3311_v7, %v2991_v60 }
 0x415   : > { %v3639_v29 = vmul.f32 %v3575_v30, %v3447_v55  ;;  %4688 = vtanh.f32 %v7065_v27  ;;  %v7070_v47 = vmul.f32 0.5, %v3310_v4 }
 0x416   : > { %v3702_v40 = vpack.c.bf16 %v3638_v24, %v3636_v2  ;;  %4690 = vtanh.f32 %v7067_v56  ;;  %v7075_v25 = vmul.f32 0.5, %v3312_v15 }
 0x417   : > { %v4681_v22 = vpop.eup %4680  ;;  %4692 = vtanh.f32 %v7070_v47  ;;  %v3703_v8 = vpack.c.bf16 %v3639_v29, %v3637_v51 }
 0x418   : > { %v4683_v3 = vpop.eup %4682  ;;  %v3576_v59 = vadd.f32 1.0, %v4681_v22  ;;  %4694 = vtanh.f32 %v7075_v25  ;;  %v3315_v62 = vpop.f32.mrb[84].mxu1 }
 0x419   : > { %v4685_v26 = vpop.eup %4684  ;;  %v3577_v36 = vadd.f32 1.0, %v4683_v3  ;;  %v3316_v13 = vadd.f32 %v3315_v62, %v2996_v28  ;;  %v3317_v11 = vpop.f32.mrb[85].mxu1  ;;  %3741 = vmatprep.subr.bf16.mxu0 %v3703_v8 }
 0x41a   : > { %v4687_v57 = vpop.eup %4686  ;;  %v3578_v32 = vadd.f32 1.0, %v4685_v26  ;;  %v3318_v23 = vadd.f32 %v3317_v11, %v2996_v28  ;;  %v3319_v37 = vpop.f32.mrb[86].mxu1  ;;  %3742 = vmatpush1.bf16.msra.mxu0 %v3702_v40  ;;  %v3640_v16 = vmul.f32 %v3576_v59, %v7051_v21 }
 0x41b   : > { %v3579_v42 = vadd.f32 1.0, %v4687_v57  ;;  %v7079_v0 = vmul.f32 0.5, %v3316_v13  ;;  %v3320_v58 = vadd.f32 %v3319_v37, %v3001_v18  ;;  %v3321_v55 = vpop.f32.mrb[87].mxu1  ;;  %v3641_v31 = vmul.f32 %v3577_v36, %v7053_v63  ;;  %v3021_v26 = vpop.permute.xlu1 %3020 }
 0x41c   : > { %v3642_v19 = vmul.f32 %v3578_v32, %v3450_v20  ;;  %v7082_v43 = vmul.f32 0.5, %v3318_v23  ;;  %v3322_v9 = vadd.f32 %v3321_v55, %v3001_v18  ;;  %v3006_v20 = vpop.permute.xlu0 %3005 }
 0x41d   : > { %v3643_v44 = vmul.f32 %v3579_v42, %v7057_v6  ;;  %4696 = vtanh.f32 %v7079_v0  ;;  %v3458_v33 = vmul.f32 0.5, %v3320_v58 }
 0x41e   : > { %v3704_v52 = vpack.c.bf16 %v3642_v19, %v3640_v16  ;;  %4698 = vtanh.f32 %v7082_v43  ;;  %v7088_v10 = vmul.f32 0.5, %v3322_v9 }
 0x41f   : > { %v4689_v35 = vpop.eup %4688  ;;  %4700 = vtanh.f32 %v3458_v33  ;;  %v3705_v45 = vpack.c.bf16 %v3643_v44, %v3641_v31 }
 0x420   : > { %v4691_v21 = vpop.eup %4690  ;;  %v3580_v38 = vadd.f32 1.0, %v4689_v35  ;;  %4702 = vtanh.f32 %v7088_v10  ;;  %v3325_v39 = vpop.f32.mrb[88].mxu1 }
 0x421   : > { %v4693_v63 = vpop.eup %4692  ;;  %v3581_v5 = vadd.f32 1.0, %v4691_v21  ;;  %v3326_v6 = vadd.f32 %v3325_v39, %v3006_v20  ;;  %v3327_v17 = vpop.f32.mrb[89].mxu1  ;;  %3743 = vmatprep.subr.bf16.mxu0 %v3705_v45 }
 0x422   : > { %v4695_v41 = vpop.eup %4694  ;;  %v3582_v34 = vadd.f32 1.0, %v4693_v63  ;;  %v3328_v53 = vadd.f32 %v3327_v17, %v3006_v20  ;;  %v3329_v14 = vpop.f32.mrb[90].mxu1  ;;  %3744 = vmatpush1.bf16.msra.mxu0 %v3704_v52  ;;  %v3644_v2 = vmul.f32 %v3580_v38, %v7065_v27 }
 0x423   : > { %v3583_v60 = vadd.f32 1.0, %v4695_v41  ;;  %v7091_v61 = vmul.f32 0.5, %v3326_v6  ;;  %v3330_v54 = vadd.f32 %v3329_v14, %v3011_v46  ;;  %v3331_v49 = vpop.f32.mrb[91].mxu1  ;;  %v3645_v51 = vmul.f32 %v3581_v5, %v7067_v56  ;;  %v3031_v63 = vpop.permute.xlu1 %3030 }
 0x424   : > { %v3646_v30 = vmul.f32 %v3582_v34, %v7070_v47  ;;  %v7095_v4 = vmul.f32 0.5, %v3328_v53  ;;  %v3332_v7 = vadd.f32 %v3331_v49, %v3011_v46  ;;  %v3016_v47 = vpop.permute.xlu0 %3015 }
 0x425   : > { %v3647_v24 = vmul.f32 %v3583_v60, %v7075_v25  ;;  %4704 = vtanh.f32 %v7091_v61  ;;  %v3462_v15 = vmul.f32 0.5, %v3330_v54 }
 0x426   : > { %v3706_v29 = vpack.c.bf16 %v3646_v30, %v3644_v2  ;;  %4706 = vtanh.f32 %v7095_v4  ;;  %v7101_v50 = vmul.f32 0.5, %v3332_v7 }
 0x427   : > { %v4697_v40 = vpop.eup %4696  ;;  %4708 = vtanh.f32 %v3462_v15  ;;  %v3707_v27 = vpack.c.bf16 %v3647_v24, %v3645_v51 }
 0x428   : > { %v4699_v22 = vpop.eup %4698  ;;  %v3584_v8 = vadd.f32 1.0, %v4697_v40  ;;  %4710 = vtanh.f32 %v7101_v50  ;;  %v3335_v3 = vpop.f32.mrb[92].mxu1 }
 0x429   : > { %v4701_v56 = vpop.eup %4700  ;;  %v3585_v28 = vadd.f32 1.0, %v4699_v22  ;;  %v3336_v25 = vadd.f32 %v3335_v3, %v3016_v47  ;;  %v3337_v59 = vpop.f32.mrb[93].mxu1  ;;  %3745 = vmatprep.subr.bf16.mxu0 %v3707_v27 }
 0x42a   : > { %v4703_v62 = vpop.eup %4702  ;;  %v3586_v36 = vadd.f32 1.0, %v4701_v56  ;;  %v3338_v13 = vadd.f32 %v3337_v59, %v3016_v47  ;;  %v3339_v11 = vpop.f32.mrb[94].mxu1  ;;  %3746 = vmatpush1.bf16.msra.mxu0 %v3706_v29  ;;  %v3648_v37 = vmul.f32 %v3584_v8, %v7079_v0 }
 0x42b   : > { %v3587_v57 = vadd.f32 1.0, %v4703_v62  ;;  %v7104_v18 = vmul.f32 0.5, %v3336_v25  ;;  %v3340_v32 = vadd.f32 %v3339_v11, %v3021_v26  ;;  %v3341_v23 = vpop.f32.mrb[95].mxu1  ;;  %v3649_v16 = vmul.f32 %v3585_v28, %v7082_v43  ;;  %v3041_v56 = vpop.permute.xlu1 %3040 }
 0x42c   : > { %v3650_v42 = vmul.f32 %v3586_v36, %v3458_v33  ;;  %v7107_v58 = vmul.f32 0.5, %v3338_v13  ;;  %v3342_v55 = vadd.f32 %v3341_v23, %v3021_v26  ;;  %v3026_v33 = vpop.permute.xlu0 %3025 }
 0x42d   : > { %v3651_v19 = vmul.f32 %v3587_v57, %v7088_v10  ;;  %4712 = vtanh.f32 %v7104_v18  ;;  %v3466_v9 = vmul.f32 0.5, %v3340_v32 }
 0x42e   : > { %v3708_v31 = vpack.c.bf16 %v3650_v42, %v3648_v37  ;;  %4714 = vtanh.f32 %v7107_v58  ;;  %v7113_v44 = vmul.f32 0.5, %v3342_v55 }
 0x42f   : > { %v4705_v52 = vpop.eup %4704  ;;  %4716 = vtanh.f32 %v3466_v9  ;;  %v3709_v35 = vpack.c.bf16 %v3651_v19, %v3649_v16 }
 0x430   : > { %v4707_v0 = vpop.eup %4706  ;;  %v3588_v45 = vadd.f32 1.0, %v4705_v52  ;;  %4718 = vtanh.f32 %v7113_v44  ;;  %v3345_v21 = vpop.f32.mrb[96].mxu1 }
 0x431   : > { %v4709_v43 = vpop.eup %4708  ;;  %v3589_v20 = vadd.f32 1.0, %v4707_v0  ;;  %v3346_v10 = vadd.f32 %v3345_v21, %v3026_v33  ;;  %v3347_v38 = vpop.f32.mrb[97].mxu1  ;;  %3747 = vmatprep.subr.bf16.mxu0 %v3709_v35 }
 0x432   : > { %v4711_v39 = vpop.eup %4710  ;;  %v3590_v5 = vadd.f32 1.0, %v4709_v43  ;;  %v3348_v6 = vadd.f32 %v3347_v38, %v3026_v33  ;;  %v3349_v17 = vpop.f32.mrb[98].mxu1  ;;  %3748 = vmatpush1.bf16.msra.mxu0 %v3708_v31  ;;  %v3652_v14 = vmul.f32 %v3588_v45, %v7091_v61 }
 0x433   : > { %v3591_v41 = vadd.f32 1.0, %v4711_v39  ;;  %v7116_v46 = vmul.f32 0.5, %v3346_v10  ;;  %v3350_v34 = vadd.f32 %v3349_v17, %v3031_v63  ;;  %v3351_v53 = vpop.f32.mrb[99].mxu1  ;;  %v3653_v2 = vmul.f32 %v3589_v20, %v7095_v4  ;;  %v3051_v43 = vpop.permute.xlu1 %3050 }
 0x434   : > { %v3654_v60 = vmul.f32 %v3590_v5, %v3462_v15  ;;  %v7119_v54 = vmul.f32 0.5, %v3348_v6  ;;  %v3352_v49 = vadd.f32 %v3351_v53, %v3031_v63  ;;  %v3036_v15 = vpop.permute.xlu0 %3035 }
 0x435   : > { %v3655_v30 = vmul.f32 %v3591_v41, %v7101_v50  ;;  %4720 = vtanh.f32 %v7116_v46  ;;  %v3470_v7 = vmul.f32 0.5, %v3350_v34 }
 0x436   : > { %v3710_v51 = vpack.c.bf16 %v3654_v60, %v3652_v14  ;;  %4722 = vtanh.f32 %v7119_v54  ;;  %v7125_v24 = vmul.f32 0.5, %v3352_v49 }
 0x437   : > { %v4713_v29 = vpop.eup %4712  ;;  %4724 = vtanh.f32 %v3470_v7  ;;  %v3711_v40 = vpack.c.bf16 %v3655_v30, %v3653_v2 }
 0x438   : > { %v4715_v61 = vpop.eup %4714  ;;  %v3592_v27 = vadd.f32 1.0, %v4713_v29  ;;  %4726 = vtanh.f32 %v7125_v24  ;;  %v3355_v22 = vpop.f32.mrb[100].mxu1 }
 0x439   : > { %v4717_v4 = vpop.eup %4716  ;;  %v3593_v47 = vadd.f32 1.0, %v4715_v61  ;;  %v3356_v50 = vadd.f32 %v3355_v22, %v3036_v15  ;;  %v3357_v8 = vpop.f32.mrb[101].mxu1  ;;  %3749 = vmatprep.subr.bf16.mxu0 %v3711_v40 }
 0x43a   : > { %v4719_v3 = vpop.eup %4718  ;;  %v3594_v28 = vadd.f32 1.0, %v4717_v4  ;;  %v3358_v25 = vadd.f32 %v3357_v8, %v3036_v15  ;;  %v3359_v59 = vpop.f32.mrb[102].mxu1  ;;  %3750 = vmatpush1.bf16.msra.mxu0 %v3710_v51  ;;  %v3656_v11 = vmul.f32 %v3592_v27, %v7104_v18 }
 0x43b   : > { %v3595_v62 = vadd.f32 1.0, %v4719_v3  ;;  %v7128_v26 = vmul.f32 0.5, %v3356_v50  ;;  %v3360_v36 = vadd.f32 %v3359_v59, %v3041_v56  ;;  %v3361_v13 = vpop.f32.mrb[103].mxu1  ;;  %v3657_v37 = vmul.f32 %v3593_v47, %v7107_v58  ;;  %v3061_v4 = vpop.permute.xlu1 %3060 }
 0x43c   : > { %v3658_v57 = vmul.f32 %v3594_v28, %v3466_v9  ;;  %v7131_v32 = vmul.f32 0.5, %v3358_v25  ;;  %v3362_v23 = vadd.f32 %v3361_v13, %v3041_v56  ;;  %v3046_v9 = vpop.permute.xlu0 %3045 }
 0x43d   : > { %v3659_v42 = vmul.f32 %v3595_v62, %v7113_v44  ;;  %4728 = vtanh.f32 %v7128_v26  ;;  %v3474_v55 = vmul.f32 0.5, %v3360_v36 }
 0x43e   : > { %v3712_v16 = vpack.c.bf16 %v3658_v57, %v3656_v11  ;;  %4730 = vtanh.f32 %v7131_v32  ;;  %v7137_v19 = vmul.f32 0.5, %v3362_v23 }
 0x43f   : > { %v4721_v31 = vpop.eup %4720  ;;  %4732 = vtanh.f32 %v3474_v55  ;;  %v3713_v52 = vpack.c.bf16 %v3659_v42, %v3657_v37 }
 0x440   : > { %v4723_v18 = vpop.eup %4722  ;;  %v3596_v35 = vadd.f32 1.0, %v4721_v31  ;;  %4734 = vtanh.f32 %v7137_v19  ;;  %v3365_v0 = vpop.f32.mrb[104].mxu1 }
 0x441   : > { %v4725_v58 = vpop.eup %4724  ;;  %v3597_v33 = vadd.f32 1.0, %v4723_v18  ;;  %v3366_v44 = vadd.f32 %v3365_v0, %v3046_v9  ;;  %v3367_v45 = vpop.f32.mrb[105].mxu1  ;;  %3751 = vmatprep.subr.bf16.mxu0 %v3713_v52 }
 0x442   : > { %v4727_v21 = vpop.eup %4726  ;;  %v3598_v20 = vadd.f32 1.0, %v4725_v58  ;;  %v3368_v10 = vadd.f32 %v3367_v45, %v3046_v9  ;;  %v3369_v38 = vpop.f32.mrb[106].mxu1  ;;  %3752 = vmatpush1.bf16.msra.mxu0 %v3712_v16  ;;  %v3660_v17 = vmul.f32 %v3596_v35, %v7116_v46 }
 0x443   : > { %v3599_v39 = vadd.f32 1.0, %v4727_v21  ;;  %v7140_v63 = vmul.f32 0.5, %v3366_v44  ;;  %v3370_v5 = vadd.f32 %v3369_v38, %v3051_v43  ;;  %v3371_v6 = vpop.f32.mrb[107].mxu1  ;;  %v3661_v14 = vmul.f32 %v3597_v33, %v7119_v54  ;;  %v3071_v58 = vpop.permute.xlu1 %3070 }
 0x444   : > { %v3662_v41 = vmul.f32 %v3598_v20, %v3470_v7  ;;  %v7143_v34 = vmul.f32 0.5, %v3368_v10  ;;  %v3372_v53 = vadd.f32 %v3371_v6, %v3051_v43  ;;  %v3056_v7 = vpop.permute.xlu0 %3055 }
 0x445   : > { %v3663_v60 = vmul.f32 %v3599_v39, %v7125_v24  ;;  %4736 = vtanh.f32 %v7140_v63  ;;  %v3478_v49 = vmul.f32 0.5, %v3370_v5 }
 0x446   : > { %v3714_v2 = vpack.c.bf16 %v3662_v41, %v3660_v17  ;;  %4738 = vtanh.f32 %v7143_v34  ;;  %v7149_v30 = vmul.f32 0.5, %v3372_v53 }
 0x447   : > { %v4729_v51 = vpop.eup %4728  ;;  %4740 = vtanh.f32 %v3478_v49  ;;  %v3715_v29 = vpack.c.bf16 %v3663_v60, %v3661_v14 }
 0x448   : > { %v4731_v46 = vpop.eup %4730  ;;  %v3600_v40 = vadd.f32 1.0, %v4729_v51  ;;  %4742 = vtanh.f32 %v7149_v30  ;;  %v3375_v61 = vpop.f32.mrb[108].mxu1 }
 0x449   : > { %v4733_v54 = vpop.eup %4732  ;;  %v3601_v15 = vadd.f32 1.0, %v4731_v46  ;;  %v3376_v24 = vadd.f32 %v3375_v61, %v3056_v7  ;;  %v3377_v27 = vpop.f32.mrb[109].mxu1  ;;  %3753 = vmatprep.subr.bf16.mxu0 %v3715_v29 }
 0x44a   : > { %v4735_v22 = vpop.eup %4734  ;;  %v3602_v47 = vadd.f32 1.0, %v4733_v54  ;;  %v3378_v50 = vadd.f32 %v3377_v27, %v3056_v7  ;;  %v3379_v8 = vpop.f32.mrb[110].mxu1  ;;  %3754 = vmatpush1.bf16.msra.mxu0 %v3714_v2  ;;  %v3664_v59 = vmul.f32 %v3600_v40, %v7128_v26 }
 0x44b   : > { %v3603_v3 = vadd.f32 1.0, %v4735_v22  ;;  %v7152_v56 = vmul.f32 0.5, %v3376_v24  ;;  %v3380_v28 = vadd.f32 %v3379_v8, %v3061_v4  ;;  %v3381_v25 = vpop.f32.mrb[111].mxu1  ;;  %v3665_v11 = vmul.f32 %v3601_v15, %v7131_v32  ;;  %v3081_v54 = vpop.permute.xlu1 %3080 }
 0x44c   : > { %v3666_v62 = vmul.f32 %v3602_v47, %v3474_v55  ;;  %v7155_v36 = vmul.f32 0.5, %v3378_v50  ;;  %v3382_v13 = vadd.f32 %v3381_v25, %v3061_v4  ;;  %v3066_v55 = vpop.permute.xlu0 %3065 }
 0x44d   : > { %v3667_v57 = vmul.f32 %v3603_v3, %v7137_v19  ;;  %4744 = vtanh.f32 %v7152_v56  ;;  %v3482_v23 = vmul.f32 0.5, %v3380_v28 }
 0x44e   : > { %v3716_v37 = vpack.c.bf16 %v3666_v62, %v3664_v59  ;;  %4746 = vtanh.f32 %v7155_v36  ;;  %v7161_v42 = vmul.f32 0.5, %v3382_v13 }
 0x44f   : > { %v4737_v16 = vpop.eup %4736  ;;  %4748 = vtanh.f32 %v3482_v23  ;;  %v3717_v31 = vpack.c.bf16 %v3667_v57, %v3665_v11 }
 0x450   : > { %v4739_v26 = vpop.eup %4738  ;;  %v3604_v52 = vadd.f32 1.0, %v4737_v16  ;;  %4750 = vtanh.f32 %v7161_v42  ;;  %v3385_v18 = vpop.f32.mrb[112].mxu1 }
 0x451   : > { %v4741_v32 = vpop.eup %4740  ;;  %v3605_v9 = vadd.f32 1.0, %v4739_v26  ;;  %v3386_v19 = vadd.f32 %v3385_v18, %v3066_v55  ;;  %v3387_v35 = vpop.f32.mrb[113].mxu1  ;;  %3755 = vmatprep.subr.bf16.mxu0 %v3717_v31 }
 0x452   : > { %v4743_v0 = vpop.eup %4742  ;;  %v3606_v33 = vadd.f32 1.0, %v4741_v32  ;;  %v3388_v44 = vadd.f32 %v3387_v35, %v3066_v55  ;;  %v3389_v45 = vpop.f32.mrb[114].mxu1  ;;  %3756 = vmatpush1.bf16.msra.mxu0 %v3716_v37  ;;  %v3668_v38 = vmul.f32 %v3604_v52, %v7140_v63 }
 0x453   : > { %v3607_v21 = vadd.f32 1.0, %v4743_v0  ;;  %v7164_v43 = vmul.f32 0.5, %v3386_v19  ;;  %v3390_v20 = vadd.f32 %v3389_v45, %v3071_v58  ;;  %v3391_v10 = vpop.f32.mrb[115].mxu1  ;;  %v3669_v17 = vmul.f32 %v3605_v9, %v7143_v34  ;;  %v3091_v32 = vpop.permute.xlu1 %3090 }
 0x454   : > { %v3670_v39 = vmul.f32 %v3606_v33, %v3478_v49  ;;  %v7167_v5 = vmul.f32 0.5, %v3388_v44  ;;  %v3392_v6 = vadd.f32 %v3391_v10, %v3071_v58  ;;  %v3076_v49 = vpop.permute.xlu0 %3075 }
 0x455   : > { %v3671_v41 = vmul.f32 %v3607_v21, %v7149_v30  ;;  %4752 = vtanh.f32 %v7164_v43  ;;  %v3486_v53 = vmul.f32 0.5, %v3390_v20 }
 0x456   : > { %v3718_v14 = vpack.c.bf16 %v3670_v39, %v3668_v38  ;;  %4754 = vtanh.f32 %v7167_v5  ;;  %v7173_v60 = vmul.f32 0.5, %v3392_v6 }
 0x457   : > { %v4745_v2 = vpop.eup %4744  ;;  %4756 = vtanh.f32 %v3486_v53  ;;  %v3719_v51 = vpack.c.bf16 %v3671_v41, %v3669_v17 }
 0x458   : > { %v4747_v63 = vpop.eup %4746  ;;  %v3608_v29 = vadd.f32 1.0, %v4745_v2  ;;  %4758 = vtanh.f32 %v7173_v60  ;;  %v3395_v46 = vpop.f32.mrb[116].mxu1 }
 0x459   : > { %v4749_v34 = vpop.eup %4748  ;;  %v3609_v7 = vadd.f32 1.0, %v4747_v63  ;;  %v3396_v30 = vadd.f32 %v3395_v46, %v3076_v49  ;;  %v3397_v40 = vpop.f32.mrb[117].mxu1  ;;  %3757 = vmatprep.subr.bf16.mxu0 %v3719_v51 }
 0x45a   : > { %v4751_v61 = vpop.eup %4750  ;;  %v3610_v15 = vadd.f32 1.0, %v4749_v34  ;;  %v3398_v24 = vadd.f32 %v3397_v40, %v3076_v49  ;;  %v3399_v27 = vpop.f32.mrb[118].mxu1  ;;  %3758 = vmatpush1.bf16.msra.mxu0 %v3718_v14  ;;  %v3672_v8 = vmul.f32 %v3608_v29, %v7152_v56 }
 0x45b   : > { %v3611_v22 = vadd.f32 1.0, %v4751_v61  ;;  %v7176_v4 = vmul.f32 0.5, %v3396_v30  ;;  %v3400_v47 = vadd.f32 %v3399_v27, %v3081_v54  ;;  %v3401_v50 = vpop.f32.mrb[119].mxu1  ;;  %v3673_v59 = vmul.f32 %v3609_v7, %v7155_v36  ;;  %v3101_v34 = vpop.permute.xlu1 %3100 }
 0x45c   : > { %v3674_v3 = vmul.f32 %v3610_v15, %v3482_v23  ;;  %v7179_v28 = vmul.f32 0.5, %v3398_v24  ;;  %v3402_v25 = vadd.f32 %v3401_v50, %v3081_v54  ;;  %v3086_v23 = vpop.permute.xlu0 %3085 }
 0x45d   : > { %v3675_v62 = vmul.f32 %v3611_v22, %v7161_v42  ;;  %4760 = vtanh.f32 %v7176_v4  ;;  %v3490_v13 = vmul.f32 0.5, %v3400_v47 }
 0x45e   : > { %v3720_v11 = vpack.c.bf16 %v3674_v3, %v3672_v8  ;;  %4762 = vtanh.f32 %v7179_v28  ;;  %v7185_v57 = vmul.f32 0.5, %v3402_v25 }
 0x45f   : > { %v4753_v37 = vpop.eup %4752  ;;  %4764 = vtanh.f32 %v3490_v13  ;;  %v3721_v16 = vpack.c.bf16 %v3675_v62, %v3673_v59 }
 0x460   : > { %v4755_v56 = vpop.eup %4754  ;;  %v3612_v31 = vadd.f32 1.0, %v4753_v37  ;;  %4766 = vtanh.f32 %v7185_v57  ;;  %v3405_v26 = vpop.f32.mrb[120].mxu1 }
 0x461   : > { %v4757_v36 = vpop.eup %4756  ;;  %v3613_v55 = vadd.f32 1.0, %v4755_v56  ;;  %v3406_v42 = vadd.f32 %v3405_v26, %v3086_v23  ;;  %v3407_v52 = vpop.f32.mrb[121].mxu1  ;;  %3759 = vmatprep.subr.bf16.mxu0 %v3721_v16 }
 0x462   : > { %v4759_v18 = vpop.eup %4758  ;;  %v3614_v9 = vadd.f32 1.0, %v4757_v36  ;;  %v3408_v19 = vadd.f32 %v3407_v52, %v3086_v23  ;;  %v3409_v35 = vpop.f32.mrb[122].mxu1  ;;  %3760 = vmatpush1.bf16.msra.mxu0 %v3720_v11  ;;  %v3676_v45 = vmul.f32 %v3612_v31, %v7164_v43 }
 0x463   : > { %v3615_v0 = vadd.f32 1.0, %v4759_v18  ;;  %v7188_v58 = vmul.f32 0.5, %v3406_v42  ;;  %v3410_v33 = vadd.f32 %v3409_v35, %v3091_v32  ;;  %v3411_v44 = vpop.f32.mrb[123].mxu1  ;;  %v3677_v38 = vmul.f32 %v3613_v55, %v7167_v5  ;;  %v3111_v36 = vpop.permute.xlu1 %3110 }
 0x464   : > { %v3678_v21 = vmul.f32 %v3614_v9, %v3486_v53  ;;  %v7191_v20 = vmul.f32 0.5, %v3408_v19  ;;  %v3412_v10 = vadd.f32 %v3411_v44, %v3091_v32  ;;  %v3096_v53 = vpop.permute.xlu0 %3095 }
 0x465   : > { %v3679_v39 = vmul.f32 %v3615_v0, %v7173_v60  ;;  %4768 = vtanh.f32 %v7188_v58  ;;  %v3494_v6 = vmul.f32 0.5, %v3410_v33 }
 0x466   : > { %v3722_v17 = vpack.c.bf16 %v3678_v21, %v3676_v45  ;;  %4770 = vtanh.f32 %v7191_v20  ;;  %v7197_v41 = vmul.f32 0.5, %v3412_v10 }
 0x467   : > { %v4761_v14 = vpop.eup %4760  ;;  %4772 = vtanh.f32 %v3494_v6  ;;  %v3723_v2 = vpack.c.bf16 %v3679_v39, %v3677_v38 }
 0x468   : > { %v4763_v43 = vpop.eup %4762  ;;  %v3616_v51 = vadd.f32 1.0, %v4761_v14  ;;  %4774 = vtanh.f32 %v7197_v41  ;;  %v3415_v63 = vpop.f32.mrb[124].mxu1 }
 0x469   : > { %v4765_v5 = vpop.eup %4764  ;;  %v3617_v49 = vadd.f32 1.0, %v4763_v43  ;;  %v3416_v60 = vadd.f32 %v3415_v63, %v3096_v53  ;;  %v3417_v29 = vpop.f32.mrb[125].mxu1  ;;  %3761 = vmatprep.subr.bf16.mxu0 %v3723_v2 }
 0x46a   : > { %v4767_v46 = vpop.eup %4766  ;;  %v3618_v7 = vadd.f32 1.0, %v4765_v5  ;;  %v3418_v30 = vadd.f32 %v3417_v29, %v3096_v53  ;;  %v3419_v40 = vpop.f32.mrb[126].mxu1  ;;  %3762 = vmatpush1.bf16.msra.mxu0 %v3722_v17  ;;  %v3680_v27 = vmul.f32 %v3616_v51, %v7176_v4 }
 0x46b   : > { %v3619_v61 = vadd.f32 1.0, %v4767_v46  ;;  %v7200_v54 = vmul.f32 0.5, %v3416_v60  ;;  %v3420_v15 = vadd.f32 %v3419_v40, %v3101_v34  ;;  %v3421_v24 = vpop.f32.mrb[127].mxu1  ;;  %v3681_v8 = vmul.f32 %v3617_v49, %v7179_v28 }
 0x46c   : > { %v3682_v22 = vmul.f32 %v3618_v7, %v3490_v13  ;;  %v7203_v47 = vmul.f32 0.5, %v3418_v30  ;;  %v3422_v50 = vadd.f32 %v3421_v24, %v3101_v34  ;;  %v3106_v13 = vpop.permute.xlu0 %3105 }
 0x46d   : > { %v3683_v3 = vmul.f32 %v3619_v61, %v7185_v57  ;;  %4776 = vtanh.f32 %v7200_v54  ;;  %v3498_v25 = vmul.f32 0.5, %v3420_v15 }
 0x46e   : > { %v3724_v59 = vpack.c.bf16 %v3682_v22, %v3680_v27  ;;  %4778 = vtanh.f32 %v7203_v47  ;;  %v7209_v62 = vmul.f32 0.5, %v3422_v50 }
 0x46f   : > { %v4769_v11 = vpop.eup %4768  ;;  %4780 = vtanh.f32 %v3498_v25  ;;  %v3725_v37 = vpack.c.bf16 %v3683_v3, %v3681_v8 }
 0x470   : > { %v4771_v4 = vpop.eup %4770  ;;  %v3620_v16 = vadd.f32 1.0, %v4769_v11  ;;  %4782 = vtanh.f32 %v7209_v62  ;;  %v3425_v56 = vpop.f32.mrb[128].mxu1 }
 0x471   : > { %v4773_v28 = vpop.eup %4772  ;;  %v3621_v23 = vadd.f32 1.0, %v4771_v4  ;;  %v3426_v57 = vadd.f32 %v3425_v56, %v3106_v13  ;;  %v3427_v31 = vpop.f32.mrb[129].mxu1  ;;  %3763 = vmatprep.subr.bf16.mxu0 %v3725_v37 }
 0x472   : > { %v4775_v26 = vpop.eup %4774  ;;  %v3622_v55 = vadd.f32 1.0, %v4773_v28  ;;  %v3428_v42 = vadd.f32 %v3427_v31, %v3106_v13  ;;  %v3429_v52 = vpop.f32.mrb[130].mxu1  ;;  %3764 = vmatpush1.bf16.msra.mxu0 %v3724_v59  ;;  %v3684_v35 = vmul.f32 %v3620_v16, %v7188_v58 }
 0x473   : > { %v3623_v18 = vadd.f32 1.0, %v4775_v26  ;;  %v3500_v32 = vmul.f32 0.5, %v3426_v57  ;;  %v3430_v9 = vadd.f32 %v3429_v52, %v3111_v36  ;;  %v3431_v19 = vpop.f32.mrb[131].mxu1  ;;  %v3685_v45 = vmul.f32 %v3621_v23, %v7191_v20  ;;  %v3116_v43 = vpop.permute.xlu0 %3115 }
 0x474   : > { %v3686_v0 = vmul.f32 %v3622_v55, %v3494_v6  ;;  %v3501_v33 = vmul.f32 0.5, %v3428_v42  ;;  %v3432_v44 = vadd.f32 %v3431_v19, %v3111_v36 }
 0x475   : > { %v3687_v21 = vmul.f32 %v3623_v18, %v7197_v41  ;;  %4784 = vtanh.f32 %v3500_v32  ;;  %v3502_v10 = vmul.f32 0.5, %v3430_v9  ;;  %v3121_v41 = vpop.permute.xlu1 %3120 }
 0x476   : > { %v3726_v38 = vpack.c.bf16 %v3686_v0, %v3684_v35  ;;  %4786 = vtanh.f32 %v3501_v33  ;;  %v3503_v39 = vmul.f32 0.5, %v3432_v44 }
 0x477   : > { %v4777_v17 = vpop.eup %4776  ;;  %4788 = vtanh.f32 %v3502_v10  ;;  %v3727_v14 = vpack.c.bf16 %v3687_v21, %v3685_v45 }
 0x478   : > { %v4779_v2 = vpop.eup %4778  ;;  %v3624_v53 = vadd.f32 1.0, %v4777_v17  ;;  %4790 = vtanh.f32 %v3503_v39  ;;  %v3435_v58 = vpop.f32.mrb[132].mxu1 }
 0x479   : > { %v4781_v6 = vpop.eup %4780  ;;  %v3625_v51 = vadd.f32 1.0, %v4779_v2  ;;  %v3436_v63 = vadd.f32 %v3435_v58, %v3116_v43  ;;  %v3437_v5 = vpop.f32.mrb[133].mxu1  ;;  %3765 = vmatprep.subr.bf16.mxu0 %v3727_v14 }
 0x47a   : > { %v4783_v20 = vpop.eup %4782  ;;  %v3626_v49 = vadd.f32 1.0, %v4781_v6  ;;  %v3438_v60 = vadd.f32 %v3437_v5, %v3116_v43  ;;  %v3439_v29 = vpop.f32.mrb[134].mxu1  ;;  %3766 = vmatpush1.bf16.msra.mxu0 %v3726_v38  ;;  %v3688_v40 = vmul.f32 %v3624_v53, %v7200_v54 }
 0x47b   : > { %v3627_v46 = vadd.f32 1.0, %v4783_v20  ;;  %v3504_v34 = vmul.f32 0.5, %v3436_v63  ;;  %v3440_v7 = vadd.f32 %v3439_v29, %v3121_v41  ;;  %v3441_v30 = vpop.f32.mrb[135].mxu1  ;;  %v3689_v27 = vmul.f32 %v3625_v51, %v7203_v47  ;;  %v3788_v17 = vpop.permute.xlu0 %3787 }
 0x47c   : > { %v3690_v61 = vmul.f32 %v3626_v49, %v3498_v25  ;;  %v3505_v15 = vmul.f32 0.5, %v3438_v60  ;;  %v3442_v24 = vadd.f32 %v3441_v30, %v3121_v41 }
 0x47d   : > { %v3691_v22 = vmul.f32 %v3627_v46, %v7209_v62  ;;  %4792 = vtanh.f32 %v3504_v34  ;;  %v3506_v50 = vmul.f32 0.5, %v3440_v7 }
 0x47e   : > { %v3728_v8 = vpack.c.bf16 %v3690_v61, %v3688_v40  ;;  %4794 = vtanh.f32 %v3505_v15  ;;  %v3507_v3 = vmul.f32 0.5, %v3442_v24 }
 0x47f   : > { %v4785_v59 = vpop.eup %4784  ;;  %4796 = vtanh.f32 %v3506_v50  ;;  %v3729_v11 = vpack.c.bf16 %v3691_v22, %v3689_v27 }
 0x480   : > { %v4787_v37 = vpop.eup %4786  ;;  %v3628_v4 = vadd.f32 1.0, %v4785_v59  ;;  %4798 = vtanh.f32 %v3507_v3 }
 0x481   : > { %v4789_v13 = vpop.eup %4788  ;;  %v3629_v54 = vadd.f32 1.0, %v4787_v37  ;;  %3767 = vmatprep.subr.bf16.mxu0 %v3729_v11 }
 0x482   : > { %v4791_v25 = vpop.eup %4790  ;;  %v3630_v16 = vadd.f32 1.0, %v4789_v13  ;;  %3768 = vmatpush1.bf16.msra.mxu0 %v3728_v8  ;;  %v3692_v56 = vmul.f32 %v3628_v4, %v3500_v32 }
 0x483   : > { %v3631_v47 = vadd.f32 1.0, %v4791_v25  ;;  %v3693_v28 = vmul.f32 %v3629_v54, %v3501_v33  ;;  %v4200_v33 = vcombine.low %v7063_v48, %v7063_v48 }
 0x484   : > { %v3694_v62 = vmul.f32 %v3630_v16, %v3502_v10 }
 0x485   : > { %v3695_v23 = vmul.f32 %v3631_v47, %v3503_v39 }
 0x486   : > { %v3730_v57 = vpack.c.bf16 %v3694_v62, %v3692_v56 }
 0x487   : > { %v4793_v31 = vpop.eup %4792  ;;  %v3731_v26 = vpack.c.bf16 %v3695_v23, %v3693_v28 }
 0x488   : > { %v4795_v36 = vpop.eup %4794  ;;  %v3632_v55 = vadd.f32 1.0, %v4793_v31 }
 0x489   : > { %v4797_v42 = vpop.eup %4796  ;;  %v3633_v52 = vadd.f32 1.0, %v4795_v36  ;;  %3769 = vmatprep.subr.bf16.mxu0 %v3731_v26 }
 0x48a   : > { %v4799_v18 = vpop.eup %4798  ;;  %v3634_v9 = vadd.f32 1.0, %v4797_v42  ;;  %3770 = vmatpush1.bf16.msra.mxu0 %v3730_v57  ;;  %v3696_v35 = vmul.f32 %v3632_v55, %v3504_v34 }
 0x48b   : > { %v3635_v19 = vadd.f32 1.0, %v4799_v18  ;;  %v3697_v44 = vmul.f32 %v3633_v52, %v3505_v15 }
 0x48c   : > { %v3698_v0 = vmul.f32 %v3634_v9, %v3506_v50 }
 0x48d   : > { %v3699_v45 = vmul.f32 %v3635_v19, %v3507_v3 }
 0x48e   : > { %v3732_v32 = vpack.c.bf16 %v3698_v0, %v3696_v35 }
 0x48f   : > { %v3733_v21 = vpack.c.bf16 %v3699_v45, %v3697_v44 }
 0x491   : > { %3771 = vmatprep.subr.bf16.mxu0 %v3733_v21 }
 0x492   : > { %3772 = vmatpush1.bf16.msra.mxu0 %v3732_v32 }
 0x495   : > { %3774 = vmatmul.mubr.bf16.vlgmr.msra.gmra.mrb[132].mxu0 %v4200_v33 }
 0x568   : > { %v3775_v10 = vpop.f32.mrb[132].mxu0 }
 0x569   : > { %v3782_v38 = vadd.f32 %v3775_v10, %v7046_v1  ;;  %v3777_v39 = vpop.f32.mrb[133].mxu0 }
 0x56a   : > { %v3783_v14 = vadd.f32 %v3777_v39, %v7049_v12  ;;  %v3779_v2 = vpop.f32.mrb[134].mxu0 }
 0x56b   : > { %v3790_v43 = vadd.f32 %v3788_v17, %v3782_v38  ;;  %v3780_v53 = vpop.f32.mrb[135].mxu0 }
 0x56c   : > { %v3791_v58 = vadd.f32 %v3788_v17, %v3783_v14 }
 0x56d   : > { %v3792_v6 = vmul.f32 0.5, %v3790_v43 }
 0x56e   : > { %v3793_v51 = vmul.f32 0.5, %v3791_v58 }
 0x56f   : > { %4800 = vtanh.f32 %v3792_v6 }
 0x570   : > { %4802 = vtanh.f32 %v3793_v51 }
 0x579   : > { %v4801_v48 = vpop.eup %4800 }
 0x57a   : > { %v4803_v63 = vpop.eup %4802  ;;  %v3796_v5 = vadd.f32 1.0, %v4801_v48 }
 0x57b   : > { %v3797_v1 = vadd.f32 1.0, %v4803_v63 }
 0x57c   : > { %v3798_v20 = vmul.f32 0.5, %v3796_v5 }
 0x57d   : > { %v3799_v41 = vmul.f32 0.5, %v3797_v1 }
 0x57e   : > { %3800 = vst [vmem:[%s226_s6] sm:$0xff] %v3798_v20 }
 0x57f   : > { %3801 = vst [vmem:[%s226_s6 + $0x8] sm:$0xff] %v3799_v41 }
 0x580 PF: > { %s15_s18 = sadd.s32 1, %s4810_s18  }
 0x581   : > { %p12_p4 = scmp.ge.s32.totalorder %s15_s18, 4  }
 0x583   :  { %14 = sbr.rel (!%p12_p4) target bundleno = 1 (0x1), region = 79 }

</bundles_post_ra>
